<compile_context>
chip_gen: v6e
topology: v6e:2x2x1
jax: 0.10.0
libtpu: 0.0.40
codegen_flags: <defaults>
</compile_context>

<pallas_src>
import numpy as np
import jax
import jax.numpy as jnp
from jax.experimental import pallas as pl
from jax.experimental.pallas import tpu as pltpu

NODE_SIZE = 207   # metr-la graph size baked into the module
BATCH = 64        # module repeats the operators to batch 64
N_PAD = 256       # lane / MXU-aligned padded node count


def rd_fused_kernel(x_ref, w_ref, o_ref):
    # x_ref: (B, N_PAD)        padded x, ones column at index NODE_SIZE
    # w_ref: (N_PAD, 2*N_PAD)  [L_r^T | L_d^T] with the bias row at row NODE_SIZE
    # o_ref: (B, N_PAD)
    x = x_ref[...]
    np_ = x.shape[1]
    fused = jnp.dot(x, w_ref[...],
                    preferred_element_type=jnp.float32,
                    precision=jax.lax.Precision.HIGHEST)
    reaction = fused[:, :np_]        # static, lane-aligned (multiple-of-128) slices
    diffusion = fused[:, np_:]
    o_ref[...] = (jnp.tanh(reaction) + diffusion + x).astype(o_ref.dtype)


def build_fused_operator(i_idx, j_idx, weight_react, weight_diff,
                         bias_reaction, bias_diffusion,
                         node_size=NODE_SIZE, n_pad=N_PAD):
    """Builds [L_r^T | L_d^T] padded to (n_pad, 2*n_pad) with both biases folded
    into row `node_size` (picked up by the ones column appended to x).

    Transposed operators are built directly (no explicit transposes):
      L_r^T = diag(rowsum(A)) - A,  A[j_e, i_e] = weight_react[e]
      L_d^T = diag(rowsum(C)) - C,  C[i_e, j_e] = weight_diff[e]
    which equals the module's (diag(colsum(W)) - W)^T.

    Depends only on edge weights / biases — build once and cache across calls.
    """
    # TODO(synk): the sparse-COO edge-list -> dense operator scatter stays in
    # plain JAX/XLA (no clean Pallas TPU scatter equivalent).
    diag = jnp.arange(n_pad)
    a = jnp.zeros((n_pad, n_pad), jnp.float32).at[j_idx, i_idx].add(weight_react[0])
    rwt = (-a).at[diag, diag].add(jnp.sum(a, axis=1))
    c = jnp.zeros((n_pad, n_pad), jnp.float32).at[i_idx, j_idx].add(weight_diff[0])
    dwt = (-c).at[diag, diag].add(jnp.sum(c, axis=1))
    w = jnp.concatenate([rwt, dwt], axis=1)                       # (n_pad, 2*n_pad)
    bias_row = jnp.zeros((2 * n_pad,), jnp.float32)
    bias_row = bias_row.at[:node_size].set(bias_reaction[0])
    bias_row = bias_row.at[n_pad:n_pad + node_size].set(bias_diffusion[0])
    return w.at[node_size, :].set(bias_row)


def reaction_diffusion_forward(x, w_fused, node_size=NODE_SIZE, n_pad=N_PAD):
    """x: (B, node_size) float32; w_fused: output of build_fused_operator."""
    b = x.shape[0]
    # Pad x to the lane-aligned width and append the ones column that selects
    # the folded bias row. (If this op is applied repeatedly, keep x / out
    # persistently padded so this stays out of the hot path.)
    x_pad = (jnp.zeros((b, n_pad), jnp.float32)
             .at[:, :node_size].set(x)
             .at[:, node_size].set(1.0))

    cost = pl.CostEstimate(
        flops=2 * b * n_pad * (2 * n_pad) + 4 * b * n_pad,
        transcendentals=b * n_pad,
        bytes_accessed=4 * (2 * b * n_pad + n_pad * 2 * n_pad),
    )
    out_pad = pl.pallas_call(
        rd_fused_kernel,
        out_shape=jax.ShapeDtypeStruct((b, n_pad), jnp.float32),
        grid=(1,),  # single step: whole problem resident in VMEM, no per-step overhead
        in_specs=[
            pl.BlockSpec((b, n_pad), lambda i: (0, 0)),          # padded x (+ ones col)
            pl.BlockSpec((n_pad, 2 * n_pad), lambda i: (0, 0)),  # [L_r^T | L_d^T] + bias row
        ],
        out_specs=pl.BlockSpec((b, n_pad), lambda i: (0, 0)),
        compiler_params=pltpu.CompilerParams(
            dimension_semantics=("arbitrary",)),
        cost_estimate=cost,
    )(x_pad, w_fused)
    # TODO(synk): on v7x a 2-wide "parallel" column grid could split the weight
    # DMA across the two TensorCores; kept single-step (no win on v5e/v6e).
    return out_pad[:, :node_size]


if __name__ == "__main__":
    N = NODE_SIZE
    B = BATCH

    # Deterministic synthetic edge list standing in for the CSV (ring + skip edges).
    src = np.arange(N, dtype=np.int32)
    i_idx = jnp.asarray(np.concatenate([src, src]))
    j_idx = jnp.asarray(np.concatenate([(src + 1) % N, (src + 5) % N]))
    E = int(i_idx.shape[0])

    key = jax.random.PRNGKey(0)
    k1, k2, k3, k4, kx = jax.random.split(key, 5)
    weight_react = jax.random.normal(k1, (1, E), dtype=jnp.float32) / 10.0
    weight_diff = jax.random.normal(k2, (1, E), dtype=jnp.float32) / 1000.0
    bias_reaction = jax.random.normal(k3, (1, N), dtype=jnp.float32) / 10.0
    bias_diffusion = jax.random.normal(k4, (1, N), dtype=jnp.float32) / 10.0
    x = jax.random.normal(kx, (B, N), dtype=jnp.float32)

    # Build the fused operator once (cacheable across forward calls).
    w_fused = build_fused_operator(i_idx, j_idx, weight_react, weight_diff,
                                   bias_reaction, bias_diffusion)

    out = reaction_diffusion_forward(x, w_fused)
    out = jax.block_until_ready(out)

    # Pure-JAX reference mirroring the PyTorch forward (up=True, down=True path),
    # built from the NON-transposed Laplacians to validate the whole pipeline.
    w_r = jnp.zeros((N, N), jnp.float32).at[i_idx, j_idx].add(weight_react[0])
    l_r = jnp.diag(jnp.sum(w_r, axis=0)) - w_r
    w_d = jnp.zeros((N, N), jnp.float32).at[j_idx, i_idx].add(weight_diff[0])
    l_d = jnp.diag(jnp.sum(w_d, axis=0)) - w_d
    reaction = jnp.einsum("wv,bv->bw", l_r, x, precision="highest") + bias_reaction
    diffusion = jnp.einsum("wv,bv->bw", l_d, x, precision="highest") + bias_diffusion
    ref = jnp.tanh(reaction) + diffusion + x

    assert out.shape == (B, N)
    np.testing.assert_allclose(np.asarray(out), np.asarray(ref),
                               rtol=1e-4, atol=1e-4)

    print("KERNEL_OK")
</pallas_src>

<mosaic_0001>
module attributes {stable_mosaic.version = 11 : i64} {
  func.func @rd_fused_kernel(%arg0: i32, %arg1: memref<64x256xf32, #tpu.memory_space<vmem>>, %arg2: memref<256x512xf32, #tpu.memory_space<vmem>>, %arg3: memref<64x256xf32, #tpu.memory_space<vmem>>) attributes {dimension_semantics = [#tpu.dimension_semantics<arbitrary>], iteration_bounds = array<i64: 1>, scalar_prefetch = 0 : i64, scratch_operands = 0 : i64, tpu.core_type = #tpu.core_type<tc>, window_params = [{pipeline_mode = #tpu.pipeline_mode<synchronous>, transform_indices = @transform_0, window_bounds = array<i64: 64, 256>}, {pipeline_mode = #tpu.pipeline_mode<synchronous>, transform_indices = @transform_1, window_bounds = array<i64: 256, 512>}, {pipeline_mode = #tpu.pipeline_mode<synchronous>, transform_indices = @transform_2, window_bounds = array<i64: 64, 256>}]} {
    %c0 = arith.constant 0 : index
    %c0_0 = arith.constant 0 : index
    %0 = vector.load %arg1[%c0, %c0_0] : memref<64x256xf32, #tpu.memory_space<vmem>>, vector<64x256xf32>
    %c0_1 = arith.constant 0 : index
    %c0_2 = arith.constant 0 : index
    %1 = vector.load %arg2[%c0_1, %c0_2] : memref<256x512xf32, #tpu.memory_space<vmem>>, vector<256x512xf32>
    %cst = arith.constant dense<0.000000e+00> : vector<64x512xf32>
    %2 = tpu.matmul %0, %1, %cst {dimension_numbers = #tpu.dot_dimension_numbers<[1], [0], [0], [1], [0, 0, 1, 1], [], []>, precision = #tpu.contract_precision<fp32>} : vector<64x256xf32>, vector<256x512xf32>, vector<64x512xf32> -> vector<64x512xf32>
    %3 = vector.extract_strided_slice %2 {offsets = [0, 0], sizes = [64, 256], strides = [1, 1]} : vector<64x512xf32> to vector<64x256xf32>
    %4 = vector.extract_strided_slice %2 {offsets = [0, 256], sizes = [64, 256], strides = [1, 1]} : vector<64x512xf32> to vector<64x256xf32>
    %5 = math.tanh %3 : vector<64x256xf32>
    %6 = arith.addf %5, %4 : vector<64x256xf32>
    %7 = arith.addf %6, %0 : vector<64x256xf32>
    %c0_3 = arith.constant 0 : index
    %c0_4 = arith.constant 0 : index
    %8 = vector.load %arg3[%c0_3, %c0_4] : memref<64x256xf32, #tpu.memory_space<vmem>>, vector<64x256xf32>
    tpu.vector_store %arg3[%c0_3, %c0_4], %7 {strides = array<i32>} : memref<64x256xf32, #tpu.memory_space<vmem>>, vector<64x256xf32>,
    return
  }
  func.func @transform_0(%arg0: i32) -> (i32, i32) {
    %c0_i32 = arith.constant 0 : i32
    %c0_i32_0 = arith.constant 0 : i32
    %c0_i32_1 = arith.constant 0 : i32
    return %c0_i32, %c0_i32_0 : i32, i32
  }
  func.func @transform_1(%arg0: i32) -> (i32, i32) {
    %c0_i32 = arith.constant 0 : i32
    %c0_i32_0 = arith.constant 0 : i32
    %c0_i32_1 = arith.constant 0 : i32
    return %c0_i32, %c0_i32_0 : i32, i32
  }
  func.func @transform_2(%arg0: i32) -> (i32, i32) {
    %c0_i32 = arith.constant 0 : i32
    %c0_i32_0 = arith.constant 0 : i32
    %c0_i32_1 = arith.constant 0 : i32
    return %c0_i32, %c0_i32_0 : i32, i32
  }
}

</mosaic_0001>

<bundles_post_ra>
// kernel: tpu_custom_call.1
= control target key start
LH: loop header
LB: loop body
LE: loop exit
PB: predicated region body
PF: predicated region fallthrough
CT: control target
= control target key end

     0   :  { %7 = vsyncpa [#allocation3], 0  ;;  %s6859_s0 = inlined_call_operand.hbm [shape: f32[64,256], index: 0, kind: input, shape index: {}]   ;;  %s6860_s1 = inlined_call_operand.hbm [shape: f32[256,512], index: 1, kind: input, shape index: {}]   ;;  %s6861_s2 = inlined_call_operand.hbm [shape: f32[64,256], index: 2, kind: output, shape index: {}]  }
   0x1   :  { %8 = vsyncpa [#allocation6], 0 }
   0x2   :  { %9 = vsyncpa [#allocation4], 0  ;;  %s3823_s9 = smov [#allocation2]  }
   0x3   :  { %s15_s10 = sshll.u32 %s3823_s9, 4  ;;  %s16_s10 = int_to_ptr.vmem [resolvable:$true] %s15_s10 }
   0x4   :  { %s3765_s11 = scalar_lea.vmem %s16_s10, 2048  ;;  %p3770_p1 = scmp.lt.s32.totalorder %s16_s10, %s16_s10 }
   0x5   :  { %p3766_p0 = scmp.ne.s32.totalorder %s16_s10, %s3765_s11  ;;  %p3771_p2 = scmp.lt.s32.totalorder %s3765_s11, %s3765_s11 }
   0x7   :  { %p3772_p3 = por %p3771_p2, %p3770_p1 }
   0x9   :  { %p3773_p4 = pnand %p3772_p3, %p3766_p0 }
   0xb   :  { %3776 = shalt.err (!%p3773_p4)
}
   0xc   :  { %s3824_s12 = smov 256   ;;  %s3825_s13 = smov 16  }
   0xd   :  { %21 = dma.hbm_to_vmem [thread:$0]  %s6859_s0, 2048, %s16_s10, [#allocation3], %s3824_s12, %s3824_s12, %s3825_s13  }
   0xe   :  { %s3826_s16 = smov [#allocation5]  }
   0xf   :  { %s27_s17 = sshll.u32 %s3826_s16, 4  ;;  %s28_s17 = int_to_ptr.vmem [resolvable:$true] %s27_s17 }
  0x10   :  { %s3785_s18 = scalar_lea.vmem %s28_s17, 16384  ;;  %p3790_p6 = scmp.lt.s32.totalorder %s28_s17, %s28_s17 }
  0x11   :  { %p3786_p5 = scmp.ne.s32.totalorder %s28_s17, %s3785_s18  ;;  %p3791_p7 = scmp.lt.s32.totalorder %s3785_s18, %s3785_s18 }
  0x13   :  { %p3792_p8 = por %p3791_p7, %p3790_p6 }
  0x15   :  { %p3793_p9 = pnand %p3792_p8, %p3786_p5 }
  0x17   :  { %3796 = shalt.err (!%p3793_p9)
}
  0x18   :  { %s3827_s19 = smov 512   ;;  %s3828_s20 = smov 32  }
  0x19   :  { %33 = dma.hbm_to_vmem [thread:$0]  %s6860_s1, 16384, %s28_s17, [#allocation6], %s3827_s19, %s3827_s19, %s3828_s20  }
  0x1a   :  { %3817 = dma.done.wait [#allocation3], 2048  }
  0x1b   :  { %3818 = vsyncadd [#allocation3], 4294965248 }
  0x1c   :  { %3819 = dma.done.wait [#allocation6], 16384  }
  0x1d   :  { %3820 = vsyncadd [#allocation6], 4294950912  ;;  %v117_v0 = vld [vmem:[#allocation5 + $0x1e8] sm:$0xff]  ;;  %v116_v1 = vld [vmem:[#allocation5 + $0x1e0] sm:$0xff]  ;;  %s3829_s0 = smov [#allocation7]  }
  0x1e   :  { %v113_v2 = vld [vmem:[#allocation5 + $0x1c8] sm:$0xff]  ;;  %v3854_v3 = vand.u32 4294901760, %v117_v0  ;;  %v3856_v4 = vand.u32 4294901760, %v116_v1  ;;  %v112_v6 = vld [vmem:[#allocation5 + $0x1c0] sm:$0xff]  ;;  %s3689_s1 = sshll.u32 %s3829_s0, 4  ;;  %s3690_s1 = int_to_ptr.vmem [resolvable:$true] %s3689_s1 }
  0x1f   :  { %v3858_v5 = vand.u32 4294901760, %v113_v2  ;;  %v109_v7 = vld [vmem:[#allocation5 + $0x1a8] sm:$0xff]  ;;  %v108_v8 = vld [vmem:[#allocation5 + $0x1a0] sm:$0xff]  ;;  %v3860_v9 = vand.u32 4294901760, %v112_v6  ;;  %s3797_s23 = scalar_lea.vmem %s3690_s1, 2048  ;;  %p3802_p11 = scmp.lt.s32.totalorder %s3690_s1, %s3690_s1 }
  0x20   :  { %v3862_v10 = vand.u32 4294901760, %v109_v7  ;;  %v3864_v11 = vand.u32 4294901760, %v108_v8  ;;  %v105_v12 = vld [vmem:[#allocation5 + $0x188] sm:$0xff]  ;;  %v104_v13 = vld [vmem:[#allocation5 + $0x180] sm:$0xff]  ;;  %185 = vmatprep.subr.mxu0 %v3854_v3  ;;  %v3874_v18 = vsub.f32 %v117_v0, %v3854_v3  ;;  %v3887_v23 = vsub.f32 %v116_v1, %v3856_v4  ;;  %p3798_p10 = scmp.ne.s32.totalorder %s3690_s1, %s3797_s23  ;;  %p3803_p12 = scmp.lt.s32.totalorder %s3797_s23, %s3797_s23 }
  0x21   :  { %7386 = vst [vmem:[#allocation11_spill] sm:$0xff] %v3860_v9  ;;  %v101_v14 = vld [vmem:[#allocation5 + $0x168] sm:$0xff]  ;;  %v3867_v15 = vand.u32 4294901760, %v105_v12  ;;  %v3869_v16 = vand.u32 4294901760, %v104_v13  ;;  %v3876_v19 = vld [vmem:[#allocation5 + $0x160] sm:$0xff]  ;;  %187 = vmatpush1.msra.mxu0 %v3856_v4  ;;  %v3893_v25 = vsub.f32 %v113_v2, %v3858_v5  ;;  %v3907_v31 = vsub.f32 %v112_v6, %v3860_v9 }
  0x22   :  { %7387 = vst [vmem:[#allocation12_spill] sm:$0xff] %v3862_v10  ;;  %7388 = vst [vmem:[#allocation13_spill] sm:$0xff] %v3864_v11  ;;  %v3871_v17 = vand.u32 4294901760, %v101_v14  ;;  %v3878_v20 = vld [vmem:[#allocation5 + $0x148] sm:$0xff]  ;;  %v3880_v21 = vld [vmem:[#allocation5 + $0x140] sm:$0xff]  ;;  %v3884_v22 = vand.u32 4294901760, %v3876_v19  ;;  %189 = vmatprep.subr.mxu0 %v3858_v5  ;;  %v3916_v35 = vsub.f32 %v109_v7, %v3862_v10  ;;  %v3929_v40 = vsub.f32 %v108_v8, %v3864_v11  ;;  %p3804_p13 = por %p3803_p12, %p3802_p11 }
  0x23   :  { %7389 = vst [vmem:[#allocation14_spill] sm:$0xff] %v3867_v15  ;;  %7390 = vst [vmem:[#allocation15_spill] sm:$0xff] %v3869_v16  ;;  %v3890_v24 = vand.u32 4294901760, %v3878_v20  ;;  %v3895_v26 = vld [vmem:[#allocation5 + $0x128] sm:$0xff]  ;;  %v3897_v27 = vld [vmem:[#allocation5 + $0x120] sm:$0xff]  ;;  %v6875_v29 = vand.u32 4294901760, %v3874_v18  ;;  %191 = vmatpush1.msra.mxu0 %v3860_v9  ;;  %v3943_v45 = vsub.f32 %v105_v12, %v3867_v15  ;;  %v3969_v59 = vsub.f32 %v104_v13, %v3869_v16 }
  0x24   :  { %7391 = vst [vmem:[#allocation16_spill] sm:$0xff] %v3871_v17  ;;  %7392 = vst [vmem:[#allocation17_spill] sm:$0xff] %v3884_v22  ;;  %v3899_v28 = vld [vmem:[#allocation5 + $0x108] sm:$0xff]  ;;  %v3904_v30 = vand.u32 4294901760, %v3880_v21  ;;  %v3910_v32 = vand.u32 4294901760, %v3895_v26  ;;  %v6873_v33 = vand.u32 4294901760, %v3887_v23  ;;  %193 = vmatprep.subr.mxu0 %v3862_v10  ;;  %v3981_v0 = vsub.f32 %v101_v14, %v3871_v17  ;;  %p3805_p0 = pnand %p3804_p13, %p3798_p10 }
  0x25   :  { %7393 = vst [vmem:[#allocation18_spill] sm:$0xff] %v3890_v24  ;;  %v6872_v34 = vand.u32 4294901760, %v3893_v25  ;;  %v3919_v36 = vand.u32 4294901760, %v3897_v27  ;;  %v3921_v37 = vld [vmem:[#allocation5 + $0x100] sm:$0xff]  ;;  %v444_v38 = vsub.f32 %v3874_v18, %v6875_v29  ;;  %v6870_v39 = vand.u32 4294901760, %v3907_v31  ;;  %195 = vmatpush1.msra.mxu0 %v3864_v11  ;;  %v3945_v46 = vld [vmem:[#allocation5 + $0xe8] sm:$0xff] }
  0x26   :  { %7394 = vst [vmem:[#allocation19_spill] sm:$0xff] %v3904_v30  ;;  %7395 = vst [vmem:[#allocation20_spill] sm:$0xff] %v3910_v32  ;;  %v3932_v41 = vand.u32 4294901760, %v3899_v28  ;;  %v450_v42 = vsub.f32 %v3887_v23, %v6873_v33  ;;  %v6868_v44 = vand.u32 4294901760, %v3916_v35  ;;  %197 = vmatprep.subr.mxu0 %v3867_v15  ;;  %v6867_v49 = vand.u32 4294901760, %v3929_v40  ;;  %v3955_v51 = vld [vmem:[#allocation5 + $0xe0] sm:$0xff] }
  0x27   :  { %7396 = vst [vmem:[#allocation21_spill] sm:$0xff] %v3919_v36  ;;  %v456_v43 = vsub.f32 %v3893_v25, %v6872_v34  ;;  %v445_v47 = vand.u32 4294901760, %v444_v38  ;;  %v462_v48 = vsub.f32 %v3907_v31, %v6870_v39  ;;  %v3953_v50 = vand.u32 4294901760, %v3921_v37  ;;  %199 = vmatpush1.msra.mxu0 %v3869_v16  ;;  %v3962_v56 = vld [vmem:[#allocation5 + $0xc8] sm:$0xff]  ;;  %v3974_v61 = vld [vmem:[#allocation5 + $0xc0] sm:$0xff] }
  0x28   :  { %7397 = vst [vmem:[#allocation22_spill] sm:$0xff] %v3932_v41  ;;  %v451_v52 = vand.u32 4294901760, %v450_v42  ;;  %v468_v54 = vsub.f32 %v3916_v35, %v6868_v44  ;;  %v6865_v55 = vand.u32 4294901760, %v3943_v45  ;;  %201 = vmatprep.subr.mxu0 %v3871_v17  ;;  %v474_v58 = vsub.f32 %v3929_v40, %v6867_v49  ;;  %v3986_v2 = vld [vmem:[#allocation5 + $0xa8] sm:$0xff]  ;;  %v3997_v13 = vld [vmem:[#allocation5 + $0xa0] sm:$0xff] }
  0x29   :  { %7398 = vst [vmem:[#allocation23_spill] sm:$0xff] %v3953_v50  ;;  %v457_v53 = vand.u32 4294901760, %v456_v43  ;;  %446 = vmatprep.subr.mxu1 %v445_v47  ;;  %v463_v57 = vand.u32 4294901760, %v462_v48  ;;  %v3972_v60 = vand.u32 4294901760, %v3945_v46  ;;  %203 = vmatpush1.msra.mxu0 %v3884_v22  ;;  %v3984_v1 = vand.u32 4294901760, %v3955_v51  ;;  %v4064_v49 = vld [vmem:[#allocation5 + $0x60] sm:$0xff] }
  0x2a   :  { %452 = vmatpush1.msra.mxu1 %v451_v52  ;;  %v469_v62 = vand.u32 4294901760, %v468_v54  ;;  %v480_v63 = vsub.f32 %v3943_v45, %v6865_v55  ;;  %205 = vmatprep.subr.mxu0 %v3890_v24  ;;  %v475_v6 = vand.u32 4294901760, %v474_v58  ;;  %v6863_v7 = vand.u32 4294901760, %v3969_v59  ;;  %v4077_v39 = vld [vmem:[#allocation5 + $0x48] sm:$0xff]  ;;  %v4087_v34 = vld [vmem:[#allocation5 + $0x40] sm:$0xff] }
  0x2b   :  { %7399 = vst [vmem:[#allocation24_spill] sm:$0xff] %v3972_v60  ;;  %7400 = vst [vmem:[#allocation25_spill] sm:$0xff] %v3984_v1  ;;  %458 = vmatprep.subr.mxu1 %v457_v53  ;;  %v3992_v8 = vsub.f32 %v3876_v19, %v3884_v22  ;;  %v3995_v12 = vand.u32 4294901760, %v3962_v56  ;;  %207 = vmatpush1.msra.mxu0 %v3904_v30  ;;  %v6862_v38 = vand.u32 4294901760, %v3981_v0  ;;  %v4006_v43 = vand.u32 4294901760, %v3974_v61 }
  0x2c   :  { %464 = vmatpush1.msra.mxu1 %v463_v57  ;;  %v481_v14 = vand.u32 4294901760, %v480_v63  ;;  %v4003_v42 = vsub.f32 %v3878_v20, %v3890_v24  ;;  %209 = vmatprep.subr.mxu0 %v3910_v32  ;;  %v486_v19 = vsub.f32 %v3969_v59, %v6863_v7  ;;  %v4015_v48 = vsub.f32 %v3880_v21, %v3904_v30  ;;  %v4020_v20 = vld [vmem:[#allocation5 + $0x88] sm:$0xff] }
  0x2d   :  { %7401 = vst [vmem:[#allocation26_spill] sm:$0xff] %v3995_v12  ;;  %7402 = vst [vmem:[#allocation27_spill] sm:$0xff] %v4006_v43  ;;  %470 = vmatprep.subr.mxu1 %v469_v62  ;;  %v6864_v47 = vand.u32 4294901760, %v3992_v8  ;;  %v4018_v52 = vand.u32 4294901760, %v3986_v2  ;;  %211 = vmatpush1.msra.mxu0 %v3919_v36  ;;  %v492_v53 = vsub.f32 %v3981_v0, %v6862_v38  ;;  %v4032_v21 = vand.u32 4294901760, %v3997_v13  ;;  %v4043_v38 = vld [vmem:[#allocation5 + $0x80] sm:$0xff] }
  0x2e   :  { %7403 = vst [vmem:[#allocation28_spill] sm:$0xff] %v4015_v48  ;;  %476 = vmatpush1.msra.mxu1 %v475_v6  ;;  %v6866_v54 = vand.u32 4294901760, %v4003_v42  ;;  %v4029_v57 = vsub.f32 %v3895_v26, %v3910_v32  ;;  %213 = vmatprep.subr.mxu0 %v3932_v41  ;;  %v487_v58 = vand.u32 4294901760, %v486_v19  ;;  %v6869_v63 = vand.u32 4294901760, %v4015_v48 }
  0x2f   :  { %7404 = vst [vmem:[#allocation29_spill] sm:$0xff] %v4018_v52  ;;  %7406 = vst [vmem:[#allocation31_spill] sm:$0xff] %v4032_v21  ;;  %482 = vmatprep.subr.mxu1 %v481_v14  ;;  %v498_v62 = vsub.f32 %v3992_v8, %v6864_v47  ;;  %v4041_v6 = vsub.f32 %v3897_v27, %v3919_v36  ;;  %215 = vmatpush1.msra.mxu0 %v3953_v50  ;;  %v493_v26 = vand.u32 4294901760, %v492_v53  ;;  %v4053_v47 = vld [vmem:[#allocation5 + $0x68] sm:$0xff] }
  0x30   :  { %7405 = vst [vmem:[#allocation30_spill] sm:$0xff] %v4029_v57  ;;  %v504_v14 = vsub.f32 %v4003_v42, %v6866_v54  ;;  %v6871_v19 = vand.u32 4294901760, %v4029_v57  ;;  %v4051_v7 = vand.u32 4294901760, %v4020_v20  ;;  %488 = vmatpush1.msra.mxu1 %v487_v58  ;;  %217 = vmatprep.subr.mxu0 %v3972_v60  ;;  %v510_v55 = vsub.f32 %v4015_v48, %v6869_v63  ;;  %v4167_v36 = vld [vmem:[#allocation5 + $0x3e8] sm:$0xff] }
  0x31   :  { %7407 = vst [vmem:[#allocation32_spill] sm:$0xff] %v4041_v6  ;;  %v499_v27 = vand.u32 4294901760, %v498_v62  ;;  %v6874_v53 = vand.u32 4294901760, %v4041_v6  ;;  %v4062_v54 = vsub.f32 %v3899_v28, %v3932_v41  ;;  %494 = vmatprep.subr.mxu1 %v493_v26  ;;  %219 = vmatpush1.msra.mxu0 %v3984_v1  ;;  %v4071_v62 = vand.u32 4294901760, %v4043_v38 }
  0x32   :  { %7408 = vst [vmem:[#allocation33_spill] sm:$0xff] %v4051_v7  ;;  %v505_v44 = vand.u32 4294901760, %v504_v14  ;;  %v516_v58 = vsub.f32 %v4029_v57, %v6871_v19  ;;  %v4075_v63 = vsub.f32 %v3921_v37, %v3953_v50  ;;  %221 = vmatprep.subr.mxu0 %v3995_v12  ;;  %v511_v28 = vand.u32 4294901760, %v510_v55 }
  0x33   :  { %7409 = vst [vmem:[#allocation34_spill] sm:$0xff] %v4062_v54  ;;  %7410 = vst [vmem:[#allocation35_spill] sm:$0xff] %v4071_v62  ;;  %500 = vmatpush1.msra.mxu1 %v499_v27  ;;  %v522_v26 = vsub.f32 %v4041_v6, %v6874_v53  ;;  %v6878_v14 = vand.u32 4294901760, %v4062_v54  ;;  %v4085_v19 = vand.u32 4294901760, %v4053_v47  ;;  %223 = vmatpush1.msra.mxu0 %v4006_v43  ;;  %v4096_v33 = vand.u32 4294901760, %v4064_v49  ;;  %v4098_v53 = vld [vmem:[#allocation5 + $0x28] sm:$0xff] }
  0x34   :  { %7411 = vst [vmem:[#allocation36_spill] sm:$0xff] %v4075_v63  ;;  %506 = vmatprep.subr.mxu1 %v505_v44  ;;  %v517_v37 = vand.u32 4294901760, %v516_v58  ;;  %v6881_v27 = vand.u32 4294901760, %v4075_v63  ;;  %v4093_v55 = vsub.f32 %v3945_v46, %v3972_v60  ;;  %225 = vmatprep.subr.mxu0 %v4018_v52  ;;  %v4106_v58 = vsub.f32 %v3955_v51, %v3984_v1  ;;  %v4123_v51 = vld [vmem:[#allocation5 + $0x20] sm:$0xff] }
  0x35   :  { %7412 = vst [vmem:[#allocation37_spill] sm:$0xff] %v4085_v19  ;;  %7414 = vst [vmem:[#allocation39_spill] sm:$0xff] %v4096_v33  ;;  %512 = vmatpush1.msra.mxu1 %v511_v28  ;;  %v523_v29 = vand.u32 4294901760, %v522_v26  ;;  %v528_v44 = vsub.f32 %v4062_v54, %v6878_v14  ;;  %v4109_v46 = vand.u32 4294901760, %v4077_v39  ;;  %227 = vmatpush1.msra.mxu0 %v4032_v21  ;;  %v4121_v14 = vand.u32 4294901760, %v4087_v34 }
  0x36   :  { %7413 = vst [vmem:[#allocation38_spill] sm:$0xff] %v4093_v55  ;;  %7415 = vst [vmem:[#allocation40_spill] sm:$0xff] %v4106_v58  ;;  %518 = vmatprep.subr.mxu1 %v517_v37  ;;  %v534_v28 = vsub.f32 %v4075_v63, %v6881_v27  ;;  %v4118_v60 = vsub.f32 %v3962_v56, %v3995_v12  ;;  %229 = vmatprep.subr.mxu0 %v4051_v7  ;;  %v4132_v26 = vand.u32 4294901760, %v4098_v53  ;;  %v4134_v56 = vld [vmem:[#allocation5 + $0x8] sm:$0xff] }
  0x37   :  { %7416 = vst [vmem:[#allocation41_spill] sm:$0xff] %v4109_v46  ;;  %7418 = vst [vmem:[#allocation43_spill] sm:$0xff] %v4121_v14  ;;  %524 = vmatpush1.msra.mxu1 %v523_v29  ;;  %v529_v37 = vand.u32 4294901760, %v528_v44  ;;  %v4129_v27 = vsub.f32 %v3974_v61, %v4006_v43  ;;  %231 = vmatpush1.msra.mxu0 %v4071_v62  ;;  %v7421_v50 = vand.u32 4294901760, %v4093_v55  ;;  %v7423_v61 = vand.u32 4294901760, %v4106_v58  ;;  %v4157_v44 = vld [vmem:[#allocation5] sm:$0xff] }
  0x38   :  { %7417 = vst [vmem:[#allocation42_spill] sm:$0xff] %v4118_v60  ;;  %7420 = vst [vmem:[#allocation45_spill] sm:$0xff] %v4132_v26  ;;  %v535_v12 = vand.u32 4294901760, %v534_v28  ;;  %v4143_v1 = vsub.f32 %v3986_v2, %v4018_v52  ;;  %233 = vmatprep.subr.mxu0 %v4085_v19  ;;  %v4151_v28 = vand.u32 4294901760, %v4123_v51  ;;  %v4165_v41 = vand.u32 4294901760, %v4134_v56 }
  0x39   :  { %7419 = vst [vmem:[#allocation44_spill] sm:$0xff] %v4129_v27  ;;  %v540_v29 = vsub.f32 %v4093_v55, %v7421_v50  ;;  %530 = vmatprep.subr.mxu1 %v529_v37  ;;  %v546_v43 = vsub.f32 %v4106_v58, %v7423_v61  ;;  %v4155_v50 = vsub.f32 %v3997_v13, %v4032_v21  ;;  %v7426_v37 = vand.u32 4294901760, %v4118_v60 }
  0x3a   :  { %7422 = vst [vmem:[#allocation46_spill] sm:$0xff] %v4143_v1  ;;  %7424 = vst [vmem:[#allocation47_spill] sm:$0xff] %v4151_v28  ;;  %536 = vmatpush1.msra.mxu1 %v535_v12  ;;  %235 = vmatpush1.msra.mxu0 %v4096_v33  ;;  %v7428_v13 = vand.u32 4294901760, %v4129_v27  ;;  %v4176_v21 = vsub.f32 %v4020_v20, %v4051_v7  ;;  %v4185_v24 = vand.u32 4294901760, %v4157_v44 }
  0x3b   :  { %7425 = vst [vmem:[#allocation48_spill] sm:$0xff] %v4155_v50  ;;  %v541_v2 = vand.u32 4294901760, %v540_v29  ;;  %v552_v52 = vsub.f32 %v4118_v60, %v7426_v37  ;;  %7427 = vst [vmem:[#allocation49_spill] sm:$0xff] %v4165_v41  ;;  %v547_v32 = vand.u32 4294901760, %v546_v43  ;;  %237 = vmatprep.subr.mxu0 %v4109_v46  ;;  %v4178_v37 = vld [vmem:[#allocation5 + $0x3e0] sm:$0xff]  ;;  %v7430_v43 = vand.u32 4294901760, %v4143_v1 }
  0x3c   :  { %v558_v12 = vsub.f32 %v4129_v27, %v7428_v13  ;;  %7429 = vst [vmem:[#allocation50_spill] sm:$0xff] %v4176_v21  ;;  %239 = vmatpush1.msra.mxu0 %v4121_v14  ;;  %7431 = vst [vmem:[#allocation51_spill] sm:$0xff] %v4185_v24  ;;  %v4189_v13 = vsub.f32 %v4043_v38, %v4071_v62  ;;  %v4191_v29 = vld [vmem:[#allocation5 + $0x3c8] sm:$0xff]  ;;  %v4210_v62 = vand.u32 4294901760, %v4178_v37 }
  0x3d   :  { %542 = vmatprep.subr.mxu1 %v541_v2  ;;  %v553_v61 = vand.u32 4294901760, %v552_v52  ;;  %v564_v30 = vsub.f32 %v4143_v1, %v7430_v43  ;;  %241 = vmatprep.subr.mxu0 %v4132_v26  ;;  %v7433_v52 = vand.u32 4294901760, %v4155_v50  ;;  %v4199_v43 = vand.u32 4294901760, %v4167_v36  ;;  %v4201_v1 = vld [vmem:[#allocation5 + $0x3c0] sm:$0xff] }
  0x3e   :  { %7432 = vst [vmem:[#allocation52_spill] sm:$0xff] %v4189_v13  ;;  %548 = vmatpush1.msra.mxu1 %v547_v32  ;;  %v559_v20 = vand.u32 4294901760, %v558_v12  ;;  %243 = vmatpush1.msra.mxu0 %v4151_v28  ;;  %v4207_v12 = vsub.f32 %v4053_v47, %v4085_v19  ;;  %7436 = vst [vmem:[#allocation55_spill] sm:$0xff] %v4210_v62  ;;  %v4220_v32 = vsub.f32 %v4064_v49, %v4096_v33  ;;  %v4237_v49 = vld [vmem:[#allocation5 + $0x3a0] sm:$0xff] }
  0x3f   :  { %v570_v2 = vsub.f32 %v4155_v50, %v7433_v52  ;;  %7434 = vst [vmem:[#allocation53_spill] sm:$0xff] %v4199_v43  ;;  %554 = vmatprep.subr.mxu1 %v553_v61  ;;  %v565_v38 = vand.u32 4294901760, %v564_v30  ;;  %v4212_v52 = vld [vmem:[#allocation5 + $0x3a8] sm:$0xff]  ;;  %245 = vmatprep.subr.mxu0 %v4165_v41  ;;  %v7437_v61 = vand.u32 4294901760, %v4176_v21  ;;  %v4223_v47 = vand.u32 4294901760, %v4191_v29 }
  0x40   :  { %7435 = vst [vmem:[#allocation54_spill] sm:$0xff] %v4207_v12  ;;  %560 = vmatpush1.msra.mxu1 %v559_v20  ;;  %7438 = vst [vmem:[#allocation56_spill] sm:$0xff] %v4220_v32  ;;  %247 = vmatpush1.msra.mxu0 %v4185_v24  ;;  %v7440_v19 = vand.u32 4294901760, %v4189_v13  ;;  %v4232_v50 = vsub.f32 %v4077_v39, %v4109_v46  ;;  %v4248_v39 = vld [vmem:[#allocation5 + $0x388] sm:$0xff] }
  0x41   :  { %v571_v7 = vand.u32 4294901760, %v570_v2  ;;  %v576_v30 = vsub.f32 %v4176_v21, %v7437_v61  ;;  %7439 = vst [vmem:[#allocation57_spill] sm:$0xff] %v4223_v47  ;;  %566 = vmatprep.subr.mxu1 %v565_v38  ;;  %v4235_v61 = vand.u32 4294901760, %v4201_v1  ;;  %249 = vmatprep.subr.mxu0 %v4199_v43  ;;  %v6924_v38 = vand.u32 4294901760, %v4220_v32 }
  0x42   :  { %v582_v20 = vsub.f32 %v4189_v13, %v7440_v19  ;;  %7441 = vst [vmem:[#allocation58_spill] sm:$0xff] %v4232_v50  ;;  %v4243_v19 = vsub.f32 %v4087_v34, %v4121_v14  ;;  %v4246_v2 = vand.u32 4294901760, %v4212_v52  ;;  %v7445_v13 = vand.u32 4294901760, %v4207_v12  ;;  %251 = vmatpush2.msra.mxu0 %v4210_v62 }
  0x43   :  { %7442 = vst [vmem:[#allocation59_spill] sm:$0xff] %v4235_v61  ;;  %572 = vmatpush1.msra.mxu1 %v571_v7  ;;  %v577_v33 = vand.u32 4294901760, %v576_v30  ;;  %v4257_v30 = vsub.f32 %v4098_v53, %v4132_v26  ;;  %v594_v34 = vsub.f32 %v4220_v32, %v6924_v38  ;;  %253 = vmatprep.subr.mxu0 %v4223_v47  ;;  %v4265_v14 = vand.u32 4294901760, %v4237_v49  ;;  %v4271_v7 = vld [vmem:[#allocation5 + $0x380] sm:$0xff]  ;;  %v4281_v32 = vld [vmem:[#allocation5 + $0x368] sm:$0xff] }
  0x44   :  { %7443 = vst [vmem:[#allocation60_spill] sm:$0xff] %v4243_v19  ;;  %7444 = vst [vmem:[#allocation61_spill] sm:$0xff] %v4246_v2  ;;  %v583_v46 = vand.u32 4294901760, %v582_v20  ;;  %v588_v21 = vsub.f32 %v4207_v12, %v7445_v13  ;;  %v4269_v13 = vsub.f32 %v4123_v51, %v4151_v28  ;;  %255 = vmatpush2.msra.mxu0 %v4235_v61  ;;  %v4279_v20 = vand.u32 4294901760, %v4248_v39 }
  0x45   :  { %7446 = vst [vmem:[#allocation62_spill] sm:$0xff] %v4257_v30  ;;  %578 = vmatprep.subr.mxu1 %v577_v33  ;;  %7447 = vst [vmem:[#allocation63_spill] sm:$0xff] %v4265_v14  ;;  %v7449_v33 = vand.u32 4294901760, %v4232_v50  ;;  %v595_v12 = vand.u32 4294901760, %v594_v34  ;;  %v7451_v51 = vand.u32 4294901760, %v4243_v19  ;;  %257 = vmatprep.subr.mxu0 %v4246_v2 }
  0x46   :  { %7448 = vst [vmem:[#allocation64_spill] sm:$0xff] %v4269_v13  ;;  %584 = vmatpush1.msra.mxu1 %v583_v46  ;;  %v589_v53 = vand.u32 4294901760, %v588_v21  ;;  %7450 = vst [vmem:[#allocation65_spill] sm:$0xff] %v4279_v20  ;;  %v4290_v46 = vsub.f32 %v4134_v56, %v4165_v41  ;;  %259 = vmatpush2.msra.mxu0 %v4265_v14  ;;  %v4303_v21 = vsub.f32 %v4157_v44, %v4185_v24  ;;  %v4326_v24 = vld [vmem:[#allocation5 + $0x328] sm:$0xff] }
  0x47   :  { %v600_v26 = vsub.f32 %v4232_v50, %v7449_v33  ;;  %v606_v28 = vsub.f32 %v4243_v19, %v7451_v51  ;;  %v4292_v33 = vld [vmem:[#allocation5 + $0x360] sm:$0xff]  ;;  %v7453_v50 = vand.u32 4294901760, %v4257_v30  ;;  %v4299_v51 = vand.u32 4294901760, %v4271_v7  ;;  %v4305_v19 = vld [vmem:[#allocation5 + $0x348] sm:$0xff]  ;;  %261 = vmatprep.subr.mxu0 %v4279_v20 }
  0x48   :  { %7452 = vst [vmem:[#allocation66_spill] sm:$0xff] %v4290_v46  ;;  %590 = vmatprep.subr.mxu1 %v589_v53  ;;  %7455 = vst [vmem:[#allocation68_spill] sm:$0xff] %v4303_v21  ;;  %v7456_v53 = vand.u32 4294901760, %v4269_v13  ;;  %v4313_v41 = vand.u32 4294901760, %v4281_v32 }
  0x49   :  { %v601_v38 = vand.u32 4294901760, %v600_v26  ;;  %v612_v34 = vsub.f32 %v4257_v30, %v7453_v50  ;;  %7454 = vst [vmem:[#allocation67_spill] sm:$0xff] %v4299_v51  ;;  %596 = vmatpush1.msra.mxu1 %v595_v12  ;;  %v607_v56 = vand.u32 4294901760, %v606_v28  ;;  %v4315_v30 = vld [vmem:[#allocation5 + $0x340] sm:$0xff]  ;;  %263 = vmatpush2.msra.mxu0 %v4299_v51  ;;  %v6947_v12 = vand.u32 4294901760, %v4303_v21 }
  0x4a   :  { %v618_v26 = vsub.f32 %v4269_v13, %v7456_v53  ;;  %7457 = vst [vmem:[#allocation69_spill] sm:$0xff] %v4313_v41  ;;  %v4321_v28 = vsub.f32 %v4167_v36, %v4199_v43  ;;  %v4324_v53 = vand.u32 4294901760, %v4292_v33  ;;  %v7460_v13 = vand.u32 4294901760, %v4290_v46  ;;  %265 = vmatprep.subr.mxu0 %v4313_v41 }
  0x4b   :  { %602 = vmatprep.subr.mxu1 %v601_v38  ;;  %v613_v44 = vand.u32 4294901760, %v612_v34  ;;  %v4334_v34 = vsub.f32 %v4178_v37, %v4210_v62  ;;  %v4337_v36 = vand.u32 4294901760, %v4305_v19  ;;  %v630_v43 = vsub.f32 %v4303_v21, %v6947_v12  ;;  %v4351_v37 = vld [vmem:[#allocation5 + $0x320] sm:$0xff] }
  0x4c   :  { %7458 = vst [vmem:[#allocation70_spill] sm:$0xff] %v4321_v28  ;;  %7459 = vst [vmem:[#allocation71_spill] sm:$0xff] %v4324_v53  ;;  %608 = vmatpush1.msra.mxu1 %v607_v56  ;;  %v619_v50 = vand.u32 4294901760, %v618_v26  ;;  %v624_v38 = vsub.f32 %v4290_v46, %v7460_v13  ;;  %267 = vmatpush2.msra.mxu0 %v4324_v53  ;;  %v4346_v13 = vsub.f32 %v4191_v29, %v4223_v47  ;;  %v4362_v29 = vld [vmem:[#allocation5 + $0x308] sm:$0xff] }
  0x4d   :  { %7461 = vst [vmem:[#allocation72_spill] sm:$0xff] %v4334_v34  ;;  %7462 = vst [vmem:[#allocation73_spill] sm:$0xff] %v4337_v36  ;;  %614 = vmatprep.subr.mxu1 %v613_v44  ;;  %v4349_v26 = vand.u32 4294901760, %v4315_v30  ;;  %v6958_v44 = vand.u32 4294901760, %v4334_v34  ;;  %269 = vmatprep.subr.mxu0 %v4337_v36  ;;  %v4357_v12 = vsub.f32 %v4201_v1, %v4235_v61  ;;  %v4360_v56 = vand.u32 4294901760, %v4326_v24 }
  0x4e   :  { %7463 = vst [vmem:[#allocation74_spill] sm:$0xff] %v4346_v13  ;;  %620 = vmatpush1.msra.mxu1 %v619_v50  ;;  %v625_v62 = vand.u32 4294901760, %v624_v38  ;;  %v631_v47 = vand.u32 4294901760, %v630_v43  ;;  %v7467_v21 = vand.u32 4294901760, %v4321_v28  ;;  %v4371_v38 = vsub.f32 %v4212_v52, %v4246_v2  ;;  %v4385_v50 = vld [vmem:[#allocation5 + $0x300] sm:$0xff] }
  0x4f   :  { %7464 = vst [vmem:[#allocation75_spill] sm:$0xff] %v4349_v26  ;;  %7465 = vst [vmem:[#allocation76_spill] sm:$0xff] %v4357_v12  ;;  %271 = vmatpush2.msra.mxu0 %v4349_v26  ;;  %v642_v1 = vsub.f32 %v4334_v34, %v6958_v44  ;;  %v4379_v43 = vand.u32 4294901760, %v4351_v37  ;;  %v4392_v61 = vand.u32 4294901760, %v4362_v29  ;;  %v4394_v34 = vld [vmem:[#allocation5 + $0x2e8] sm:$0xff]  ;;  %v7473_v27 = vand.u32 4294901760, %v4357_v12 }
  0x50   :  { %7466 = vst [vmem:[#allocation77_spill] sm:$0xff] %v4360_v56  ;;  %v636_v46 = vsub.f32 %v4321_v28, %v7467_v21  ;;  %7468 = vst [vmem:[#allocation78_spill] sm:$0xff] %v4371_v38  ;;  %626 = vmatprep.subr.mxu1 %v625_v62  ;;  %273 = vmatprep.subr.mxu0 %v4360_v56  ;;  %v4383_v21 = vsub.f32 %v4237_v49, %v4265_v14  ;;  %v7471_v62 = vand.u32 4294901760, %v4346_v13 }
  0x51   :  { %7469 = vst [vmem:[#allocation79_spill] sm:$0xff] %v4379_v43  ;;  %632 = vmatpush1.msra.mxu1 %v631_v47  ;;  %7472 = vst [vmem:[#allocation81_spill] sm:$0xff] %v4392_v61  ;;  %v643_v28 = vand.u32 4294901760, %v642_v1  ;;  %v654_v49 = vsub.f32 %v4357_v12, %v7473_v27  ;;  %275 = vmatpush2.msra.mxu0 %v4379_v43  ;;  %v7475_v14 = vand.u32 4294901760, %v4371_v38  ;;  %v4412_v27 = vand.u32 4294901760, %v4385_v50  ;;  %v4418_v12 = vld [vmem:[#allocation5 + $0x2c8] sm:$0xff] }
  0x52   :  { %7470 = vst [vmem:[#allocation80_spill] sm:$0xff] %v4383_v21  ;;  %v637_v52 = vand.u32 4294901760, %v636_v46  ;;  %v648_v2 = vsub.f32 %v4346_v13, %v7471_v62  ;;  %v4403_v46 = vsub.f32 %v4248_v39, %v4279_v20  ;;  %v4405_v62 = vld [vmem:[#allocation5 + $0x2e0] sm:$0xff]  ;;  %277 = vmatprep.subr.mxu0 %v4392_v61  ;;  %v4416_v47 = vsub.f32 %v4271_v7, %v4299_v51 }
  0x53   :  { %v660_v1 = vsub.f32 %v4371_v38, %v7475_v14  ;;  %7476 = vst [vmem:[#allocation83_spill] sm:$0xff] %v4412_v27  ;;  %v655_v39 = vand.u32 4294901760, %v654_v49  ;;  %v4425_v14 = vand.u32 4294901760, %v4394_v34  ;;  %v4427_v38 = vld [vmem:[#allocation5 + $0x2c0] sm:$0xff]  ;;  %279 = vmatpush2.msra.mxu0 %v4412_v27  ;;  %v4436_v49 = vand.u32 4294901760, %v4405_v62 }
  0x54   :  { %7474 = vst [vmem:[#allocation82_spill] sm:$0xff] %v4403_v46  ;;  %638 = vmatprep.subr.mxu1 %v637_v52  ;;  %v649_v44 = vand.u32 4294901760, %v648_v2  ;;  %7477 = vst [vmem:[#allocation84_spill] sm:$0xff] %v4416_v47  ;;  %v7478_v52 = vand.u32 4294901760, %v4383_v21  ;;  %v6981_v7 = vand.u32 4294901760, %v4416_v47  ;;  %v7482_v51 = vand.u32 4294901760, %v4403_v46 }
  0x55   :  { %644 = vmatpush2.msra.mxu1 %v643_v28  ;;  %7479 = vst [vmem:[#allocation85_spill] sm:$0xff] %v4425_v14  ;;  %v661_v13 = vand.u32 4294901760, %v660_v1  ;;  %v4433_v28 = vsub.f32 %v4281_v32, %v4313_v41  ;;  %7481 = vst [vmem:[#allocation87_spill] sm:$0xff] %v4436_v49  ;;  %281 = vmatprep.subr.mxu0 %v4425_v14  ;;  %v4446_v1 = vsub.f32 %v4292_v33, %v4324_v53  ;;  %v4463_v33 = vld [vmem:[#allocation5 + $0x2a0] sm:$0xff] }
  0x56   :  { %v666_v2 = vsub.f32 %v4383_v21, %v7478_v52  ;;  %650 = vmatprep.subr.mxu1 %v649_v44  ;;  %v4438_v52 = vld [vmem:[#allocation5 + $0x2a8] sm:$0xff]  ;;  %v672_v44 = vsub.f32 %v4403_v46, %v7482_v51  ;;  %v4449_v32 = vand.u32 4294901760, %v4418_v12  ;;  %v678_v41 = vsub.f32 %v4416_v47, %v6981_v7  ;;  %283 = vmatpush2.msra.mxu0 %v4436_v49 }
  0x57   :  { %7480 = vst [vmem:[#allocation86_spill] sm:$0xff] %v4433_v28  ;;  %656 = vmatpush2.msra.mxu1 %v655_v39  ;;  %7483 = vst [vmem:[#allocation88_spill] sm:$0xff] %v4446_v1  ;;  %v4458_v51 = vsub.f32 %v4305_v19, %v4337_v36  ;;  %v4469_v7 = vsub.f32 %v4315_v30, %v4349_v26  ;;  %v4472_v39 = vand.u32 4294901760, %v4438_v52  ;;  %v4474_v19 = vld [vmem:[#allocation5 + $0x288] sm:$0xff]  ;;  %v7489_v47 = vand.u32 4294901760, %v4433_v28 }
  0x58   :  { %v667_v20 = vand.u32 4294901760, %v666_v2  ;;  %7484 = vst [vmem:[#allocation89_spill] sm:$0xff] %v4449_v32  ;;  %662 = vmatprep.subr.mxu1 %v661_v13  ;;  %v4461_v2 = vand.u32 4294901760, %v4427_v38  ;;  %v673_v53 = vand.u32 4294901760, %v672_v44  ;;  %v6992_v13 = vand.u32 4294901760, %v4446_v1  ;;  %285 = vmatprep.subr.mxu0 %v4449_v32 }
  0x59   :  { %7485 = vst [vmem:[#allocation90_spill] sm:$0xff] %v4458_v51  ;;  %7487 = vst [vmem:[#allocation92_spill] sm:$0xff] %v4469_v7  ;;  %v679_v36 = vand.u32 4294901760, %v678_v41  ;;  %v684_v46 = vsub.f32 %v4433_v28, %v7489_v47  ;;  %v4483_v44 = vsub.f32 %v4326_v24, %v4360_v56  ;;  %v4491_v41 = vand.u32 4294901760, %v4463_v33 }
  0x5a   :  { %7486 = vst [vmem:[#allocation91_spill] sm:$0xff] %v4461_v2  ;;  %668 = vmatpush2.msra.mxu1 %v667_v20  ;;  %7488 = vst [vmem:[#allocation93_spill] sm:$0xff] %v4472_v39  ;;  %287 = vmatpush2.msra.mxu0 %v4461_v2  ;;  %v690_v30 = vsub.f32 %v4446_v1, %v6992_v13  ;;  %v4495_v47 = vsub.f32 %v4351_v37, %v4379_v43  ;;  %v4497_v20 = vld [vmem:[#allocation5 + $0x280] sm:$0xff]  ;;  %v4504_v26 = vand.u32 4294901760, %v4474_v19  ;;  %v4506_v1 = vld [vmem:[#allocation5 + $0x268] sm:$0xff] }
  0x5b   :  { %7490 = vst [vmem:[#allocation94_spill] sm:$0xff] %v4483_v44  ;;  %674 = vmatprep.subr.mxu1 %v673_v53  ;;  %289 = vmatprep.subr.mxu0 %v4472_v39  ;;  %7491 = vst [vmem:[#allocation95_spill] sm:$0xff] %v4491_v41  ;;  %v685_v24 = vand.u32 4294901760, %v684_v46  ;;  %v7493_v53 = vand.u32 4294901760, %v4458_v51  ;;  %v7495_v21 = vand.u32 4294901760, %v4469_v7  ;;  %v4515_v46 = vsub.f32 %v4362_v29, %v4392_v61 }
  0x5c   :  { %7492 = vst [vmem:[#allocation96_spill] sm:$0xff] %v4495_v47  ;;  %680 = vmatpush2.msra.mxu1 %v679_v36  ;;  %7494 = vst [vmem:[#allocation97_spill] sm:$0xff] %v4504_v26  ;;  %v691_v28 = vand.u32 4294901760, %v690_v30  ;;  %291 = vmatpush2.msra.mxu0 %v4491_v41  ;;  %v7497_v43 = vand.u32 4294901760, %v4483_v44  ;;  %v4528_v36 = vsub.f32 %v4385_v50, %v4412_v27 }
  0x5d   :  { %v696_v56 = vsub.f32 %v4458_v51, %v7493_v53  ;;  %v702_v37 = vsub.f32 %v4469_v7, %v7495_v21  ;;  %7496 = vst [vmem:[#allocation98_spill] sm:$0xff] %v4515_v46  ;;  %v4517_v53 = vld [vmem:[#allocation5 + $0x260] sm:$0xff]  ;;  %686 = vmatprep.subr.mxu1 %v685_v24  ;;  %293 = vmatprep.subr.mxu0 %v4504_v26  ;;  %v4524_v21 = vand.u32 4294901760, %v4497_v20  ;;  %v4530_v7 = vld [vmem:[#allocation5 + $0x248] sm:$0xff]  ;;  %v7500_v24 = vand.u32 4294901760, %v4495_v47 }
  0x5e   :  { %v708_v30 = vsub.f32 %v4483_v44, %v7497_v43  ;;  %7499 = vst [vmem:[#allocation100_spill] sm:$0xff] %v4528_v36  ;;  %692 = vmatpush2.msra.mxu1 %v691_v28  ;;  %v4537_v43 = vand.u32 4294901760, %v4506_v1  ;;  %v4539_v44 = vld [vmem:[#allocation5 + $0x240] sm:$0xff]  ;;  %v7015_v50 = vand.u32 4294901760, %v4528_v36  ;;  %v4545_v28 = vsub.f32 %v4394_v34, %v4425_v14 }
  0x5f   :  { %v697_v13 = vand.u32 4294901760, %v696_v56  ;;  %7498 = vst [vmem:[#allocation99_spill] sm:$0xff] %v4524_v21  ;;  %v703_v29 = vand.u32 4294901760, %v702_v37  ;;  %v714_v56 = vsub.f32 %v4495_v47, %v7500_v24  ;;  %295 = vmatpush2.msra.mxu0 %v4524_v21  ;;  %v4548_v37 = vand.u32 4294901760, %v4517_v53  ;;  %v4550_v24 = vld [vmem:[#allocation5 + $0x228] sm:$0xff] }
  0x60   :  { %v709_v51 = vand.u32 4294901760, %v708_v30  ;;  %7501 = vst [vmem:[#allocation101_spill] sm:$0xff] %v4545_v28  ;;  %v7502_v27 = vand.u32 4294901760, %v4515_v46  ;;  %297 = vmatprep.subr.mxu0 %v4537_v43  ;;  %v4558_v30 = vsub.f32 %v4405_v62, %v4436_v49  ;;  %v4561_v34 = vand.u32 4294901760, %v4530_v7  ;;  %v4575_v62 = vld [vmem:[#allocation5 + $0x220] sm:$0xff] }
  0x61   :  { %698 = vmatprep.subr.mxu1 %v697_v13  ;;  %v715_v61 = vand.u32 4294901760, %v714_v56  ;;  %v726_v14 = vsub.f32 %v4528_v36, %v7015_v50  ;;  %299 = vmatpush2.msra.mxu0 %v4548_v37  ;;  %v4573_v56 = vand.u32 4294901760, %v4539_v44  ;;  %v4581_v50 = vsub.f32 %v4427_v38, %v4461_v2 }
  0x62   :  { %704 = vmatpush2.msra.mxu1 %v703_v29  ;;  %v720_v13 = vsub.f32 %v4515_v46, %v7502_v27  ;;  %7503 = vst [vmem:[#allocation102_spill] sm:$0xff] %v4558_v30  ;;  %7504 = vst [vmem:[#allocation103_spill] sm:$0xff] %v4561_v34  ;;  %v4570_v27 = vsub.f32 %v4418_v12, %v4449_v32  ;;  %301 = vmatprep.subr.mxu0 %v4561_v34  ;;  %v4584_v29 = vand.u32 4294901760, %v4550_v24  ;;  %v4586_v12 = vld [vmem:[#allocation5 + $0x208] sm:$0xff] }
  0x63   :  { %710 = vmatprep.subr.mxu1 %v709_v51  ;;  %7506 = vst [vmem:[#allocation105_spill] sm:$0xff] %v4573_v56  ;;  %v7026_v51 = vand.u32 4294901760, %v4558_v30  ;;  %7507 = vst [vmem:[#allocation106_spill] sm:$0xff] %v4581_v50  ;;  %v727_v32 = vand.u32 4294901760, %v726_v14  ;;  %v7509_v36 = vand.u32 4294901760, %v4545_v28  ;;  %303 = vmatpush2.msra.mxu0 %v4573_v56  ;;  %v4603_v14 = vand.u32 4294901760, %v4575_v62 }
  0x64   :  { %7505 = vst [vmem:[#allocation104_spill] sm:$0xff] %v4570_v27  ;;  %716 = vmatpush2.msra.mxu1 %v715_v61  ;;  %v721_v49 = vand.u32 4294901760, %v720_v13  ;;  %7508 = vst [vmem:[#allocation107_spill] sm:$0xff] %v4584_v29  ;;  %v4595_v13 = vsub.f32 %v4438_v52, %v4472_v39  ;;  %305 = vmatprep.subr.mxu0 %v4584_v29  ;;  %v4609_v61 = vld [vmem:[#allocation5 + $0x200] sm:$0xff]  ;;  %v4616_v2 = vand.u32 4294901760, %v4586_v12  ;;  %v7512_v47 = vand.u32 4294901760, %v4581_v50 }
  0x65   :  { %v732_v46 = vsub.f32 %v4545_v28, %v7509_v36  ;;  %v738_v38 = vsub.f32 %v4558_v30, %v7026_v51  ;;  %v4607_v36 = vsub.f32 %v4463_v33, %v4491_v41  ;;  %v41_v30 = vld [vmem:[#allocation2 + $0x8] sm:$0xff]  ;;  %307 = vmatpush2.msra.mxu0 %v4603_v14 }
  0x66   :  { %7510 = vst [vmem:[#allocation108_spill] sm:$0xff] %v4595_v13  ;;  %722 = vmatprep.subr.mxu1 %v721_v49  ;;  %v7511_v49 = vand.u32 4294901760, %v4570_v27  ;;  %v750_v33 = vsub.f32 %v4581_v50, %v7512_v47  ;;  %v7514_v41 = vand.u32 4294901760, %v4595_v13  ;;  %309 = vmatprep.subr.mxu0 %v4616_v2  ;;  %v4636_v47 = vsub.f32 %v4497_v20, %v4524_v21 }
  0x67   :  { %728 = vmatpush2.msra.mxu1 %v727_v32  ;;  %v733_v52 = vand.u32 4294901760, %v732_v46  ;;  %v739_v28 = vand.u32 4294901760, %v738_v38  ;;  %v4625_v46 = vsub.f32 %v4474_v19, %v4504_v26  ;;  %v4632_v38 = vand.u32 4294901760, %v4609_v61 }
  0x68   :  { %v744_v39 = vsub.f32 %v4570_v27, %v7511_v49  ;;  %v40_v49 = vld [vmem:[#allocation2] sm:$0xff]  ;;  %v756_v27 = vsub.f32 %v4595_v13, %v7514_v41  ;;  %v751_v32 = vand.u32 4294901760, %v750_v33  ;;  %v7515_v19 = vand.u32 4294901760, %v4607_v36 }
  0x69   :  { %7513 = vst [vmem:[#allocation109_spill] sm:$0xff] %v4625_v46  ;;  %734 = vmatprep.subr.mxu1 %v733_v52  ;;  %v4642_v26 = vand.u32 4294901760, %v41_v30  ;;  %311 = vmatpush2.msra.mxu0 %v4632_v38  ;;  %v7043_v13 = vand.u32 4294901760, %v4636_v47  ;;  %v4648_v20 = vsub.f32 %v4506_v1, %v4537_v43 }
  0x6a   :  { %v745_v51 = vand.u32 4294901760, %v744_v39  ;;  %740 = vmatpush2.msra.mxu1 %v739_v28  ;;  %v762_v52 = vsub.f32 %v4607_v36, %v7515_v19  ;;  %v7044_v39 = vand.u32 4294901760, %v4625_v46  ;;  %v757_v41 = vand.u32 4294901760, %v756_v27  ;;  %892 = vmatprep.subr.mxu0 %v3874_v18 }
  0x6b   :  { %7516 = vst [vmem:[#allocation110_spill] sm:$0xff] %v4642_v26  ;;  %v4650_v28 = vand.u32 4294901760, %v40_v49  ;;  %v4656_v21 = vsub.f32 %v41_v30, %v4642_v26  ;;  %v4661_v27 = vsub.f32 %v4517_v53, %v4548_v37  ;;  %v774_v1 = vsub.f32 %v4636_v47, %v7043_v13  ;;  %826 = vmatprep.mubr.f32.mxu1 %v4642_v26 }
  0x6c   :  { %746 = vmatprep.subr.mxu1 %v745_v51  ;;  %v763_v33 = vand.u32 4294901760, %v762_v52  ;;  %v768_v19 = vsub.f32 %v4625_v46, %v7044_v39  ;;  %v7047_v51 = vand.u32 4294901760, %v4648_v20  ;;  %v4672_v30 = vsub.f32 %v4530_v7, %v4561_v34 }
  0x6d   :  { %7517 = vst [vmem:[#allocation111_spill] sm:$0xff] %v4650_v28  ;;  %752 = vmatpush2.msra.mxu1 %v751_v32  ;;  %7518 = vst [vmem:[#allocation112_spill] sm:$0xff] %v4656_v21  ;;  %v4668_v32 = vsub.f32 %v40_v49, %v4650_v28  ;;  %v4676_v53 = vand.u32 4294901760, %v4656_v21  ;;  %v4681_v13 = vsub.f32 %v4539_v44, %v4573_v56  ;;  %v775_v39 = vand.u32 4294901760, %v774_v1 }
  0x6e   :  { %758 = vmatprep.subr.mxu1 %v757_v41  ;;  %v769_v52 = vand.u32 4294901760, %v768_v19  ;;  %v7052_v41 = vand.u32 4294901760, %v4661_v27  ;;  %v780_v49 = vsub.f32 %v4648_v20, %v7047_v51  ;;  %v4698_v1 = vsub.f32 %v4550_v24, %v4584_v29 }
  0x6f   :  { %7519 = vst [vmem:[#allocation113_spill] sm:$0xff] %v4668_v32  ;;  %764 = vmatpush2.msra.mxu1 %v763_v33  ;;  %7520 = vst [vmem:[#allocation114_spill] sm:$0xff] %v4676_v53  ;;  %v4687_v7 = vand.u32 4294901760, %v4668_v32  ;;  %v7059_v33 = vand.u32 4294901760, %v4672_v30  ;;  %v315_v19 = vsub.f32 %v4656_v21, %v4676_v53  ;;  %v4707_v53 = vsub.f32 %v4575_v62, %v4603_v14 }
  0x70   :  { %770 = vmatprep.subr.mxu1 %v769_v52  ;;  %v786_v26 = vsub.f32 %v4661_v27, %v7052_v41  ;;  %v781_v51 = vand.u32 4294901760, %v780_v49  ;;  %v7523_v34 = vand.u32 4294901760, %v4681_v13  ;;  %v4728_v62 = vsub.f32 %v4609_v61, %v4632_v38 }
  0x71   :  { %7521 = vst [vmem:[#allocation115_spill] sm:$0xff] %v4687_v7  ;;  %776 = vmatpush2.msra.mxu1 %v775_v39  ;;  %v321_v56 = vsub.f32 %v4668_v32, %v4687_v7  ;;  %v792_v52 = vsub.f32 %v4672_v30, %v7059_v33  ;;  %v4709_v41 = vand.u32 4294901760, %v315_v19  ;;  %v7063_v39 = vand.u32 4294901760, %v4698_v1 }
  0x72   :  { %v787_v44 = vand.u32 4294901760, %v786_v26  ;;  %v798_v24 = vsub.f32 %v4681_v13, %v7523_v34  ;;  %782 = vmatprep.subr.mxu1 %v781_v51  ;;  %v7062_v29 = vand.u32 4294901760, %v4707_v53  ;;  %v4720_v33 = vsub.f32 %v4586_v12, %v4616_v2 }
  0x73   :  { %7522 = vst [vmem:[#allocation116_spill] sm:$0xff] %v4709_v41  ;;  %v4715_v49 = vand.u32 4294901760, %v321_v56  ;;  %v793_v7 = vand.u32 4294901760, %v792_v52  ;;  %317 = vmatprep.mubr.f32.mxu0 %v4709_v41  ;;  %v804_v34 = vsub.f32 %v4698_v1, %v7063_v39  ;;  %v7060_v19 = vand.u32 4294901760, %v4728_v62  ;;  %v7533_v39 = vld [vmem:[#allocation20_spill] sm:$0xff] }
  0x74   :  { %788 = vmatpush2.msra.mxu1 %v787_v44  ;;  %v799_v26 = vand.u32 4294901760, %v798_v24  ;;  %v810_v56 = vsub.f32 %v4707_v53, %v7062_v29  ;;  %v7061_v12 = vand.u32 4294901760, %v4720_v33 }
  0x75   :  { %7524 = vst [vmem:[#allocation117_spill] sm:$0xff] %v4715_v49  ;;  %323 = vmatmul.mubr.f32.vlgmr.msra.gmra.mxu0 %v4715_v49  ;;  %794 = vmatprep.subr.mxu1 %v793_v7  ;;  %v805_v51 = vand.u32 4294901760, %v804_v34  ;;  %v822_v7 = vsub.f32 %v4728_v62, %v7060_v19  ;;  %v42_v34 = vld [vmem:[#allocation2 + $0x10] sm:$0xff]  ;;  %v7530_v19 = vld [vmem:[#allocation19_spill] sm:$0xff]  ;;  %v7534_v49 = vld [vmem:[#allocation48_spill] sm:$0xff] }
  0x76   :  { %895 = vmatpush1.msra.mxu0 %v3887_v23  ;;  %800 = vmatpush2.msra.mxu1 %v799_v26  ;;  %v811_v44 = vand.u32 4294901760, %v810_v56  ;;  %v816_v61 = vsub.f32 %v4720_v33, %v7061_v12  ;;  %v43_v26 = vld [vmem:[#allocation2 + $0x18] sm:$0xff] }
  0x77   :  { %898 = vmatprep.subr.mxu0 %v3893_v25  ;;  %806 = vmatprep.subr.mxu1 %v805_v51  ;;  %v823_v24 = vand.u32 4294901760, %v822_v7  ;;  %v4765_v56 = vand.u32 4294901760, %v43_v26  ;;  %v4771_v51 = vand.u32 4294901760, %v42_v34  ;;  %v7528_v7 = vld [vmem:[#allocation44_spill] sm:$0xff]  ;;  %v7531_v12 = vld [vmem:[#allocation46_spill] sm:$0xff] }
  0x78   :  { %901 = vmatpush1.msra.mxu0 %v3907_v31  ;;  %812 = vmatpush2.msra.mxu1 %v811_v44  ;;  %v817_v52 = vand.u32 4294901760, %v816_v61  ;;  %v45_v44 = vld [vmem:[#allocation2 + $0x28] sm:$0xff]  ;;  %v7527_v61 = vld [vmem:[#allocation18_spill] sm:$0xff] }
  0x79   :  { %904 = vmatprep.subr.mxu0 %v3916_v35  ;;  %7525 = vst [vmem:[#allocation118_spill] sm:$0xff] %v4765_v56  ;;  %7526 = vst [vmem:[#allocation119_spill] sm:$0xff] %v4771_v51  ;;  %v4782_v29 = vand.u32 4294901760, %v45_v44  ;;  %v4787_v41 = vsub.f32 %v42_v34, %v4771_v51 }
  0x7a   :  { %907 = vmatpush1.msra.mxu0 %v3929_v40  ;;  %818 = vmatprep.subr.mxu1 %v817_v52  ;;  %v4778_v52 = vsub.f32 %v43_v26, %v4765_v56 }
  0x7b   :  { %910 = vmatprep.subr.mxu0 %v3943_v45  ;;  %824 = vmatpush2.msra.mxu1 %v823_v24  ;;  %v44_v24 = vld [vmem:[#allocation2 + $0x20] sm:$0xff]  ;;  %7532 = vst [vmem:[#allocation121_spill] sm:$0xff] %v4782_v29  ;;  %7535 = vst [vmem:[#allocation122_spill] sm:$0xff] %v4787_v41  ;;  %v4801_v34 = vsub.f32 %v45_v44, %v4782_v29  ;;  %v7553_v44 = vld [vmem:[#allocation60_spill] sm:$0xff] }
  0x7c   :  { %913 = vmatpush1.msra.mxu0 %v3969_v59  ;;  %828 = vmatmul.mubr.f32.vlgmr.msra.gmra.mxu1 %v4650_v28  ;;  %7529 = vst [vmem:[#allocation120_spill] sm:$0xff] %v4778_v52  ;;  %v7536_v28 = vld [vmem:[#allocation21_spill] sm:$0xff]  ;;  %v4791_v26 = vand.u32 4294901760, %v44_v24 }
  0x7d   :  { %916 = vmatprep.subr.mxu0 %v3981_v0  ;;  %1164 = vmatprep.subr.mxu1 %v3854_v3  ;;  %7544 = vst [vmem:[#allocation125_spill] sm:$0xff] %v4801_v34 }
  0x7e   :  { %919 = vmatpush1.msra.mxu0 %v3992_v8  ;;  %1166 = vmatpush1.msra.mxu1 %v3856_v4  ;;  %7538 = vst [vmem:[#allocation123_spill] sm:$0xff] %v4791_v26 }
  0x7f   :  { %922 = vmatprep.subr.mxu0 %v4003_v42  ;;  %1168 = vmatprep.subr.mxu1 %v3858_v5 }
  0x80   :  { %925 = vmatpush1.msra.mxu0 %v4015_v48  ;;  %1170 = vmatpush1.msra.mxu1 %v3860_v9  ;;  %v7584_v9 = vld [vmem:[#allocation78_spill] sm:$0xff]  ;;  %v7585_v48 = vld [vmem:[#allocation45_spill] sm:$0xff] }
  0x81   :  { %928 = vmatprep.subr.mxu0 %v4029_v57  ;;  %1172 = vmatprep.subr.mxu1 %v3862_v10  ;;  %v7568_v10 = vld [vmem:[#allocation70_spill] sm:$0xff] }
  0x82   :  { %931 = vmatpush1.msra.mxu0 %v4041_v6  ;;  %1174 = vmatpush1.msra.mxu1 %v3864_v11  ;;  %v7565_v11 = vld [vmem:[#allocation68_spill] sm:$0xff]  ;;  %v7567_v6 = vld [vmem:[#allocation35_spill] sm:$0xff] }
  0x83   :  { %934 = vmatprep.subr.mxu0 %v4062_v54  ;;  %1176 = vmatprep.subr.mxu1 %v3867_v15  ;;  %v7561_v15 = vld [vmem:[#allocation66_spill] sm:$0xff]  ;;  %v7564_v54 = vld [vmem:[#allocation33_spill] sm:$0xff] }
  0x84   :  { %937 = vmatpush1.msra.mxu0 %v4075_v63  ;;  %1178 = vmatpush1.msra.mxu1 %v3869_v16  ;;  %v7559_v16 = vld [vmem:[#allocation64_spill] sm:$0xff]  ;;  %v7560_v63 = vld [vmem:[#allocation31_spill] sm:$0xff] }
  0x85   :  { %940 = vmatprep.subr.mxu0 %v4093_v55  ;;  %1180 = vmatprep.subr.mxu1 %v3871_v17  ;;  %v4811_v17 = vsub.f32 %v44_v24, %v4791_v26  ;;  %v7555_v55 = vld [vmem:[#allocation62_spill] sm:$0xff]  ;;  %v7558_v24 = vld [vmem:[#allocation29_spill] sm:$0xff] }
  0x86   :  { %943 = vmatpush1.msra.mxu0 %v4106_v58  ;;  %1182 = vmatpush1.msra.mxu1 %v3884_v22  ;;  %v4806_v22 = vand.u32 4294901760, %v4787_v41  ;;  %v7549_v58 = vld [vmem:[#allocation58_spill] sm:$0xff] }
  0x87   :  { %946 = vmatprep.subr.mxu0 %v4118_v60  ;;  %1184 = vmatprep.subr.mxu1 %v7527_v61  ;;  %v7539_v61 = vld [vmem:[#allocation22_spill] sm:$0xff]  ;;  %7550 = vst [vmem:[#allocation127_spill] sm:$0xff] %v4811_v17 }
  0x88   :  { %949 = vmatpush1.msra.mxu0 %v7528_v7  ;;  %1186 = vmatpush1.msra.mxu1 %v7530_v19  ;;  %v7537_v7 = vld [vmem:[#allocation50_spill] sm:$0xff]  ;;  %v7540_v19 = vld [vmem:[#allocation52_spill] sm:$0xff]  ;;  %7547 = vst [vmem:[#allocation126_spill] sm:$0xff] %v4806_v22 }
  0x89   :  { %952 = vmatprep.subr.mxu0 %v7531_v12  ;;  %1188 = vmatprep.subr.mxu1 %v7533_v39  ;;  %v4796_v12 = vand.u32 4294901760, %v4778_v52  ;;  %v47_v60 = vld [vmem:[#allocation2 + $0x38] sm:$0xff]  ;;  %v7542_v39 = vld [vmem:[#allocation23_spill] sm:$0xff] }
  0x8a   :  { %955 = vmatpush1.msra.mxu0 %v7534_v49  ;;  %1190 = vmatpush1.msra.mxu1 %v7536_v28  ;;  %v7543_v49 = vld [vmem:[#allocation54_spill] sm:$0xff]  ;;  %v7545_v28 = vld [vmem:[#allocation24_spill] sm:$0xff] }
  0x8b   :  { %958 = vmatprep.subr.mxu0 %v7537_v7  ;;  %1192 = vmatprep.subr.mxu1 %v7539_v61  ;;  %7541 = vst [vmem:[#allocation124_spill] sm:$0xff] %v4796_v12  ;;  %v7546_v7 = vld [vmem:[#allocation56_spill] sm:$0xff]  ;;  %v46_v61 = vld [vmem:[#allocation2 + $0x30] sm:$0xff] }
  0x8c   :  { %961 = vmatpush1.msra.mxu0 %v7540_v19  ;;  %1194 = vmatpush1.msra.mxu1 %v7542_v39  ;;  %v7548_v19 = vld [vmem:[#allocation25_spill] sm:$0xff]  ;;  %v4813_v39 = vand.u32 4294901760, %v47_v60 }
  0x8d   :  { %964 = vmatprep.subr.mxu0 %v7543_v49  ;;  %1196 = vmatprep.subr.mxu1 %v7545_v28  ;;  %v7552_v49 = vld [vmem:[#allocation26_spill] sm:$0xff]  ;;  %v7554_v28 = vld [vmem:[#allocation27_spill] sm:$0xff] }
  0x8e   :  { %967 = vmatpush1.msra.mxu0 %v7546_v7  ;;  %1198 = vmatpush1.msra.mxu1 %v7548_v19  ;;  %7551 = vst [vmem:[#allocation128_spill] sm:$0xff] %v4813_v39  ;;  %v331_v7 = vsub.f32 %v4778_v52, %v4796_v12  ;;  %v4822_v19 = vand.u32 4294901760, %v4801_v34 }
  0x8f   :  { %970 = vmatprep.subr.mxu0 %v7549_v58  ;;  %1200 = vmatprep.subr.mxu1 %v7552_v49  ;;  %v4824_v58 = vand.u32 4294901760, %v46_v61  ;;  %v337_v49 = vsub.f32 %v4787_v41, %v4806_v22  ;;  %v7575_v22 = vld [vmem:[#allocation74_spill] sm:$0xff] }
  0x90   :  { %973 = vmatpush1.msra.mxu0 %v7553_v44  ;;  %1202 = vmatpush1.msra.mxu1 %v7554_v28  ;;  %7556 = vst [vmem:[#allocation129_spill] sm:$0xff] %v4822_v19  ;;  %v49_v44 = vld [vmem:[#allocation2 + $0x48] sm:$0xff]  ;;  %v4833_v28 = vand.u32 4294901760, %v4811_v17 }
  0x91   :  { %976 = vmatprep.subr.mxu0 %v7555_v55  ;;  %7557 = vst [vmem:[#allocation130_spill] sm:$0xff] %v4824_v58  ;;  %1204 = vmatprep.subr.mxu1 %v7558_v24  ;;  %v4836_v55 = vsub.f32 %v47_v60, %v4813_v39  ;;  %v4840_v24 = vand.u32 4294901760, %v331_v7  ;;  %v4849_v57 = vand.u32 4294901760, %v49_v44  ;;  %v7571_v60 = vld [vmem:[#allocation37_spill] sm:$0xff]  ;;  %v7574_v7 = vld [vmem:[#allocation39_spill] sm:$0xff] }
  0x92   :  { %979 = vmatpush1.msra.mxu0 %v7559_v16  ;;  %1206 = vmatpush1.msra.mxu1 %v7560_v63  ;;  %7562 = vst [vmem:[#allocation131_spill] sm:$0xff] %v4833_v28  ;;  %v48_v16 = vld [vmem:[#allocation2 + $0x40] sm:$0xff]  ;;  %v4847_v63 = vsub.f32 %v46_v61, %v4824_v58 }
  0x93   :  { %982 = vmatprep.subr.mxu0 %v7561_v15  ;;  %7563 = vst [vmem:[#allocation132_spill] sm:$0xff] %v4836_v55  ;;  %1208 = vmatprep.subr.mxu1 %v7564_v54  ;;  %7566 = vst [vmem:[#allocation133_spill] sm:$0xff] %v4840_v24  ;;  %v347_v15 = vsub.f32 %v4801_v34, %v4822_v19  ;;  %v7572_v54 = vld [vmem:[#allocation72_spill] sm:$0xff]  ;;  %v4862_v61 = vand.u32 4294901760, %v48_v16  ;;  %v7578_v19 = vld [vmem:[#allocation41_spill] sm:$0xff] }
  0x94   :  { %985 = vmatpush1.msra.mxu0 %v7565_v11  ;;  %1210 = vmatpush1.msra.mxu1 %v7567_v6  ;;  %7569 = vst [vmem:[#allocation134_spill] sm:$0xff] %v4847_v63  ;;  %7570 = vst [vmem:[#allocation135_spill] sm:$0xff] %v4849_v57  ;;  %v4853_v11 = vand.u32 4294901760, %v337_v49  ;;  %v4860_v6 = vand.u32 4294901760, %v4836_v55  ;;  %v7580_v49 = vld [vmem:[#allocation43_spill] sm:$0xff] }
  0x95   :  { %988 = vmatprep.subr.mxu0 %v7568_v10  ;;  %1212 = vmatprep.subr.mxu1 %v7571_v60  ;;  %v353_v10 = vsub.f32 %v4811_v17, %v4833_v28  ;;  %7577 = vst [vmem:[#allocation138_spill] sm:$0xff] %v4862_v61  ;;  %v51_v60 = vld [vmem:[#allocation2 + $0x58] sm:$0xff]  ;;  %v4874_v28 = vsub.f32 %v49_v44, %v4849_v57  ;;  %v7590_v44 = vld [vmem:[#allocation47_spill] sm:$0xff] }
  0x96   :  { %991 = vmatpush2.msra.mxu0 %v7572_v54  ;;  %7573 = vst [vmem:[#allocation136_spill] sm:$0xff] %v4853_v11  ;;  %1214 = vmatpush1.msra.mxu1 %v7574_v7  ;;  %7576 = vst [vmem:[#allocation137_spill] sm:$0xff] %v4860_v6  ;;  %v7579_v54 = vld [vmem:[#allocation76_spill] sm:$0xff]  ;;  %v4868_v7 = vand.u32 4294901760, %v347_v15  ;;  %v363_v15 = vsub.f32 %v4836_v55, %v4860_v6  ;;  %v4887_v12 = vand.u32 4294901760, %v51_v60  ;;  %v7596_v6 = vld [vmem:[#allocation51_spill] sm:$0xff] }
  0x97   :  { %994 = vmatprep.subr.mxu0 %v7575_v22  ;;  %1216 = vmatprep.subr.mxu1 %v7578_v19  ;;  %v4871_v22 = vand.u32 4294901760, %v4847_v63  ;;  %7583 = vst [vmem:[#allocation141_spill] sm:$0xff] %v4874_v28  ;;  %v50_v19 = vld [vmem:[#allocation2 + $0x50] sm:$0xff]  ;;  %v53_v55 = vld [vmem:[#allocation2 + $0x68] sm:$0xff] }
  0x98   :  { %333 = vmatprep.mubr.f32.mxu0 %v4840_v24  ;;  %997 = vmatpush2.msra.mxu0 %v7579_v54  ;;  %7581 = vst [vmem:[#allocation139_spill] sm:$0xff] %v4868_v7  ;;  %v7586_v24 = vld [vmem:[#allocation80_spill] sm:$0xff]  ;;  %v4880_v54 = vand.u32 4294901760, %v353_v10  ;;  %7589 = vst [vmem:[#allocation144_spill] sm:$0xff] %v4887_v12 }
  0x99   :  { %1218 = vmatpush1.msra.mxu1 %v7580_v49  ;;  %7582 = vst [vmem:[#allocation140_spill] sm:$0xff] %v4871_v22  ;;  %339 = vmatmul.mubr.f32.gmra.mxu0 %v4853_v11  ;;  %v4885_v49 = vsub.f32 %v48_v16, %v4862_v61  ;;  %v7591_v11 = vld [vmem:[#allocation82_spill] sm:$0xff]  ;;  %v369_v10 = vsub.f32 %v4847_v63, %v4871_v22  ;;  %v7595_v16 = vld [vmem:[#allocation84_spill] sm:$0xff]  ;;  %v7601_v22 = vld [vmem:[#allocation53_spill] sm:$0xff]  ;;  %v4923_v63 = vand.u32 4294901760, %v53_v55 }
  0x9a   :  { %1000 = vmatprep.subr.mxu0 %v7584_v9  ;;  %1220 = vmatprep.subr.mxu1 %v7585_v48  ;;  %7587 = vst [vmem:[#allocation142_spill] sm:$0xff] %v4880_v54  ;;  %v7592_v9 = vld [vmem:[#allocation49_spill] sm:$0xff]  ;;  %v4898_v48 = vand.u32 4294901760, %v50_v19 }
  0x9b   :  { %1003 = vmatpush2.msra.mxu0 %v7586_v24  ;;  %7588 = vst [vmem:[#allocation143_spill] sm:$0xff] %v4885_v49  ;;  %1222 = vmatpush1.msra.mxu1 %v7590_v44  ;;  %v4896_v24 = vand.u32 4294901760, %v4874_v28  ;;  %v7600_v44 = vld [vmem:[#allocation86_spill] sm:$0xff]  ;;  %7605 = vst [vmem:[#allocation152_spill] sm:$0xff] %v4923_v63 }
  0x9c   :  { %1006 = vmatprep.subr.mxu0 %v7591_v11  ;;  %1224 = vmatprep.subr.mxu1 %v7592_v9  ;;  %7594 = vst [vmem:[#allocation146_spill] sm:$0xff] %v4898_v48  ;;  %v4904_v9 = vand.u32 4294901760, %v363_v15  ;;  %v4910_v11 = vsub.f32 %v51_v60, %v4887_v12  ;;  %v7606_v60 = vld [vmem:[#allocation55_spill] sm:$0xff] }
  0x9d   :  { %349 = vmatprep.mubr.f32.mxu0 %v4868_v7  ;;  %7593 = vst [vmem:[#allocation145_spill] sm:$0xff] %v4896_v24  ;;  %1009 = vmatpush2.msra.mxu0 %v7595_v16  ;;  %v4907_v7 = vand.u32 4294901760, %v4885_v49  ;;  %v52_v16 = vld [vmem:[#allocation2 + $0x60] sm:$0xff]  ;;  %v379_v15 = vsub.f32 %v4874_v28, %v4896_v24  ;;  %v55_v28 = vld [vmem:[#allocation2 + $0x78] sm:$0xff] }
  0x9e   :  { %1226 = vmatpush1.msra.mxu1 %v7596_v6  ;;  %355 = vmatmul.mubr.f32.gmra.mxu0 %v4880_v54  ;;  %7597 = vst [vmem:[#allocation147_spill] sm:$0xff] %v4904_v9  ;;  %7599 = vst [vmem:[#allocation149_spill] sm:$0xff] %v4910_v11  ;;  %v7602_v6 = vld [vmem:[#allocation88_spill] sm:$0xff]  ;;  %v4916_v54 = vand.u32 4294901760, %v369_v10  ;;  %v7612_v24 = vld [vmem:[#allocation59_spill] sm:$0xff] }
  0x9f   :  { %834 = vmatprep.mubr.f32.mxu1 %v4765_v56  ;;  %7598 = vst [vmem:[#allocation148_spill] sm:$0xff] %v4907_v7  ;;  %1012 = vmatprep.subr.mxu0 %v7600_v44  ;;  %v4921_v56 = vsub.f32 %v50_v19, %v4898_v48  ;;  %v7607_v44 = vld [vmem:[#allocation90_spill] sm:$0xff]  ;;  %v385_v10 = vsub.f32 %v4885_v49, %v4907_v7  ;;  %v7611_v19 = vld [vmem:[#allocation92_spill] sm:$0xff]  ;;  %v7617_v7 = vld [vmem:[#allocation61_spill] sm:$0xff]  ;;  %v4959_v49 = vand.u32 4294901760, %v55_v28 }
  0xa0   :  { %1228 = vmatprep.subr.mxu1 %v7601_v22  ;;  %836 = vmatmul.mubr.f32.gmra.mxu1 %v4771_v51  ;;  %7603 = vst [vmem:[#allocation150_spill] sm:$0xff] %v4916_v54  ;;  %v7608_v22 = vld [vmem:[#allocation57_spill] sm:$0xff]  ;;  %v4932_v51 = vand.u32 4294901760, %v4910_v11 }
  0xa1   :  { %1015 = vmatpush2.msra.mxu0 %v7602_v6  ;;  %7604 = vst [vmem:[#allocation151_spill] sm:$0xff] %v4921_v56  ;;  %1230 = vmatpush2.msra.mxu1 %v7606_v60  ;;  %v4934_v6 = vand.u32 4294901760, %v52_v16  ;;  %v7616_v60 = vld [vmem:[#allocation94_spill] sm:$0xff]  ;;  %7621 = vst [vmem:[#allocation160_spill] sm:$0xff] %v4959_v49 }
  0xa2   :  { %1018 = vmatprep.subr.mxu0 %v7607_v44  ;;  %1232 = vmatprep.subr.mxu1 %v7608_v22  ;;  %7609 = vst [vmem:[#allocation153_spill] sm:$0xff] %v4932_v51  ;;  %v4940_v22 = vand.u32 4294901760, %v379_v15  ;;  %v4946_v44 = vsub.f32 %v53_v55, %v4923_v63  ;;  %v395_v15 = vsub.f32 %v4910_v11, %v4932_v51  ;;  %v7622_v55 = vld [vmem:[#allocation63_spill] sm:$0xff] }
  0xa3   :  { %365 = vmatprep.mubr.f32.mxu0 %v4904_v9  ;;  %7610 = vst [vmem:[#allocation154_spill] sm:$0xff] %v4934_v6  ;;  %1021 = vmatpush2.msra.mxu0 %v7611_v19  ;;  %v4943_v9 = vand.u32 4294901760, %v4921_v56  ;;  %v54_v19 = vld [vmem:[#allocation2 + $0x70] sm:$0xff]  ;;  %v7628_v51 = vld [vmem:[#allocation67_spill] sm:$0xff] }
  0xa4   :  { %1234 = vmatpush2.msra.mxu1 %v7612_v24  ;;  %371 = vmatmul.mubr.f32.gmra.mxu0 %v4916_v54  ;;  %7613 = vst [vmem:[#allocation155_spill] sm:$0xff] %v4940_v22  ;;  %7615 = vst [vmem:[#allocation157_spill] sm:$0xff] %v4946_v44  ;;  %v7618_v24 = vld [vmem:[#allocation96_spill] sm:$0xff]  ;;  %v4952_v54 = vand.u32 4294901760, %v385_v10 }
  0xa5   :  { %842 = vmatprep.mubr.f32.mxu1 %v4782_v29  ;;  %7614 = vst [vmem:[#allocation156_spill] sm:$0xff] %v4943_v9  ;;  %1024 = vmatprep.subr.mxu0 %v7616_v60  ;;  %v4957_v29 = vsub.f32 %v52_v16, %v4934_v6  ;;  %v7623_v60 = vld [vmem:[#allocation98_spill] sm:$0xff]  ;;  %v401_v10 = vsub.f32 %v4921_v56, %v4943_v9  ;;  %v7627_v16 = vld [vmem:[#allocation100_spill] sm:$0xff]  ;;  %v7633_v9 = vld [vmem:[#allocation69_spill] sm:$0xff] }
  0xa6   :  { %1236 = vmatprep.subr.mxu1 %v7617_v7  ;;  %844 = vmatmul.mubr.f32.gmra.mxu1 %v4791_v26  ;;  %7619 = vst [vmem:[#allocation158_spill] sm:$0xff] %v4952_v54  ;;  %v7624_v7 = vld [vmem:[#allocation65_spill] sm:$0xff]  ;;  %v4968_v26 = vand.u32 4294901760, %v4946_v44 }
  0xa7   :  { %1027 = vmatpush2.msra.mxu0 %v7618_v24  ;;  %7620 = vst [vmem:[#allocation159_spill] sm:$0xff] %v4957_v29  ;;  %1238 = vmatpush2.msra.mxu1 %v7622_v55  ;;  %v4970_v24 = vand.u32 4294901760, %v54_v19  ;;  %v7632_v55 = vld [vmem:[#allocation101_spill] sm:$0xff] }
  0xa8   :  { %1030 = vmatprep.subr.mxu0 %v7623_v60  ;;  %1240 = vmatprep.subr.mxu1 %v7624_v7  ;;  %7625 = vst [vmem:[#allocation161_spill] sm:$0xff] %v4968_v26  ;;  %v4976_v60 = vand.u32 4294901760, %v395_v15  ;;  %v4982_v7 = vsub.f32 %v55_v28, %v4959_v49  ;;  %v411_v15 = vsub.f32 %v4946_v44, %v4968_v26  ;;  %v7638_v28 = vld [vmem:[#allocation104_spill] sm:$0xff]  ;;  %v7639_v56 = vld [vmem:[#allocation73_spill] sm:$0xff] }
  0xa9   :  { %381 = vmatprep.mubr.f32.mxu0 %v4940_v22  ;;  %7626 = vst [vmem:[#allocation162_spill] sm:$0xff] %v4970_v24  ;;  %1033 = vmatpush2.msra.mxu0 %v7627_v16  ;;  %v4979_v22 = vand.u32 4294901760, %v4957_v29  ;;  %v7634_v16 = vld [vmem:[#allocation102_spill] sm:$0xff] }
  0xaa   :  { %1242 = vmatpush2.msra.mxu1 %v7628_v51  ;;  %387 = vmatmul.mubr.f32.gmra.mxu0 %v4952_v54  ;;  %7629 = vst [vmem:[#allocation163_spill] sm:$0xff] %v4976_v60  ;;  %7631 = vst [vmem:[#allocation165_spill] sm:$0xff] %v4982_v7  ;;  %v4988_v51 = vand.u32 4294901760, %v401_v10  ;;  %v4993_v54 = vsub.f32 %v54_v19, %v4970_v24  ;;  %v5002_v10 = vand.u32 4294901760, %v4982_v7  ;;  %v5008_v19 = vand.u32 4294901760, %v411_v15  ;;  %v7648_v15 = vld [vmem:[#allocation81_spill] sm:$0xff] }
  0xab   :  { %850 = vmatprep.mubr.f32.mxu1 %v4813_v39  ;;  %7630 = vst [vmem:[#allocation164_spill] sm:$0xff] %v4979_v22  ;;  %1036 = vmatprep.subr.mxu0 %v7632_v55  ;;  %v7637_v39 = vld [vmem:[#allocation71_spill] sm:$0xff] }
  0xac   :  { %1244 = vmatprep.subr.mxu1 %v7633_v9  ;;  %852 = vmatmul.mubr.f32.gmra.mxu1 %v4824_v58  ;;  %7635 = vst [vmem:[#allocation101_spill] sm:$0xff] %v4988_v51  ;;  %7636 = vst [vmem:[#allocation69_spill] sm:$0xff] %v4993_v54  ;;  %v417_v58 = vsub.f32 %v4957_v29, %v4979_v22 }
  0xad   :  { %1039 = vmatpush2.msra.mxu0 %v7634_v16  ;;  %1246 = vmatpush2.msra.mxu1 %v7637_v39  ;;  %7640 = vst [vmem:[#allocation71_spill] sm:$0xff] %v5002_v10  ;;  %v7641_v16 = vld [vmem:[#allocation75_spill] sm:$0xff]  ;;  %7642 = vst [vmem:[#allocation166_spill] sm:$0xff] %v5008_v19 }
  0xae   :  { %1042 = vmatprep.subr.mxu0 %v7638_v28  ;;  %1248 = vmatprep.subr.mxu1 %v7639_v56  ;;  %v5011_v56 = vand.u32 4294901760, %v4993_v54  ;;  %v7645_v28 = vld [vmem:[#allocation77_spill] sm:$0xff] }
  0xaf   :  { %397 = vmatprep.mubr.f32.mxu0 %v4976_v60  ;;  %1045 = vmatpush2.msra.mxu0 %v4581_v50  ;;  %v7644_v60 = vld [vmem:[#allocation108_spill] sm:$0xff]  ;;  %v5017_v50 = vand.u32 4294901760, %v417_v58 }
  0xb0   :  { %1250 = vmatpush2.msra.mxu1 %v7641_v16  ;;  %403 = vmatmul.mubr.f32.gmra.mxu0 %v4988_v51  ;;  %7643 = vst [vmem:[#allocation167_spill] sm:$0xff] %v5011_v56  ;;  %v427_v51 = vsub.f32 %v4982_v7, %v5002_v10  ;;  %v7647_v16 = vld [vmem:[#allocation79_spill] sm:$0xff] }
  0xb1   :  { %858 = vmatprep.mubr.f32.mxu1 %v4849_v57  ;;  %1048 = vmatprep.subr.mxu0 %v7644_v60  ;;  %7646 = vst [vmem:[#allocation108_spill] sm:$0xff] %v5017_v50  ;;  %v433_v57 = vsub.f32 %v4993_v54, %v5011_v56 }
  0xb2   :  { %1252 = vmatprep.subr.mxu1 %v7645_v28  ;;  %860 = vmatmul.mubr.f32.gmra.mxu1 %v4862_v61  ;;  %v7649_v61 = vld [vmem:[#allocation83_spill] sm:$0xff]  ;;  %v5031_v58 = vand.u32 4294901760, %v427_v51 }
  0xb3   :  { %1051 = vmatpush2.msra.mxu0 %v4607_v36  ;;  %1254 = vmatpush2.msra.mxu1 %v7647_v16  ;;  %v7655_v51 = vld [vmem:[#allocation91_spill] sm:$0xff] }
  0xb4   :  { %1054 = vmatprep.subr.mxu0 %v4625_v46  ;;  %1256 = vmatprep.subr.mxu1 %v7648_v15  ;;  %7650 = vst [vmem:[#allocation77_spill] sm:$0xff] %v5031_v58  ;;  %v7651_v46 = vld [vmem:[#allocation85_spill] sm:$0xff]  ;;  %v7653_v15 = vld [vmem:[#allocation87_spill] sm:$0xff] }
  0xb5   :  { %413 = vmatprep.mubr.f32.mxu0 %v5008_v19  ;;  %1057 = vmatpush2.msra.mxu0 %v4636_v47  ;;  %v5037_v19 = vand.u32 4294901760, %v433_v57  ;;  %v7656_v57 = vld [vmem:[#allocation93_spill] sm:$0xff] }
  0xb6   :  { %1258 = vmatpush2.msra.mxu1 %v7649_v61  ;;  %419 = vmatmul.mubr.f32.gmra.mxu0 %v5017_v50  ;;  %v7654_v61 = vld [vmem:[#allocation89_spill] sm:$0xff]  ;;  %v7657_v50 = vld [vmem:[#allocation95_spill] sm:$0xff] }
  0xb7   :  { %866 = vmatprep.mubr.f32.mxu1 %v4887_v12  ;;  %1060 = vmatprep.subr.mxu0 %v4648_v20  ;;  %7652 = vst [vmem:[#allocation79_spill] sm:$0xff] %v5037_v19 }
  0xb8   :  { %1260 = vmatprep.subr.mxu1 %v7651_v46  ;;  %868 = vmatmul.mubr.f32.gmra.mxu1 %v4898_v48  ;;  %v7663_v48 = vld [vmem:[#allocation103_spill] sm:$0xff] }
  0xb9   :  { %1063 = vmatpush2.msra.mxu0 %v4661_v27  ;;  %1262 = vmatpush2.msra.mxu1 %v7653_v15 }
  0xba   :  { %1066 = vmatprep.subr.mxu0 %v4672_v30  ;;  %1264 = vmatprep.subr.mxu1 %v7654_v61 }
  0xbb   :  { %429 = vmatprep.mubr.f32.mxu0 %v5031_v58  ;;  %1069 = vmatpush2.msra.mxu0 %v4681_v13  ;;  %v7658_v58 = vld [vmem:[#allocation97_spill] sm:$0xff] }
  0xbc   :  { %1266 = vmatpush2.msra.mxu1 %v7655_v51  ;;  %435 = vmatmul.mubr.f32.gmra.mxu0 %v5037_v19  ;;  %v7659_v19 = vld [vmem:[#allocation99_spill] sm:$0xff] }
  0xbd   :  { %874 = vmatprep.mubr.f32.mxu1 %v4923_v63  ;;  %1072 = vmatprep.subr.mxu0 %v4698_v1  ;;  %v7661_v63 = vand.u32 4294901760, %v3887_v23  ;;  %v7667_v23 = vand.u32 4294901760, %v3916_v35  ;;  %v7672_v35 = vld [vmem:[#allocation115_spill] sm:$0xff] }
  0xbe   :  { %1268 = vmatprep.subr.mxu1 %v7656_v57  ;;  %876 = vmatmul.mubr.f32.gmra.mxu1 %v4934_v6  ;;  %v7660_v6 = vand.u32 4294901760, %v3874_v18  ;;  %v7666_v18 = vld [vmem:[#allocation107_spill] sm:$0xff] }
  0xbf   :  { %1075 = vmatpush2.msra.mxu0 %v4707_v53  ;;  %1270 = vmatpush2.msra.mxu1 %v7657_v50 }
  0xc0   :  { %1078 = vmatprep.subr.mxu0 %v4720_v33  ;;  %1272 = vmatprep.subr.mxu1 %v7658_v58 }
  0xc1   :  { %1081 = vmatpush2.msra.mxu0 %v4728_v62  ;;  %1084 = vmatprep.mubr.f32.mxu0 %v4656_v21  ;;  %v7662_v21 = vand.u32 4294901760, %v3893_v25  ;;  %v7668_v25 = vand.u32 4294901760, %v3929_v40  ;;  %v7673_v40 = vand.u32 4294901760, %v3981_v0  ;;  %v7680_v0 = vld [vmem:[#allocation11_spill] sm:$0xff] }
  0xc2   :  { %1274 = vmatpush2.msra.mxu1 %v7659_v19  ;;  %882 = vmatprep.mubr.f32.mxu1 %v4959_v49  ;;  %v7665_v49 = vand.u32 4294901760, %v3907_v31  ;;  %v7670_v31 = vld [vmem:[#allocation114_spill] sm:$0xff] }
  0xc3   :  { %1087 = vmatmul.mubr.f32.vlgmr.msra.gmra.mxu0 %v4668_v32  ;;  %1276 = vmatprep.subr.mxu1 %v4537_v43  ;;  %v7664_v32 = vld [vmem:[#allocation105_spill] sm:$0xff] }
  0xc4   :  { %1391 = vmatprep.subr.mxu0 %v7660_v6  ;;  %884 = vmatmul.mubr.f32.gmra.mxu1 %v4970_v24  ;;  %v7671_v6 = vand.u32 4294901760, %v3969_v59  ;;  %v7676_v59 = vld [vmem:[#allocation132_spill] sm:$0xff] }
  0xc5   :  { %1395 = vmatpush1.msra.mxu0 %v7661_v63  ;;  %1278 = vmatpush2.msra.mxu1 %v4548_v37  ;;  %v7669_v63 = vand.u32 4294901760, %v3943_v45  ;;  %v7674_v45 = vand.u32 4294901760, %v3992_v8  ;;  %v7682_v8 = vld [vmem:[#allocation126_spill] sm:$0xff] }
  0xc6   :  { %1399 = vmatprep.subr.mxu0 %v7662_v21  ;;  %1280 = vmatprep.subr.mxu1 %v7663_v48  ;;  %v7675_v21 = vand.u32 4294901760, %v4003_v42  ;;  %v7685_v42 = vld [vmem:[#allocation12_spill] sm:$0xff] }
  0xc7   :  { %1094 = vmatprep.mubr.f32.mxu0 %v4778_v52  ;;  %1282 = vmatpush2.msra.mxu1 %v7664_v32 }
  0xc8   :  { %1403 = vmatpush1.msra.mxu0 %v7665_v49  ;;  %1284 = vmatprep.subr.mxu1 %v7666_v18  ;;  %v7677_v49 = vld [vmem:[#allocation124_spill] sm:$0xff] }
  0xc9   :  { %1097 = vmatmul.mubr.f32.gmra.mxu0 %v4787_v41  ;;  %1407 = vmatprep.subr.mxu0 %v7667_v23  ;;  %v7678_v23 = vld [vmem:[#allocation28_spill] sm:$0xff] }
  0xca   :  { %1286 = vmatpush2.msra.mxu1 %v4603_v14  ;;  %1411 = vmatpush1.msra.mxu0 %v7668_v25  ;;  %v7679_v25 = vand.u32 4294901760, %v7678_v23  ;;  %v7691_v23 = vld [vmem:[#allocation14_spill] sm:$0xff] }
  0xcb   :  { %1288 = vmatprep.subr.mxu1 %v4616_v2  ;;  %1415 = vmatprep.subr.mxu0 %v7669_v63  ;;  %v7683_v63 = vld [vmem:[#allocation30_spill] sm:$0xff] }
  0xcc   :  { %1104 = vmatprep.mubr.f32.mxu0 %v4801_v34  ;;  %1290 = vmatpush2.msra.mxu1 %v4632_v38 }
  0xcd   :  { %1294 = vmatprep.mubr.f32.mxu1 %v7670_v31  ;;  %1419 = vmatpush1.msra.mxu0 %v7671_v6  ;;  %v7686_v6 = vld [vmem:[#allocation32_spill] sm:$0xff] }
  0xce   :  { %1298 = vmatmul.mubr.f32.vlgmr.msra.gmra.mxu1 %v7672_v35  ;;  %1107 = vmatmul.mubr.f32.gmra.mxu0 %v4811_v17  ;;  %v79_v35 = vld [vmem:[#allocation5 + $0xb8] sm:$0xff] }
  0xcf   :  { %1423 = vmatprep.subr.mxu0 %v7673_v40  ;;  %1710 = vmatprep.subr.mxu1 %v3854_v3  ;;  %v7681_v3 = vld [vmem:[#allocation134_spill] sm:$0xff]  ;;  %v7688_v40 = vld [vmem:[#allocation13_spill] sm:$0xff]  ;;  %v5477_v41 = vand.u32 4294901760, %v79_v35 }
  0xd0   :  { %1427 = vmatpush1.msra.mxu0 %v7674_v45  ;;  %1712 = vmatpush1.msra.mxu1 %v3856_v4  ;;  %v7684_v4 = vand.u32 4294901760, %v7683_v63  ;;  %v7689_v45 = vld [vmem:[#allocation34_spill] sm:$0xff]  ;;  %v7696_v63 = vld [vmem:[#allocation15_spill] sm:$0xff] }
  0xd1   :  { %1431 = vmatprep.subr.mxu0 %v7675_v21  ;;  %1714 = vmatprep.subr.mxu1 %v3858_v5  ;;  %v7687_v5 = vand.u32 4294901760, %v7686_v6  ;;  %v7690_v21 = vand.u32 4294901760, %v7689_v45  ;;  %v7699_v6 = vld [vmem:[#allocation38_spill] sm:$0xff]  ;;  %v7702_v45 = vld [vmem:[#allocation40_spill] sm:$0xff] }
  0xd2   :  { %1114 = vmatprep.mubr.f32.mxu0 %v7676_v59  ;;  %1306 = vmatprep.mubr.f32.mxu1 %v7677_v49  ;;  %v82_v59 = vld [vmem:[#allocation5 + $0xd0] sm:$0xff] }
  0xd3   :  { %1435 = vmatpush1.msra.mxu0 %v7679_v25  ;;  %1716 = vmatpush1.msra.mxu1 %v7680_v0  ;;  %v7692_v25 = vld [vmem:[#allocation141_spill] sm:$0xff]  ;;  %v5465_v52 = vand.u32 4294901760, %v82_v59 }
  0xd4   :  { %1117 = vmatmul.mubr.f32.gmra.mxu0 %v7681_v3  ;;  %1310 = vmatmul.mubr.f32.gmra.mxu1 %v7682_v8  ;;  %v7693_v0 = vld [vmem:[#allocation129_spill] sm:$0xff]  ;;  %v7694_v8 = vld [vmem:[#allocation36_spill] sm:$0xff] }
  0xd5   :  { %1439 = vmatprep.subr.mxu0 %v7684_v4  ;;  %1718 = vmatprep.subr.mxu1 %v7685_v42  ;;  %v7695_v3 = vand.u32 4294901760, %v7694_v8  ;;  %v7697_v4 = vld [vmem:[#allocation143_spill] sm:$0xff]  ;;  %v7708_v8 = vld [vmem:[#allocation137_spill] sm:$0xff] }
  0xd6   :  { %1443 = vmatpush1.msra.mxu0 %v7687_v5  ;;  %1720 = vmatpush1.msra.mxu1 %v7688_v40  ;;  %v7698_v42 = vld [vmem:[#allocation131_spill] sm:$0xff]  ;;  %v7700_v5 = vand.u32 4294901760, %v7699_v6  ;;  %v7701_v40 = vld [vmem:[#allocation16_spill] sm:$0xff] }
  0xd7   :  { %1447 = vmatprep.subr.mxu0 %v7690_v21  ;;  %1722 = vmatprep.subr.mxu1 %v7691_v23  ;;  %v7703_v21 = vand.u32 4294901760, %v7702_v45  ;;  %v7704_v23 = vld [vmem:[#allocation17_spill] sm:$0xff]  ;;  %v7711_v6 = vld [vmem:[#allocation19_spill] sm:$0xff]  ;;  %v7714_v45 = vld [vmem:[#allocation46_spill] sm:$0xff] }
  0xd8   :  { %1124 = vmatprep.mubr.f32.mxu0 %v7692_v25  ;;  %1318 = vmatprep.mubr.f32.mxu1 %v7693_v0  ;;  %v7705_v0 = vld [vmem:[#allocation42_spill] sm:$0xff]  ;;  %7870 = vst [vmem:[#allocation19_spill] sm:$0xff] %v5477_v41 }
  0xd9   :  { %1451 = vmatpush1.msra.mxu0 %v7695_v3  ;;  %1724 = vmatpush1.msra.mxu1 %v7696_v63  ;;  %v7706_v25 = vand.u32 4294901760, %v7705_v0  ;;  %v7707_v3 = vld [vmem:[#allocation18_spill] sm:$0xff]  ;;  %v7709_v63 = vld [vmem:[#allocation44_spill] sm:$0xff] }
  0xda   :  { %1127 = vmatmul.mubr.f32.gmra.mxu0 %v7697_v4  ;;  %1322 = vmatmul.mubr.f32.gmra.mxu1 %v7698_v42  ;;  %v7710_v42 = vand.u32 4294901760, %v7709_v63  ;;  %v7716_v0 = vld [vmem:[#allocation20_spill] sm:$0xff]  ;;  %v7723_v63 = vld [vmem:[#allocation145_spill] sm:$0xff]  ;;  %v7858_v4 = vld [vmem:[#allocation123_spill] sm:$0xff]  ;;  %7867 = vst [vmem:[#allocation18_spill] sm:$0xff] %v5465_v52 }
  0xdb   :  { %1455 = vmatprep.subr.mxu0 %v7700_v5  ;;  %1726 = vmatprep.subr.mxu1 %v7701_v40  ;;  %v7712_v5 = vld [vmem:[#allocation151_spill] sm:$0xff]  ;;  %v7713_v40 = vld [vmem:[#allocation140_spill] sm:$0xff] }
  0xdc   :  { %1459 = vmatpush1.msra.mxu0 %v7703_v21  ;;  %1728 = vmatpush1.msra.mxu1 %v7704_v23  ;;  %v7715_v21 = vand.u32 4294901760, %v7714_v45  ;;  %v7726_v45 = vld [vmem:[#allocation23_spill] sm:$0xff] }
  0xdd   :  { %1463 = vmatprep.subr.mxu0 %v7706_v25  ;;  %1730 = vmatprep.subr.mxu1 %v7707_v3  ;;  %v7717_v25 = vld [vmem:[#allocation48_spill] sm:$0xff]  ;;  %v7719_v3 = vld [vmem:[#allocation21_spill] sm:$0xff] }
  0xde   :  { %1134 = vmatprep.mubr.f32.mxu0 %v4910_v11  ;;  %1330 = vmatprep.mubr.f32.mxu1 %v7708_v8  ;;  %v7718_v23 = vand.u32 4294901760, %v7717_v25  ;;  %v7720_v8 = vld [vmem:[#allocation50_spill] sm:$0xff] }
  0xdf   :  { %1467 = vmatpush1.msra.mxu0 %v7710_v42  ;;  %1732 = vmatpush1.msra.mxu1 %v7711_v6  ;;  %v7721_v11 = vand.u32 4294901760, %v7720_v8  ;;  %v7722_v42 = vld [vmem:[#allocation22_spill] sm:$0xff]  ;;  %v7724_v6 = vld [vmem:[#allocation52_spill] sm:$0xff] }
  0xe0   :  { %1137 = vmatmul.mubr.f32.gmra.mxu0 %v7712_v5  ;;  %1334 = vmatmul.mubr.f32.gmra.mxu1 %v7713_v40  ;;  %v7725_v40 = vand.u32 4294901760, %v7724_v6  ;;  %v7730_v8 = vld [vmem:[#allocation24_spill] sm:$0xff]  ;;  %v7737_v6 = vld [vmem:[#allocation153_spill] sm:$0xff] }
  0xe1   :  { %1471 = vmatprep.subr.mxu0 %v7715_v21  ;;  %1734 = vmatprep.subr.mxu1 %v7716_v0  ;;  %v7727_v21 = vld [vmem:[#allocation148_spill] sm:$0xff]  ;;  %v7728_v0 = vld [vmem:[#allocation54_spill] sm:$0xff] }
  0xe2   :  { %1475 = vmatpush1.msra.mxu0 %v7718_v23  ;;  %1736 = vmatpush1.msra.mxu1 %v7719_v3  ;;  %v7729_v25 = vand.u32 4294901760, %v7728_v0  ;;  %v7733_v3 = vld [vmem:[#allocation25_spill] sm:$0xff]  ;;  %v7740_v0 = vld [vmem:[#allocation27_spill] sm:$0xff] }
  0xe3   :  { %1479 = vmatprep.subr.mxu0 %v7721_v11  ;;  %1738 = vmatprep.subr.mxu1 %v7722_v42  ;;  %v7731_v11 = vld [vmem:[#allocation56_spill] sm:$0xff]  ;;  %v7734_v42 = vld [vmem:[#allocation58_spill] sm:$0xff] }
  0xe4   :  { %1144 = vmatprep.mubr.f32.mxu0 %v4946_v44  ;;  %1342 = vmatprep.mubr.f32.mxu1 %v7723_v63  ;;  %v7732_v23 = vand.u32 4294901760, %v7731_v11  ;;  %v7735_v63 = vand.u32 4294901760, %v7734_v42  ;;  %v7747_v42 = vld [vmem:[#allocation31_spill] sm:$0xff] }
  0xe5   :  { %1483 = vmatpush1.msra.mxu0 %v7725_v40  ;;  %1740 = vmatpush1.msra.mxu1 %v7726_v45  ;;  %v7736_v40 = vld [vmem:[#allocation26_spill] sm:$0xff]  ;;  %v7738_v45 = vld [vmem:[#allocation60_spill] sm:$0xff] }
  0xe6   :  { %1147 = vmatmul.mubr.f32.gmra.mxu0 %v4957_v29  ;;  %1346 = vmatmul.mubr.f32.gmra.mxu1 %v7727_v21  ;;  %v7739_v21 = vand.u32 4294901760, %v7738_v45  ;;  %v7751_v45 = vld [vmem:[#allocation68_spill] sm:$0xff] }
  0xe7   :  { %1487 = vmatprep.subr.mxu0 %v7729_v25  ;;  %1742 = vmatprep.subr.mxu1 %v7730_v8  ;;  %v7741_v25 = vld [vmem:[#allocation156_spill] sm:$0xff]  ;;  %v7742_v8 = vld [vmem:[#allocation62_spill] sm:$0xff] }
  0xe8   :  { %1491 = vmatpush1.msra.mxu0 %v7732_v23  ;;  %1744 = vmatpush1.msra.mxu1 %v7733_v3  ;;  %v7743_v11 = vand.u32 4294901760, %v7742_v8  ;;  %v7744_v23 = vld [vmem:[#allocation29_spill] sm:$0xff]  ;;  %v7754_v8 = vld [vmem:[#allocation70_spill] sm:$0xff] }
  0xe9   :  { %1495 = vmatprep.subr.mxu0 %v7735_v63  ;;  %1746 = vmatprep.subr.mxu1 %v7736_v40  ;;  %v7745_v63 = vld [vmem:[#allocation64_spill] sm:$0xff]  ;;  %v7748_v40 = vld [vmem:[#allocation66_spill] sm:$0xff] }
  0xea   :  { %1154 = vmatprep.mubr.f32.mxu0 %v4982_v7  ;;  %1354 = vmatprep.mubr.f32.mxu1 %v7737_v6  ;;  %v7746_v3 = vand.u32 4294901760, %v7745_v63  ;;  %v7749_v6 = vand.u32 4294901760, %v7748_v40  ;;  %v7757_v63 = vld [vmem:[#allocation72_spill] sm:$0xff] }
  0xeb   :  { %1499 = vmatpush1.msra.mxu0 %v7739_v21  ;;  %1748 = vmatpush1.msra.mxu1 %v7740_v0  ;;  %v7750_v21 = vld [vmem:[#allocation33_spill] sm:$0xff]  ;;  %v7752_v0 = vand.u32 4294901760, %v7751_v45 }
  0xec   :  { %1157 = vmatmul.mubr.f32.gmra.mxu0 %v4993_v54  ;;  %1358 = vmatmul.mubr.f32.gmra.mxu1 %v7741_v25  ;;  %v7753_v25 = vld [vmem:[#allocation35_spill] sm:$0xff] }
  0xed   :  { %1503 = vmatprep.subr.mxu0 %v7743_v11  ;;  %1750 = vmatprep.subr.mxu1 %v7744_v23  ;;  %v7755_v11 = vand.u32 4294901760, %v7754_v8  ;;  %v7756_v23 = vld [vmem:[#allocation37_spill] sm:$0xff]  ;;  %v7766_v8 = vld [vmem:[#allocation78_spill] sm:$0xff] }
  0xee   :  { %1507 = vmatpush1.msra.mxu0 %v7746_v3  ;;  %1752 = vmatpush1.msra.mxu1 %v7747_v42  ;;  %v7758_v3 = vand.u32 4294901760, %v7757_v63  ;;  %v7760_v42 = vld [vmem:[#allocation74_spill] sm:$0xff]  ;;  %v7769_v63 = vld [vmem:[#allocation80_spill] sm:$0xff] }
  0xef   :  { %1511 = vmatprep.subr.mxu0 %v7749_v6  ;;  %1754 = vmatprep.subr.mxu1 %v7750_v21  ;;  %v7759_v6 = vld [vmem:[#allocation39_spill] sm:$0xff]  ;;  %v7761_v40 = vand.u32 4294901760, %v7760_v42  ;;  %v7762_v21 = vld [vmem:[#allocation41_spill] sm:$0xff]  ;;  %v7772_v42 = vld [vmem:[#allocation82_spill] sm:$0xff] }
  0xf0   :  { %1366 = vmatprep.mubr.f32.mxu1 %v4968_v26  ;;  %1515 = vmatpush1.msra.mxu0 %v7752_v0  ;;  %v7765_v0 = vld [vmem:[#allocation43_spill] sm:$0xff] }
  0xf1   :  { %1756 = vmatpush1.msra.mxu1 %v7753_v25  ;;  %1519 = vmatprep.subr.mxu0 %v7755_v11  ;;  %v7763_v25 = vld [vmem:[#allocation76_spill] sm:$0xff]  ;;  %v7767_v11 = vand.u32 4294901760, %v7766_v8 }
  0xf2   :  { %1370 = vmatmul.mubr.f32.gmra.mxu1 %v4979_v22  ;;  %1758 = vmatprep.subr.mxu1 %v7756_v23  ;;  %v7764_v45 = vand.u32 4294901760, %v7763_v25  ;;  %v7768_v23 = vld [vmem:[#allocation45_spill] sm:$0xff]  ;;  %v7775_v25 = vld [vmem:[#allocation84_spill] sm:$0xff] }
  0xf3   :  { %1523 = vmatpush2.msra.mxu0 %v7758_v3  ;;  %1760 = vmatpush1.msra.mxu1 %v7759_v6  ;;  %v7770_v3 = vand.u32 4294901760, %v7769_v63  ;;  %v7771_v6 = vld [vmem:[#allocation47_spill] sm:$0xff] }
  0xf4   :  { %1527 = vmatprep.subr.mxu0 %v7761_v40  ;;  %1762 = vmatprep.subr.mxu1 %v7762_v21  ;;  %v7773_v40 = vand.u32 4294901760, %v7772_v42  ;;  %v7774_v21 = vld [vmem:[#allocation49_spill] sm:$0xff] }
  0xf5   :  { %1378 = vmatprep.mubr.f32.mxu1 %v5002_v10  ;;  %1531 = vmatpush2.msra.mxu0 %v7764_v45  ;;  %v7776_v45 = vand.u32 4294901760, %v7775_v25 }
  0xf6   :  { %1764 = vmatpush1.msra.mxu1 %v7765_v0  ;;  %1535 = vmatprep.subr.mxu0 %v7767_v11  ;;  %v7777_v0 = vld [vmem:[#allocation51_spill] sm:$0xff]  ;;  %v7780_v11 = vld [vmem:[#allocation53_spill] sm:$0xff] }
  0xf7   :  { %1382 = vmatmul.mubr.f32.gmra.mxu1 %v5011_v56  ;;  %1766 = vmatprep.subr.mxu1 %v7768_v23  ;;  %v7778_v56 = vld [vmem:[#allocation86_spill] sm:$0xff]  ;;  %v7781_v23 = vld [vmem:[#allocation88_spill] sm:$0xff] }
  0xf8   :  { %1539 = vmatpush2.msra.mxu0 %v7770_v3  ;;  %1768 = vmatpush1.msra.mxu1 %v7771_v6  ;;  %v7779_v8 = vand.u32 4294901760, %v7778_v56  ;;  %v7782_v63 = vand.u32 4294901760, %v7781_v23  ;;  %v7783_v3 = vld [vmem:[#allocation55_spill] sm:$0xff]  ;;  %v7784_v6 = vld [vmem:[#allocation90_spill] sm:$0xff] }
  0xf9   :  { %1543 = vmatprep.subr.mxu0 %v7773_v40  ;;  %1770 = vmatprep.subr.mxu1 %v7774_v21  ;;  %v7785_v42 = vand.u32 4294901760, %v7784_v6  ;;  %v7786_v40 = vld [vmem:[#allocation57_spill] sm:$0xff]  ;;  %v7787_v21 = vld [vmem:[#allocation92_spill] sm:$0xff] }
  0xfa   :  { %1547 = vmatpush2.msra.mxu0 %v7776_v45  ;;  %1772 = vmatpush1.msra.mxu1 %v7777_v0  ;;  %v7788_v25 = vand.u32 4294901760, %v7787_v21  ;;  %v7789_v45 = vld [vmem:[#allocation59_spill] sm:$0xff]  ;;  %v7790_v0 = vld [vmem:[#allocation94_spill] sm:$0xff] }
  0xfb   :  { %1551 = vmatprep.subr.mxu0 %v7779_v8  ;;  %1774 = vmatprep.subr.mxu1 %v7780_v11  ;;  %v7791_v56 = vand.u32 4294901760, %v7790_v0  ;;  %v7792_v8 = vld [vmem:[#allocation61_spill] sm:$0xff]  ;;  %v7793_v11 = vld [vmem:[#allocation96_spill] sm:$0xff]  ;;  %v7803_v0 = vld [vmem:[#allocation102_spill] sm:$0xff] }
  0xfc   :  { %1555 = vmatpush2.msra.mxu0 %v7782_v63  ;;  %1776 = vmatpush2.msra.mxu1 %v7783_v3  ;;  %v7794_v23 = vand.u32 4294901760, %v7793_v11  ;;  %v7795_v63 = vld [vmem:[#allocation63_spill] sm:$0xff]  ;;  %v7796_v3 = vld [vmem:[#allocation98_spill] sm:$0xff] }
  0xfd   :  { %1559 = vmatprep.subr.mxu0 %v7785_v42  ;;  %1778 = vmatprep.subr.mxu1 %v7786_v40  ;;  %v7797_v6 = vand.u32 4294901760, %v7796_v3  ;;  %v7798_v42 = vld [vmem:[#allocation65_spill] sm:$0xff]  ;;  %v7799_v40 = vld [vmem:[#allocation100_spill] sm:$0xff] }
  0xfe   :  { %1563 = vmatpush2.msra.mxu0 %v7788_v25  ;;  %1780 = vmatpush2.msra.mxu1 %v7789_v45  ;;  %v7800_v21 = vand.u32 4294901760, %v7799_v40  ;;  %v7801_v25 = vld [vmem:[#allocation67_spill] sm:$0xff]  ;;  %v7802_v45 = vand.u32 4294901760, %v7632_v55  ;;  %v7811_v55 = vand.u32 4294901760, %v7644_v60  ;;  %v7813_v40 = vld [vmem:[#allocation109_spill] sm:$0xff]  ;;  %v7818_v60 = vand.u32 4294901760, %v4648_v20 }
  0xff   :  { %1567 = vmatprep.subr.mxu0 %v7791_v56  ;;  %1782 = vmatprep.subr.mxu1 %v7792_v8  ;;  %v7804_v56 = vand.u32 4294901760, %v7803_v0  ;;  %v7805_v8 = vld [vmem:[#allocation104_spill] sm:$0xff]  ;;  %v7817_v0 = vld [vmem:[#allocation83_spill] sm:$0xff]  ;;  %v7823_v20 = vand.u32 4294901760, %v4681_v13  ;;  %v7828_v13 = vand.u32 4294901760, %v4707_v53 }
 0x100   :  { %1571 = vmatpush2.msra.mxu0 %v7794_v23  ;;  %1784 = vmatpush2.msra.mxu1 %v7795_v63  ;;  %v7806_v11 = vand.u32 4294901760, %v7805_v8  ;;  %v7807_v23 = vld [vmem:[#allocation73_spill] sm:$0xff]  ;;  %v7808_v63 = vld [vmem:[#allocation106_spill] sm:$0xff] }
 0x101   :  { %1575 = vmatprep.subr.mxu0 %v7797_v6  ;;  %1786 = vmatprep.subr.mxu1 %v7798_v42  ;;  %v7809_v3 = vand.u32 4294901760, %v7808_v63  ;;  %v7810_v6 = vld [vmem:[#allocation75_spill] sm:$0xff]  ;;  %v119_v42 = vld [vmem:[#allocation5 + $0x1f8] sm:$0xff]  ;;  %v114_v8 = vld [vmem:[#allocation5 + $0x1d0] sm:$0xff] }
 0x102   :  { %1579 = vmatpush2.msra.mxu0 %v7800_v21  ;;  %1788 = vmatpush2.msra.mxu1 %v7801_v25  ;;  %v7814_v21 = vand.u32 4294901760, %v7813_v40  ;;  %v7815_v25 = vld [vmem:[#allocation81_spill] sm:$0xff] }
 0x103   :  { %1583 = vmatprep.subr.mxu0 %v7802_v45  ;;  %1790 = vmatprep.subr.mxu1 %v7633_v9  ;;  %v7812_v9 = vand.u32 4294901760, %v4607_v36  ;;  %v7816_v45 = vand.u32 4294901760, %v4636_v47  ;;  %v7822_v47 = vand.u32 4294901760, %v4672_v30 }
 0x104   :  { %1587 = vmatpush2.msra.mxu0 %v7804_v56  ;;  %1792 = vmatpush2.msra.mxu1 %v7637_v39  ;;  %v118_v39 = vld [vmem:[#allocation5 + $0x1f0] sm:$0xff]  ;;  %v115_v56 = vld [vmem:[#allocation5 + $0x1d8] sm:$0xff] }
 0x105   :  { %1591 = vmatprep.subr.mxu0 %v7806_v11  ;;  %1794 = vmatprep.subr.mxu1 %v7807_v23  ;;  %v5262_v36 = vand.u32 4294901760, %v118_v39  ;;  %v111_v11 = vld [vmem:[#allocation5 + $0x1b8] sm:$0xff]  ;;  %v110_v23 = vld [vmem:[#allocation5 + $0x1b0] sm:$0xff]  ;;  %v5273_v63 = vand.u32 4294901760, %v115_v56 }
 0x106   :  { %1595 = vmatpush2.msra.mxu0 %v7809_v3  ;;  %1796 = vmatpush2.msra.mxu1 %v7810_v6  ;;  %v5275_v3 = vand.u32 4294901760, %v114_v8  ;;  %v5283_v30 = vand.u32 4294901760, %v111_v11  ;;  %v106_v6 = vld [vmem:[#allocation5 + $0x190] sm:$0xff] }
 0x107   :  { %1599 = vmatprep.subr.mxu0 %v7811_v55  ;;  %1798 = vmatprep.subr.mxu1 %v7645_v28  ;;  %v5260_v28 = vand.u32 4294901760, %v119_v42  ;;  %7820 = vst [vmem:[#allocation87_spill] sm:$0xff] %v5262_v36  ;;  %7824 = vst [vmem:[#allocation89_spill] sm:$0xff] %v5273_v63  ;;  %v5291_v55 = vand.u32 4294901760, %v110_v23  ;;  %v5304_v53 = vand.u32 4294901760, %v106_v6  ;;  %v5307_v40 = vsub.f32 %v115_v56, %v5273_v63  ;;  %v95_v56 = vld [vmem:[#allocation5 + $0x138] sm:$0xff] }
 0x108   :  { %1603 = vmatpush2.msra.mxu0 %v7812_v9  ;;  %1800 = vmatpush2.msra.mxu1 %v7647_v16  ;;  %v7821_v16 = vand.u32 4294901760, %v4661_v27  ;;  %7825 = vst [vmem:[#allocation91_spill] sm:$0xff] %v5275_v3  ;;  %v7826_v27 = vand.u32 4294901760, %v4698_v1  ;;  %7827 = vst [vmem:[#allocation93_spill] sm:$0xff] %v5283_v30  ;;  %v7830_v1 = vand.u32 4294901760, %v4720_v33  ;;  %v103_v9 = vld [vmem:[#allocation5 + $0x178] sm:$0xff] }
 0x109   :  { %1607 = vmatprep.subr.mxu0 %v7814_v21  ;;  %1802 = vmatprep.subr.mxu1 %v7815_v25  ;;  %7819 = vst [vmem:[#allocation85_spill] sm:$0xff] %v5260_v28  ;;  %7829 = vst [vmem:[#allocation95_spill] sm:$0xff] %v5291_v55  ;;  %v99_v21 = vld [vmem:[#allocation5 + $0x158] sm:$0xff]  ;;  %v7835_v25 = vld [vmem:[#allocation111_spill] sm:$0xff] }
 0x10a   :  { %1611 = vmatpush2.msra.mxu0 %v7816_v45  ;;  %1804 = vmatpush2.msra.mxu1 %v7817_v0  ;;  %7833 = vst [vmem:[#allocation99_spill] sm:$0xff] %v5304_v53  ;;  %v5319_v45 = vsub.f32 %v110_v23, %v5291_v55  ;;  %v5321_v0 = vand.u32 4294901760, %v103_v9  ;;  %v91_v23 = vld [vmem:[#allocation5 + $0x118] sm:$0xff] }
 0x10b   :  { %1615 = vmatprep.subr.mxu0 %v7818_v60  ;;  %1806 = vmatprep.subr.mxu1 %v7651_v46  ;;  %v107_v46 = vld [vmem:[#allocation5 + $0x198] sm:$0xff]  ;;  %v98_v60 = vld [vmem:[#allocation5 + $0x150] sm:$0xff] }
 0x10c   :  { %1619 = vmatpush2.msra.mxu0 %v7821_v16  ;;  %1808 = vmatpush2.msra.mxu1 %v7653_v15  ;;  %v5281_v15 = vsub.f32 %v118_v39, %v5262_v36  ;;  %v102_v39 = vld [vmem:[#allocation5 + $0x170] sm:$0xff]  ;;  %7836 = vst [vmem:[#allocation103_spill] sm:$0xff] %v5321_v0  ;;  %v7852_v54 = vand.u32 4294901760, %v5319_v45 }
 0x10d   :  { %1623 = vmatprep.subr.mxu0 %v7822_v47  ;;  %1810 = vmatprep.subr.mxu1 %v7654_v61  ;;  %v5286_v61 = vsub.f32 %v119_v42, %v5260_v28  ;;  %v7832_v42 = vand.u32 4294901760, %v4728_v62  ;;  %v5314_v62 = vsub.f32 %v111_v11, %v5283_v30  ;;  %v5335_v11 = vand.u32 4294901760, %v99_v21 }
 0x10e   :  { %1627 = vmatpush2.msra.mxu0 %v7823_v20  ;;  %1812 = vmatpush2.msra.mxu1 %v7655_v51  ;;  %v5296_v51 = vand.u32 4294901760, %v107_v46  ;;  %v7162_v47 = vand.u32 4294901760, %v5307_v40  ;;  %v7839_v20 = vld [vmem:[#allocation118_spill] sm:$0xff] }
 0x10f   :  { %1631 = vmatprep.subr.mxu0 %v7826_v27  ;;  %1814 = vmatprep.subr.mxu1 %v7656_v57  ;;  %v5302_v57 = vsub.f32 %v114_v8, %v5275_v3  ;;  %v7157_v33 = vand.u32 4294901760, %v5286_v61  ;;  %v94_v8 = vld [vmem:[#allocation5 + $0x130] sm:$0xff]  ;;  %7838 = vst [vmem:[#allocation107_spill] sm:$0xff] %v5335_v11  ;;  %v5347_v27 = vand.u32 4294901760, %v98_v60  ;;  %v5380_v22 = vsub.f32 %v99_v21, %v5335_v11 }
 0x110   :  { %1635 = vmatpush2.msra.mxu0 %v7828_v13  ;;  %1816 = vmatpush2.msra.mxu1 %v7657_v50  ;;  %7831 = vst [vmem:[#allocation97_spill] sm:$0xff] %v5296_v51  ;;  %v7834_v50 = vld [vmem:[#allocation110_spill] sm:$0xff]  ;;  %v5328_v16 = vsub.f32 %v107_v46, %v5296_v51  ;;  %v5352_v13 = vand.u32 4294901760, %v95_v56 }
 0x111   :  { %1639 = vmatprep.subr.mxu0 %v7830_v1  ;;  %1818 = vmatprep.subr.mxu1 %v7658_v58  ;;  %v7158_v58 = vand.u32 4294901760, %v5281_v15  ;;  %v2162_v46 = vsub.f32 %v5286_v61, %v7157_v33  ;;  %7840 = vst [vmem:[#allocation28_spill] sm:$0xff] %v5347_v27  ;;  %v5354_v1 = vand.u32 4294901760, %v94_v8  ;;  %v5358_v33 = vsub.f32 %v103_v9, %v5321_v0 }
 0x112   :  { %1643 = vmatpush2.msra.mxu0 %v7832_v42  ;;  %1645 = vmatprep.mubr.f32.mxu0 %v7834_v50  ;;  %7841 = vst [vmem:[#allocation11_spill] sm:$0xff] %v5352_v13  ;;  %v2174_v9 = vsub.f32 %v5307_v40, %v7162_v47  ;;  %v7846_v42 = vand.u32 4294901760, %v5302_v57  ;;  %7847 = vst [vmem:[#allocation13_spill] sm:$0xff] %v5380_v22  ;;  %v5385_v26 = vsub.f32 %v98_v60, %v5347_v27 }
 0x113   :  { %1820 = vmatpush2.msra.mxu1 %v7659_v19  ;;  %1647 = vmatmul.mubr.f32.vlgmr.msra.gmra.mxu0 %v7835_v25  ;;  %v5325_v19 = vand.u32 4294901760, %v102_v39  ;;  %7842 = vst [vmem:[#allocation30_spill] sm:$0xff] %v5354_v1  ;;  %v7849_v47 = vand.u32 4294901760, %v5314_v62  ;;  %v5395_v21 = vsub.f32 %v94_v8, %v5354_v1  ;;  %v5404_v7 = vsub.f32 %v95_v56, %v5352_v13 }
 0x114   :  { %1822 = vmatprep.subr.mxu1 %v4537_v43  ;;  %1903 = vmatprep.subr.mxu0 %v5260_v28  ;;  %v5333_v43 = vsub.f32 %v106_v6, %v5304_v53  ;;  %v5365_v6 = vand.u32 4294901760, %v91_v23  ;;  %v5376_v10 = vsub.f32 %v5302_v57, %v7846_v42  ;;  %7848 = vst [vmem:[#allocation34_spill] sm:$0xff] %v5385_v26  ;;  %v2175_v56 = vand.u32 4294901760, %v2174_v9  ;;  %v83_v9 = vld [vmem:[#allocation5 + $0xd8] sm:$0xff] }
 0x115   :  { %1824 = vmatpush2.msra.mxu1 %v4548_v37  ;;  %7837 = vst [vmem:[#allocation105_spill] sm:$0xff] %v5325_v19  ;;  %1905 = vmatpush1.msra.mxu0 %v5262_v36  ;;  %v7843_v37 = vld [vmem:[#allocation119_spill] sm:$0xff]  ;;  %v5390_v42 = vsub.f32 %v5314_v62, %v7849_v47  ;;  %7851 = vst [vmem:[#allocation14_spill] sm:$0xff] %v5395_v21  ;;  %v7854_v47 = vand.u32 4294901760, %v5328_v16  ;;  %v5458_v31 = vand.u32 4294901760, %v83_v9 }
 0x116   :  { %1826 = vmatprep.subr.mxu1 %v7663_v48  ;;  %1907 = vmatprep.subr.mxu0 %v5273_v63  ;;  %v2168_v48 = vsub.f32 %v5281_v15, %v7158_v58  ;;  %v5363_v58 = vsub.f32 %v102_v39, %v5325_v19  ;;  %7845 = vst [vmem:[#allocation32_spill] sm:$0xff] %v5365_v6  ;;  %v7850_v39 = vld [vmem:[#allocation121_spill] sm:$0xff]  ;;  %7853 = vst [vmem:[#allocation36_spill] sm:$0xff] %v5404_v7  ;;  %v7857_v60 = vand.u32 4294901760, %v5333_v43  ;;  %v167_v63 = vld [vmem:[#allocation5 + $0x378] sm:$0xff] }
 0x117   :  { %1653 = vmatprep.mubr.f32.mxu0 %v7839_v20  ;;  %1828 = vmatpush2.msra.mxu1 %v7664_v32  ;;  %v5411_v8 = vsub.f32 %v5328_v16, %v7854_v47  ;;  %v5417_v44 = vsub.f32 %v91_v23, %v5365_v6  ;;  %v2187_v23 = vand.u32 4294901760, %v5390_v42  ;;  %v7861_v47 = vand.u32 4294901760, %v5358_v33  ;;  %v7864_v42 = vld [vmem:[#allocation128_spill] sm:$0xff]  ;;  %7865 = vst [vmem:[#allocation42_spill] sm:$0xff] %v5458_v31 }
 0x118   :  { %1909 = vmatpush1.msra.mxu0 %v5275_v3  ;;  %1830 = vmatprep.subr.mxu1 %v7666_v18  ;;  %7844 = vst [vmem:[#allocation12_spill] sm:$0xff] %v5363_v58  ;;  %v90_v18 = vld [vmem:[#allocation5 + $0x110] sm:$0xff]  ;;  %v2169_v32 = vand.u32 4294901760, %v2168_v48  ;;  %v5425_v5 = vsub.f32 %v5333_v43, %v7857_v60 }
 0x119   :  { %1655 = vmatmul.mubr.f32.gmra.mxu0 %v7843_v37  ;;  %1911 = vmatprep.subr.mxu0 %v5283_v30  ;;  %v86_v48 = vld [vmem:[#allocation5 + $0xf0] sm:$0xff]  ;;  %v5413_v29 = vand.u32 4294901760, %v90_v18  ;;  %7856 = vst [vmem:[#allocation38_spill] sm:$0xff] %v5417_v44  ;;  %v5441_v17 = vsub.f32 %v5358_v33, %v7861_v47  ;;  %v71_v30 = vld [vmem:[#allocation5 + $0x78] sm:$0xff] }
 0x11a   :  { %1832 = vmatpush2.msra.mxu1 %v4603_v14  ;;  %1913 = vmatpush1.msra.mxu0 %v5291_v55  ;;  %v2163_v14 = vand.u32 4294901760, %v2162_v46  ;;  %v87_v46 = vld [vmem:[#allocation5 + $0xf8] sm:$0xff]  ;;  %v5433_v49 = vand.u32 4294901760, %v86_v48  ;;  %v78_v47 = vld [vmem:[#allocation5 + $0xb0] sm:$0xff] }
 0x11b   :  { %1834 = vmatprep.subr.mxu1 %v4616_v2  ;;  %1915 = vmatprep.subr.mxu0 %v5296_v51  ;;  %v5400_v2 = vsub.f32 %v5319_v45, %v7852_v54  ;;  %7855 = vst [vmem:[#allocation15_spill] sm:$0xff] %v5413_v29  ;;  %v5431_v54 = vand.u32 4294901760, %v87_v46 }
 0x11c   :  { %1661 = vmatprep.mubr.f32.mxu0 %v7850_v39  ;;  %1836 = vmatpush2.msra.mxu1 %v4632_v38  ;;  %v2181_v38 = vand.u32 4294901760, %v5376_v10  ;;  %7860 = vst [vmem:[#allocation40_spill] sm:$0xff] %v5433_v49  ;;  %v2199_v10 = vand.u32 4294901760, %v5411_v8  ;;  %v7866_v8 = vand.u32 4294901760, %v5380_v22 }
 0x11d   :  { %1838 = vmatprep.mubr.f32.mxu1 %v7834_v50  ;;  %1917 = vmatpush1.msra.mxu0 %v5304_v53  ;;  %7859 = vst [vmem:[#allocation16_spill] sm:$0xff] %v5431_v54  ;;  %v2193_v60 = vand.u32 4294901760, %v5400_v2  ;;  %v7863_v2 = vand.u32 4294901760, %v5363_v58  ;;  %v5489_v53 = vand.u32 4294901760, %v78_v47 }
 0x11e   :  { %1840 = vmatmul.mubr.f32.vlgmr.msra.gmra.mxu1 %v7835_v25  ;;  %1663 = vmatmul.mubr.f32.gmra.mxu0 %v7858_v4 }
 0x11f   :  { %1919 = vmatprep.subr.mxu0 %v5321_v0  ;;  %2164 = vmatprep.subr.mxu1 %v2163_v14  ;;  %v5448_v14 = vsub.f32 %v90_v18, %v5413_v29  ;;  %v5453_v34 = vsub.f32 %v5363_v58, %v7863_v2  ;;  %v5463_v18 = vsub.f32 %v5380_v22, %v7866_v8  ;;  %v7869_v2 = vand.u32 4294901760, %v5385_v26  ;;  %v7872_v0 = vld [vmem:[#allocation130_spill] sm:$0xff] }
 0x120   :  { %1921 = vmatpush1.msra.mxu0 %v5325_v19  ;;  %2170 = vmatpush1.msra.mxu1 %v2169_v32  ;;  %v2205_v32 = vand.u32 4294901760, %v5425_v5  ;;  %v74_v19 = vld [vmem:[#allocation5 + $0x90] sm:$0xff]  ;;  %v5480_v8 = vsub.f32 %v87_v46, %v5431_v54  ;;  %7874 = vst [vmem:[#allocation20_spill] sm:$0xff] %v5489_v53 }
 0x121   :  { %1923 = vmatprep.subr.mxu0 %v5335_v11  ;;  %7862 = vst [vmem:[#allocation17_spill] sm:$0xff] %v5448_v14  ;;  %2176 = vmatprep.subr.mxu1 %v2175_v56  ;;  %v75_v11 = vld [vmem:[#allocation5 + $0x98] sm:$0xff]  ;;  %v5470_v56 = vsub.f32 %v86_v48, %v5433_v49  ;;  %v5475_v5 = vsub.f32 %v5385_v26, %v7869_v2  ;;  %v7875_v2 = vand.u32 4294901760, %v5395_v21  ;;  %v2217_v46 = vand.u32 4294901760, %v5453_v34  ;;  %v70_v34 = vld [vmem:[#allocation5 + $0x70] sm:$0xff] }
 0x122   :  { %1669 = vmatprep.mubr.f32.mxu0 %v7864_v42  ;;  %1846 = vmatprep.mubr.f32.mxu1 %v7839_v20  ;;  %7871 = vst [vmem:[#allocation46_spill] sm:$0xff] %v5480_v8  ;;  %v2211_v20 = vand.u32 4294901760, %v5441_v17  ;;  %v7877_v17 = vand.u32 4294901760, %v5417_v44 }
 0x123   :  { %1925 = vmatpush1.msra.mxu0 %v5347_v27  ;;  %7868 = vst [vmem:[#allocation44_spill] sm:$0xff] %v5470_v56  ;;  %2182 = vmatpush1.msra.mxu1 %v2181_v38  ;;  %v7873_v27 = vand.u32 4294901760, %v5404_v7  ;;  %v5494_v51 = vsub.f32 %v5395_v21, %v7875_v2  ;;  %v5499_v38 = vand.u32 4294901760, %v75_v11  ;;  %v2223_v2 = vand.u32 4294901760, %v5463_v18 }
 0x124   :  { %1671 = vmatmul.mubr.f32.gmra.mxu0 %v7872_v0  ;;  %1848 = vmatmul.mubr.f32.gmra.mxu1 %v7843_v37  ;;  %v5510_v37 = vsub.f32 %v82_v59, %v5465_v52  ;;  %v5515_v21 = vsub.f32 %v83_v9, %v5458_v31  ;;  %v5522_v18 = vsub.f32 %v79_v35, %v5477_v41  ;;  %v7882_v59 = vld [vmem:[#allocation135_spill] sm:$0xff]  ;;  %v7892_v3 = vand.u32 4294901760, %v5470_v56 }
 0x125   :  { %v5487_v48 = vsub.f32 %v5404_v7, %v7873_v27  ;;  %1927 = vmatprep.subr.mxu0 %v5352_v13  ;;  %7876 = vst [vmem:[#allocation48_spill] sm:$0xff] %v5499_v38  ;;  %v5504_v27 = vsub.f32 %v5417_v44, %v7877_v17  ;;  %2188 = vmatprep.subr.mxu1 %v2187_v23  ;;  %v5512_v13 = vand.u32 4294901760, %v74_v19  ;;  %v2229_v17 = vand.u32 4294901760, %v5475_v5  ;;  %v66_v5 = vld [vmem:[#allocation5 + $0x50] sm:$0xff]  ;;  %v7888_v7 = vld [vmem:[#allocation138_spill] sm:$0xff] }
 0x126   :  { %1929 = vmatpush1.msra.mxu0 %v5354_v1  ;;  %7878 = vst [vmem:[#allocation21_spill] sm:$0xff] %v5510_v37  ;;  %7880 = vst [vmem:[#allocation22_spill] sm:$0xff] %v5515_v21  ;;  %2194 = vmatpush1.msra.mxu1 %v2193_v60  ;;  %v67_v1 = vld [vmem:[#allocation5 + $0x58] sm:$0xff]  ;;  %v5527_v9 = vsub.f32 %v78_v47, %v5489_v53  ;;  %v5540_v44 = vand.u32 4294901760, %v70_v34  ;;  %v62_v23 = vld [vmem:[#allocation5 + $0x30] sm:$0xff]  ;;  %v5543_v60 = vsub.f32 %v75_v11, %v5499_v38 }
 0x127   :  { %7879 = vst [vmem:[#allocation50_spill] sm:$0xff] %v5512_v13  ;;  %1931 = vmatprep.subr.mxu0 %v5365_v6  ;;  %7881 = vst [vmem:[#allocation52_spill] sm:$0xff] %v5522_v18  ;;  %2200 = vmatprep.subr.mxu1 %v2199_v10  ;;  %v5530_v6 = vand.u32 4294901760, %v71_v30  ;;  %v7885_v10 = vand.u32 4294901760, %v5448_v14  ;;  %v63_v47 = vld [vmem:[#allocation5 + $0x38] sm:$0xff]  ;;  %v7891_v11 = vand.u32 4294901760, %v5480_v8 }
 0x128   :  { %1677 = vmatprep.mubr.f32.mxu0 %v7882_v59  ;;  %7883 = vst [vmem:[#allocation23_spill] sm:$0xff] %v5527_v9  ;;  %1854 = vmatprep.mubr.f32.mxu1 %v7850_v39  ;;  %7886 = vst [vmem:[#allocation24_spill] sm:$0xff] %v5540_v44  ;;  %v5547_v39 = vsub.f32 %v74_v19, %v5512_v13  ;;  %v5563_v19 = vsub.f32 %v5470_v56, %v7892_v3  ;;  %v5565_v26 = vand.u32 4294901760, %v66_v5 }
 0x129   :  { %7884 = vst [vmem:[#allocation54_spill] sm:$0xff] %v5530_v6  ;;  %1933 = vmatpush1.msra.mxu0 %v5413_v29  ;;  %v5538_v55 = vsub.f32 %v5448_v14, %v7885_v10  ;;  %7887 = vst [vmem:[#allocation56_spill] sm:$0xff] %v5543_v60  ;;  %2206 = vmatpush1.msra.mxu1 %v2205_v32  ;;  %v5549_v29 = vand.u32 4294901760, %v67_v1  ;;  %v59_v14 = vld [vmem:[#allocation5 + $0x18] sm:$0xff]  ;;  %v5558_v32 = vsub.f32 %v5480_v8, %v7891_v11 }
 0x12a   :  { %1679 = vmatmul.mubr.f32.gmra.mxu0 %v7888_v7  ;;  %7889 = vst [vmem:[#allocation25_spill] sm:$0xff] %v5547_v39  ;;  %1856 = vmatmul.mubr.f32.gmra.mxu1 %v7858_v4  ;;  %7893 = vst [vmem:[#allocation26_spill] sm:$0xff] %v5565_v26  ;;  %v5569_v10 = vand.u32 4294901760, %v63_v47  ;;  %v5571_v4 = vand.u32 4294901760, %v62_v23  ;;  %v5575_v11 = vsub.f32 %v71_v30, %v5530_v6  ;;  %v171_v8 = vld [vmem:[#allocation5 + $0x398] sm:$0xff] }
 0x12b   :  { %7890 = vst [vmem:[#allocation58_spill] sm:$0xff] %v5549_v29  ;;  %1935 = vmatprep.subr.mxu0 %v5431_v54  ;;  %2212 = vmatprep.subr.mxu1 %v2211_v20  ;;  %v2253_v3 = vand.u32 4294901760, %v5538_v55  ;;  %v5580_v56 = vsub.f32 %v70_v34, %v5540_v44  ;;  %v5582_v20 = vand.u32 4294901760, %v59_v14  ;;  %v7899_v54 = vand.u32 4294901760, %v5515_v21  ;;  %v58_v55 = vld [vmem:[#allocation5 + $0x10] sm:$0xff]  ;;  %v7904_v34 = vld [vmem:[#allocation146_spill] sm:$0xff] }
 0x12c   :  { %1937 = vmatpush1.msra.mxu0 %v5433_v49  ;;  %7894 = vst [vmem:[#allocation60_spill] sm:$0xff] %v5569_v10  ;;  %7895 = vst [vmem:[#allocation27_spill] sm:$0xff] %v5571_v4  ;;  %2218 = vmatpush1.msra.mxu1 %v2217_v46  ;;  %v7900_v46 = vand.u32 4294901760, %v5510_v37  ;;  %v5598_v49 = vsub.f32 %v67_v1, %v5549_v29  ;;  %v5605_v35 = vsub.f32 %v66_v5, %v5565_v26 }
 0x12d   :  { %7896 = vst [vmem:[#allocation62_spill] sm:$0xff] %v5575_v11  ;;  %1939 = vmatprep.subr.mxu0 %v5458_v31  ;;  %7897 = vst [vmem:[#allocation29_spill] sm:$0xff] %v5580_v56  ;;  %2224 = vmatprep.subr.mxu1 %v2223_v2  ;;  %v5589_v30 = vsub.f32 %v5515_v21, %v7899_v54  ;;  %v2259_v2 = vand.u32 4294901760, %v5558_v32  ;;  %v5614_v1 = vsub.f32 %v62_v23, %v5571_v4  ;;  %v183_v54 = vld [vmem:[#allocation5 + $0x3f8] sm:$0xff] }
 0x12e   :  { %7898 = vst [vmem:[#allocation64_spill] sm:$0xff] %v5582_v20  ;;  %1685 = vmatprep.mubr.f32.mxu0 %v4887_v12  ;;  %v5594_v31 = vsub.f32 %v5510_v37, %v7900_v46  ;;  %7901 = vst [vmem:[#allocation31_spill] sm:$0xff] %v5598_v49  ;;  %1862 = vmatprep.mubr.f32.mxu1 %v7864_v42  ;;  %v7903_v46 = vand.u32 4294901760, %v5522_v18  ;;  %v7906_v42 = vand.u32 4294901760, %v5527_v9  ;;  %v7911_v5 = vand.u32 4294901760, %v5487_v48 }
 0x12f   :  { %1941 = vmatpush1.msra.mxu0 %v5465_v52  ;;  %7902 = vst [vmem:[#allocation66_spill] sm:$0xff] %v5605_v35  ;;  %2230 = vmatpush1.msra.mxu1 %v2229_v17  ;;  %7905 = vst [vmem:[#allocation33_spill] sm:$0xff] %v5614_v1  ;;  %v182_v52 = vld [vmem:[#allocation5 + $0x3f0] sm:$0xff]  ;;  %v5623_v21 = vsub.f32 %v63_v47, %v5569_v10  ;;  %v7908_v17 = vand.u32 4294901760, %v5543_v60  ;;  %v2271_v47 = vand.u32 4294901760, %v5589_v30  ;;  %v5653_v48 = vand.u32 4294901760, %v183_v54 }
 0x130   :  { %v5610_v37 = vsub.f32 %v5522_v18, %v7903_v46  ;;  %1687 = vmatmul.mubr.f32.gmra.mxu0 %v7904_v34  ;;  %v5619_v32 = vsub.f32 %v5527_v9, %v7906_v42  ;;  %1864 = vmatmul.mubr.f32.gmra.mxu1 %v7872_v0  ;;  %v5632_v46 = vand.u32 4294901760, %v58_v55  ;;  %v5636_v9 = vsub.f32 %v59_v14, %v5582_v20  ;;  %v179_v30 = vld [vmem:[#allocation5 + $0x3d8] sm:$0xff]  ;;  %v178_v0 = vld [vmem:[#allocation5 + $0x3d0] sm:$0xff] }
 0x131   :  { %7907 = vst [vmem:[#allocation68_spill] sm:$0xff] %v5623_v21  ;;  %1943 = vmatprep.subr.mxu0 %v5477_v41  ;;  %v5630_v23 = vsub.f32 %v5543_v60, %v7908_v17  ;;  %2236 = vmatprep.subr.mxu1 %v7911_v5  ;;  %v7912_v41 = vand.u32 4294901760, %v5547_v39  ;;  %v7913_v42 = vand.u32 4294901760, %v5494_v51  ;;  %7914 = vst [vmem:[#allocation37_spill] sm:$0xff] %v5653_v48  ;;  %v5655_v5 = vand.u32 4294901760, %v182_v52  ;;  %v175_v14 = vld [vmem:[#allocation5 + $0x3b8] sm:$0xff] }
 0x132   :  { %7909 = vst [vmem:[#allocation35_spill] sm:$0xff] %v5632_v46  ;;  %7910 = vst [vmem:[#allocation70_spill] sm:$0xff] %v5636_v9  ;;  %1945 = vmatpush1.msra.mxu0 %v5489_v53  ;;  %1870 = vmatprep.mubr.f32.mxu1 %v7882_v59  ;;  %v7920_v51 = vand.u32 4294901760, %v5580_v56  ;;  %v5683_v59 = vand.u32 4294901760, %v179_v30  ;;  %v7945_v22 = vand.u32 4294901760, %v5610_v37  ;;  %v7947_v36 = vand.u32 4294901760, %v5619_v32 }
 0x133   :  { %v5646_v17 = vsub.f32 %v5547_v39, %v7912_v41  ;;  %2242 = vmatpush1.msra.mxu1 %v7913_v42  ;;  %1947 = vmatprep.subr.mxu0 %v5499_v38  ;;  %7915 = vst [vmem:[#allocation72_spill] sm:$0xff] %v5655_v5  ;;  %v7916_v41 = vand.u32 4294901760, %v5504_v27  ;;  %v7917_v39 = vld [vmem:[#allocation152_spill] sm:$0xff]  ;;  %v7918_v42 = vand.u32 4294901760, %v5575_v11  ;;  %v7921_v38 = vld [vmem:[#allocation154_spill] sm:$0xff]  ;;  %v7923_v27 = vand.u32 4294901760, %v5598_v49 }
 0x134   :  { %1693 = vmatprep.mubr.f32.mxu0 %v7917_v39  ;;  %1949 = vmatpush1.msra.mxu0 %v5512_v13  ;;  %v5678_v53 = vsub.f32 %v5580_v56, %v7920_v51  ;;  %7922 = vst [vmem:[#allocation74_spill] sm:$0xff] %v5683_v59  ;;  %v5690_v13 = vand.u32 4294901760, %v178_v0  ;;  %v7926_v51 = vand.u32 4294901760, %v5605_v35  ;;  %v170_v56 = vld [vmem:[#allocation5 + $0x390] sm:$0xff] }
 0x135   :  { %2248 = vmatprep.subr.mxu1 %v7916_v41  ;;  %v5665_v60 = vsub.f32 %v5575_v11, %v7918_v42  ;;  %v5673_v41 = vsub.f32 %v58_v55, %v5632_v46  ;;  %v174_v42 = vld [vmem:[#allocation5 + $0x3b0] sm:$0xff]  ;;  %1695 = vmatmul.mubr.f32.gmra.mxu0 %v7921_v38  ;;  %v5688_v55 = vsub.f32 %v5598_v49, %v7923_v27  ;;  %v5702_v11 = vand.u32 4294901760, %v175_v14 }
 0x136   :  { %2254 = vmatpush1.msra.mxu1 %v2253_v3  ;;  %7924 = vst [vmem:[#allocation41_spill] sm:$0xff] %v5690_v13  ;;  %1951 = vmatprep.subr.mxu0 %v5530_v6  ;;  %v5695_v3 = vsub.f32 %v182_v52, %v5655_v5  ;;  %v5700_v18 = vsub.f32 %v5605_v35, %v7926_v51  ;;  %v7929_v6 = vand.u32 4294901760, %v5623_v21  ;;  %v5714_v49 = vand.u32 4294901760, %v174_v42 }
 0x137   :  { %7919 = vst [vmem:[#allocation39_spill] sm:$0xff] %v5673_v41  ;;  %1872 = vmatmul.mubr.f32.gmra.mxu1 %v7888_v7  ;;  %7927 = vst [vmem:[#allocation43_spill] sm:$0xff] %v5702_v11  ;;  %v5705_v27 = vsub.f32 %v183_v54, %v5653_v48  ;;  %2260 = vmatprep.subr.mxu1 %v2259_v2  ;;  %v7931_v51 = vand.u32 4294901760, %v5614_v1  ;;  %v7932_v54 = vand.u32 4294901760, %v5563_v19  ;;  %v5725_v7 = vand.u32 4294901760, %v171_v8  ;;  %v166_v2 = vld [vmem:[#allocation5 + $0x370] sm:$0xff] }
 0x138   :  { %7925 = vst [vmem:[#allocation76_spill] sm:$0xff] %v5695_v3  ;;  %1953 = vmatpush1.msra.mxu0 %v5540_v44  ;;  %v5712_v52 = vsub.f32 %v5623_v21, %v7929_v6  ;;  %7930 = vst [vmem:[#allocation45_spill] sm:$0xff] %v5714_v49  ;;  %v7934_v44 = vand.u32 4294901760, %v5636_v9  ;;  %1878 = vmatprep.mubr.f32.mxu1 %v4887_v12  ;;  %v5749_v19 = vsub.f32 %v175_v14, %v5702_v11 }
 0x139   :  { %7928 = vst [vmem:[#allocation78_spill] sm:$0xff] %v5705_v27  ;;  %v5719_v35 = vsub.f32 %v5614_v1, %v7931_v51  ;;  %2266 = vmatpush1.msra.mxu1 %v7932_v54  ;;  %1955 = vmatprep.subr.mxu0 %v5549_v29  ;;  %7933 = vst [vmem:[#allocation80_spill] sm:$0xff] %v5725_v7  ;;  %v7935_v51 = vld [vmem:[#allocation160_spill] sm:$0xff]  ;;  %v5736_v54 = vsub.f32 %v178_v0, %v5690_v13  ;;  %v5738_v29 = vand.u32 4294901760, %v170_v56  ;;  %v324_v0 = vpop.f32.mrf.mxu0 }
 0x13a   :  { %v5730_v6 = vsub.f32 %v5636_v9, %v7934_v44  ;;  %2272 = vmatprep.subr.mxu1 %v2271_v47  ;;  %1701 = vmatprep.mubr.f32.mxu0 %v7935_v51  ;;  %v5741_v1 = vsub.f32 %v179_v30, %v5683_v59  ;;  %7938 = vst [vmem:[#allocation49_spill] sm:$0xff] %v5749_v19  ;;  %v7939_v9 = vand.u32 4294901760, %v5594_v31  ;;  %v163_v47 = vld [vmem:[#allocation5 + $0x358] sm:$0xff]  ;;  %v7942_v31 = vand.u32 4294901760, %v5673_v41 }
 0x13b   :  { %7936 = vst [vmem:[#allocation47_spill] sm:$0xff] %v5736_v54  ;;  %7937 = vst [vmem:[#allocation82_spill] sm:$0xff] %v5738_v29  ;;  %1957 = vmatpush1.msra.mxu0 %v5565_v26  ;;  %v5756_v12 = vsub.f32 %v174_v42, %v5714_v49  ;;  %v5759_v26 = vand.u32 4294901760, %v167_v63  ;;  %1880 = vmatmul.mubr.f32.gmra.mxu1 %v7904_v34  ;;  %v5769_v30 = vand.u32 4294901760, %v166_v2  ;;  %v162_v42 = vld [vmem:[#allocation5 + $0x350] sm:$0xff]  ;;  %v7948_v37 = vand.u32 4294901760, %v5705_v27 }
 0x13c   :  { %2278 = vmatpush1.msra.mxu1 %v7939_v9  ;;  %1703 = vmatmul.mubr.f32.gmra.mxu0 %v4970_v24  ;;  %v5767_v9 = vsub.f32 %v5673_v41, %v7942_v31  ;;  %v5772_v21 = vsub.f32 %v171_v8, %v5725_v7  ;;  %v829_v44 = vpop.f32.mrf.mxu1  ;;  %v5778_v34 = vsub.f32 %v170_v56, %v5738_v29  ;;  %v7949_v56 = vand.u32 4294901760, %v5695_v3  ;;  %v326_v31 = vpop.f32.mrf.mxu0 }
 0x13d   :  { %7940 = vst [vmem:[#allocation84_spill] sm:$0xff] %v5756_v12  ;;  %7941 = vst [vmem:[#allocation51_spill] sm:$0xff] %v5759_v26  ;;  %1959 = vmatprep.subr.mxu0 %v5569_v10  ;;  %2284 = vmatprep.subr.mxu1 %v7945_v22  ;;  %v159_v10 = vld [vmem:[#allocation5 + $0x338] sm:$0xff]  ;;  %v5782_v41 = vadd.f32 %v829_v44, %v324_v0  ;;  %v5790_v22 = vsub.f32 %v5705_v27, %v7948_v37  ;;  %v5797_v14 = vand.u32 4294901760, %v163_v47  ;;  %v158_v0 = vld [vmem:[#allocation5 + $0x330] sm:$0xff] }
 0x13e   :  { %7943 = vst [vmem:[#allocation86_spill] sm:$0xff] %v5769_v30  ;;  %7944 = vst [vmem:[#allocation53_spill] sm:$0xff] %v5772_v21  ;;  %1961 = vmatpush1.msra.mxu0 %v5571_v4  ;;  %2290 = vmatpush1.msra.mxu1 %v7947_v36  ;;  %v5795_v8 = vsub.f32 %v5695_v3, %v7949_v56  ;;  %v831_v32 = vpop.f32.mrf.mxu1  ;;  %v7951_v36 = vand.u32 4294901760, %v5630_v23  ;;  %v155_v4 = vld [vmem:[#allocation5 + $0x318] sm:$0xff]  ;;  %v5807_v56 = vsub.f32 %v167_v63, %v5759_v26 }
 0x13f   :  { %7946 = vst [vmem:[#allocation88_spill] sm:$0xff] %v5778_v34  ;;  %1963 = vmatprep.subr.mxu0 %v5582_v20  ;;  %7950 = vst [vmem:[#allocation55_spill] sm:$0xff] %v5797_v14  ;;  %1886 = vmatprep.mubr.f32.mxu1 %v7917_v39  ;;  %v5803_v20 = vand.u32 4294901760, %v162_v42  ;;  %v5809_v3 = vadd.f32 %v831_v32, %v326_v31  ;;  %v7954_v44 = vand.u32 4294901760, %v5646_v17  ;;  %v5818_v39 = vand.u32 4294901760, %v159_v10  ;;  %v154_v32 = vld [vmem:[#allocation5 + $0x310] sm:$0xff] }
 0x140   :  { %2296 = vmatprep.subr.mxu1 %v7951_v36  ;;  %7953 = vst [vmem:[#allocation57_spill] sm:$0xff] %v5807_v56  ;;  %1965 = vmatpush1.msra.mxu0 %v5632_v46  ;;  %v5816_v36 = vsub.f32 %v166_v2, %v5769_v30  ;;  %v7957_v63 = vand.u32 4294901760, %v5741_v1  ;;  %v7958_v17 = vand.u32 4294901760, %v5736_v54  ;;  %v5833_v2 = vand.u32 4294901760, %v158_v0 }
 0x141   :  { %7952 = vst [vmem:[#allocation90_spill] sm:$0xff] %v5803_v20  ;;  %2302 = vmatpush1.msra.mxu1 %v7954_v44  ;;  %7956 = vst [vmem:[#allocation59_spill] sm:$0xff] %v5818_v39  ;;  %1967 = vmatprep.subr.mxu0 %v5653_v48  ;;  %v7960_v37 = vand.u32 4294901760, %v5665_v60  ;;  %v5845_v46 = vand.u32 4294901760, %v155_v4  ;;  %v2361_v60 = vand.u32 4294901760, %v5795_v8  ;;  %v151_v8 = vld [vmem:[#allocation5 + $0x2f8] sm:$0xff] }
 0x142   :  { %7955 = vst [vmem:[#allocation92_spill] sm:$0xff] %v5816_v36  ;;  %1888 = vmatmul.mubr.f32.gmra.mxu1 %v7921_v38  ;;  %v5826_v31 = vsub.f32 %v5741_v1, %v7957_v63  ;;  %v5831_v44 = vsub.f32 %v5736_v54, %v7958_v17  ;;  %7959 = vst [vmem:[#allocation94_spill] sm:$0xff] %v5833_v2  ;;  %1969 = vmatpush2.msra.mxu0 %v5655_v5  ;;  %v2355_v38 = vand.u32 4294901760, %v5790_v22  ;;  %v150_v5 = vld [vmem:[#allocation5 + $0x2f0] sm:$0xff] }
 0x143   :  { %2308 = vmatprep.subr.mxu1 %v7960_v37  ;;  %v7961_v63 = vand.u32 4294901760, %v5749_v19  ;;  %7962 = vst [vmem:[#allocation61_spill] sm:$0xff] %v5845_v46  ;;  %v5848_v17 = vsub.f32 %v163_v47, %v5797_v14  ;;  %v7964_v54 = vand.u32 4294901760, %v5678_v53  ;;  %1971 = vmatprep.subr.mxu0 %v5683_v59  ;;  %v5855_v37 = vsub.f32 %v162_v42, %v5803_v20 }
 0x144   :  { %v7966_v22 = vand.u32 4294901760, %v5756_v12  ;;  %v7967_v47 = vand.u32 4294901760, %v5688_v55  ;;  %1894 = vmatprep.mubr.f32.mxu1 %v7935_v51  ;;  %v7968_v53 = vand.u32 4294901760, %v5772_v21  ;;  %v5871_v42 = vand.u32 4294901760, %v154_v32  ;;  %1973 = vmatpush2.msra.mxu0 %v5690_v13  ;;  %v142_v13 = vld [vmem:[#allocation5 + $0x2b0] sm:$0xff] }
 0x145   :  { %v5843_v48 = vsub.f32 %v5749_v19, %v7961_v63  ;;  %7963 = vst [vmem:[#allocation96_spill] sm:$0xff] %v5848_v17  ;;  %2314 = vmatpush1.msra.mxu1 %v7964_v54  ;;  %7965 = vst [vmem:[#allocation63_spill] sm:$0xff] %v5855_v37  ;;  %v7971_v55 = vand.u32 4294901760, %v5700_v18  ;;  %v2373_v23 = vand.u32 4294901760, %v5831_v44  ;;  %v7973_v51 = vand.u32 4294901760, %v5778_v34  ;;  %1975 = vmatprep.subr.mxu0 %v5702_v11  ;;  %v146_v44 = vld [vmem:[#allocation5 + $0x2d0] sm:$0xff] }
 0x146   :  { %v5860_v63 = vsub.f32 %v5756_v12, %v7966_v22  ;;  %2320 = vmatprep.subr.mxu1 %v7967_v47  ;;  %v5869_v54 = vsub.f32 %v5772_v21, %v7968_v53  ;;  %7969 = vst [vmem:[#allocation98_spill] sm:$0xff] %v5871_v42  ;;  %v5875_v22 = vsub.f32 %v159_v10, %v5818_v39  ;;  %v2367_v47 = vand.u32 4294901760, %v5826_v31 }
 0x147   :  { %2326 = vmatpush1.msra.mxu1 %v7971_v55  ;;  %v5883_v53 = vsub.f32 %v158_v0, %v5833_v2  ;;  %v5888_v21 = vsub.f32 %v5778_v34, %v7973_v51  ;;  %v2379_v10 = vand.u32 4294901760, %v5843_v48  ;;  %v5893_v18 = vand.u32 4294901760, %v150_v5  ;;  %v147_v55 = vld [vmem:[#allocation5 + $0x2d8] sm:$0xff]  ;;  %1977 = vmatpush2.msra.mxu0 %v5714_v49 }
 0x148   :  { %7970 = vst [vmem:[#allocation65_spill] sm:$0xff] %v5875_v22  ;;  %1896 = vmatmul.mubr.f32.gmra.mxu1 %v4970_v24  ;;  %v5897_v0 = vsub.f32 %v155_v4, %v5845_v46  ;;  %v7976_v59 = vand.u32 4294901760, %v5712_v52  ;;  %v2385_v51 = vand.u32 4294901760, %v5860_v63  ;;  %v5903_v24 = vand.u32 4294901760, %v151_v8  ;;  %1979 = vmatprep.subr.mxu0 %v5725_v7  ;;  %v138_v7 = vld [vmem:[#allocation5 + $0x290] sm:$0xff] }
 0x149   :  { %7972 = vst [vmem:[#allocation100_spill] sm:$0xff] %v5883_v53  ;;  %7974 = vst [vmem:[#allocation67_spill] sm:$0xff] %v5893_v18  ;;  %v7978_v48 = vand.u32 4294901760, %v5807_v56  ;;  %v7979_v4 = vand.u32 4294901760, %v5719_v35  ;;  %v5916_v52 = vsub.f32 %v154_v32, %v5871_v42  ;;  %v7981_v63 = vand.u32 4294901760, %v5816_v36  ;;  %1981 = vmatpush2.msra.mxu0 %v5738_v29  ;;  %v139_v29 = vld [vmem:[#allocation5 + $0x298] sm:$0xff]  ;;  %2544 = vmatprep.mubr.f32.mxu1 %v7834_v50 }
 0x14a   :  { %7975 = vst [vmem:[#allocation102_spill] sm:$0xff] %v5897_v0  ;;  %2332 = vmatprep.subr.mxu1 %v7976_v59  ;;  %7977 = vst [vmem:[#allocation104_spill] sm:$0xff] %v5903_v24  ;;  %v2391_v59 = vand.u32 4294901760, %v5869_v54  ;;  %v7982_v31 = vand.u32 4294901760, %v5730_v6  ;;  %v2397_v35 = vand.u32 4294901760, %v5888_v21  ;;  %v5930_v54 = vand.u32 4294901760, %v146_v44  ;;  %1983 = vmatprep.subr.mxu0 %v5759_v26 }
 0x14b   :  { %v5908_v11 = vsub.f32 %v5807_v56, %v7978_v48  ;;  %2338 = vmatpush1.msra.mxu1 %v7979_v4  ;;  %7980 = vst [vmem:[#allocation73_spill] sm:$0xff] %v5916_v52  ;;  %v5921_v49 = vsub.f32 %v5816_v36, %v7981_v63  ;;  %v143_v48 = vld [vmem:[#allocation5 + $0x2b8] sm:$0xff]  ;;  %v5928_v4 = vand.u32 4294901760, %v147_v55  ;;  %v7985_v63 = vand.u32 4294901760, %v5767_v9  ;;  %1985 = vmatpush2.msra.mxu0 %v5769_v30  ;;  %v134_v26 = vld [vmem:[#allocation5 + $0x270] sm:$0xff] }
 0x14c   :  { %2344 = vmatprep.subr.mxu1 %v7982_v31  ;;  %7984 = vst [vmem:[#allocation75_spill] sm:$0xff] %v5930_v54  ;;  %v5937_v56 = vsub.f32 %v150_v5, %v5893_v18  ;;  %v7987_v6 = vand.u32 4294901760, %v5848_v17  ;;  %v5944_v21 = vand.u32 4294901760, %v142_v13  ;;  %v5954_v32 = vand.u32 4294901760, %v143_v48  ;;  %1987 = vmatprep.subr.mxu0 %v5797_v14  ;;  %v8037_v50 = vld [vmem:[#allocation17_spill] sm:$0xff] }
 0x14d   :  { %7983 = vst [vmem:[#allocation106_spill] sm:$0xff] %v5928_v4  ;;  %2350 = vmatpush1.msra.mxu1 %v7985_v63  ;;  %v2403_v9 = vand.u32 4294901760, %v5908_v11  ;;  %v7988_v63 = vand.u32 4294901760, %v5855_v37  ;;  %v7991_v36 = vand.u32 4294901760, %v5875_v22  ;;  %v5966_v30 = vand.u32 4294901760, %v138_v7  ;;  %1989 = vmatpush2.msra.mxu0 %v5803_v20 }
 0x14e   :  { %7986 = vst [vmem:[#allocation109_spill] sm:$0xff] %v5937_v56  ;;  %v5942_v31 = vsub.f32 %v5848_v17, %v7987_v6  ;;  %2356 = vmatprep.subr.mxu1 %v2355_v38  ;;  %7989 = vst [vmem:[#allocation81_spill] sm:$0xff] %v5954_v32  ;;  %v5957_v6 = vsub.f32 %v151_v8, %v5903_v24  ;;  %v2409_v38 = vand.u32 4294901760, %v5921_v49  ;;  %v5978_v14 = vand.u32 4294901760, %v139_v29 }
 0x14f   :  { %v5952_v5 = vsub.f32 %v5855_v37, %v7988_v63  ;;  %2362 = vmatpush2.msra.mxu1 %v2361_v60  ;;  %v5964_v11 = vsub.f32 %v5875_v22, %v7991_v36  ;;  %7992 = vst [vmem:[#allocation168_spill] sm:$0xff] %v5966_v30  ;;  %v135_v37 = vld [vmem:[#allocation5 + $0x278] sm:$0xff]  ;;  %v5971_v8 = vsub.f32 %v146_v44, %v5930_v54  ;;  %v7994_v60 = vand.u32 4294901760, %v5883_v53 }
 0x150   :  { %7990 = vst [vmem:[#allocation83_spill] sm:$0xff] %v5957_v6  ;;  %2368 = vmatprep.subr.mxu1 %v2367_v47  ;;  %v5981_v36 = vsub.f32 %v147_v55, %v5928_v4  ;;  %1991 = vmatprep.subr.mxu0 %v5818_v39  ;;  %v2415_v47 = vand.u32 4294901760, %v5942_v31  ;;  %v5986_v63 = vsub.f32 %v142_v13, %v5944_v21  ;;  %v7996_v44 = vand.u32 4294901760, %v5897_v0  ;;  %v130_v39 = vld [vmem:[#allocation5 + $0x250] sm:$0xff]  ;;  %v127_v22 = vld [vmem:[#allocation5 + $0x238] sm:$0xff] }
 0x151   :  { %7993 = vst [vmem:[#allocation169_spill] sm:$0xff] %v5971_v8  ;;  %v5976_v49 = vsub.f32 %v5883_v53, %v7994_v60  ;;  %2374 = vmatpush2.msra.mxu1 %v2373_v23  ;;  %v5993_v60 = vand.u32 4294901760, %v134_v26  ;;  %v131_v53 = vld [vmem:[#allocation5 + $0x258] sm:$0xff]  ;;  %1993 = vmatpush2.msra.mxu0 %v5833_v2  ;;  %v2421_v23 = vand.u32 4294901760, %v5952_v5  ;;  %v5997_v55 = vand.u32 4294901760, %v135_v37 }
 0x152   :  { %7995 = vst [vmem:[#allocation170_spill] sm:$0xff] %v5986_v63  ;;  %v5991_v20 = vsub.f32 %v5897_v0, %v7996_v44  ;;  %2380 = vmatprep.subr.mxu1 %v2379_v10  ;;  %v6001_v13 = vsub.f32 %v143_v48, %v5954_v32  ;;  %1995 = vmatprep.subr.mxu0 %v5845_v46  ;;  %v2427_v44 = vand.u32 4294901760, %v5964_v11  ;;  %v7999_v10 = vand.u32 4294901760, %v5916_v52  ;;  %v126_v11 = vld [vmem:[#allocation5 + $0x230] sm:$0xff] }
 0x153   :  { %7997 = vst [vmem:[#allocation171_spill] sm:$0xff] %v5997_v55  ;;  %2386 = vmatpush2.msra.mxu1 %v2385_v51  ;;  %v6006_v0 = vsub.f32 %v138_v7, %v5966_v30  ;;  %1997 = vmatpush2.msra.mxu0 %v5871_v42  ;;  %v2433_v48 = vand.u32 4294901760, %v5976_v49  ;;  %v6014_v51 = vand.u32 4294901760, %v131_v53  ;;  %v6018_v7 = vsub.f32 %v139_v29, %v5978_v14  ;;  %v123_v42 = vld [vmem:[#allocation5 + $0x218] sm:$0xff] }
 0x154   :  { %v2444_v5 = vsub.f32 %v5916_v52, %v7999_v10  ;;  %2392 = vmatprep.subr.mxu1 %v2391_v59  ;;  %1999 = vmatprep.subr.mxu0 %v5903_v24  ;;  %v2439_v10 = vand.u32 4294901760, %v5991_v20  ;;  %v6023_v2 = vsub.f32 %v134_v26, %v5993_v60  ;;  %v6025_v59 = vand.u32 4294901760, %v130_v39  ;;  %v122_v20 = vld [vmem:[#allocation5 + $0x210] sm:$0xff] }
 0x155   :  { %7998 = vst [vmem:[#allocation172_spill] sm:$0xff] %v6006_v0  ;;  %2398 = vmatpush2.msra.mxu1 %v2397_v35  ;;  %2001 = vmatpush2.msra.mxu0 %v5893_v18  ;;  %v8002_v31 = vand.u32 4294901760, %v5957_v6  ;;  %v6032_v35 = vand.u32 4294901760, %v127_v22  ;;  %v6036_v26 = vsub.f32 %v135_v37, %v5997_v55  ;;  %v6042_v46 = vand.u32 4294901760, %v126_v11 }
 0x156   :  { %8000 = vst [vmem:[#allocation173_spill] sm:$0xff] %v6023_v2  ;;  %8001 = vst [vmem:[#allocation174_spill] sm:$0xff] %v6025_v59  ;;  %2404 = vmatprep.subr.mxu1 %v2403_v9  ;;  %2003 = vmatprep.subr.mxu0 %v5928_v4  ;;  %v2445_v49 = vand.u32 4294901760, %v2444_v5  ;;  %v8004_v9 = vand.u32 4294901760, %v5937_v56  ;;  %v8006_v24 = vand.u32 4294901760, %v5981_v36  ;;  %v6053_v5 = vsub.f32 %v131_v53, %v6014_v51 }
 0x157   :  { %v2450_v29 = vsub.f32 %v5957_v6, %v8002_v31  ;;  %8003 = vst [vmem:[#allocation175_spill] sm:$0xff] %v6032_v35  ;;  %2410 = vmatpush2.msra.mxu1 %v2409_v38  ;;  %8005 = vst [vmem:[#allocation176_spill] sm:$0xff] %v6042_v46  ;;  %2005 = vmatpush2.msra.mxu0 %v5930_v54  ;;  %v6049_v6 = vand.u32 4294901760, %v123_v42  ;;  %v6062_v54 = vand.u32 4294901760, %v122_v20  ;;  %v8011_v53 = vand.u32 4294901760, %v6001_v13 }
 0x158   :  { %v2456_v18 = vsub.f32 %v5937_v56, %v8004_v9  ;;  %2416 = vmatprep.subr.mxu1 %v2415_v47  ;;  %v2462_v37 = vsub.f32 %v5981_v36, %v8006_v24  ;;  %2007 = vmatprep.subr.mxu0 %v5954_v32  ;;  %v6057_v9 = vsub.f32 %v130_v39, %v6025_v59  ;;  %v8009_v47 = vand.u32 4294901760, %v5971_v8 }
 0x159   :  { %8007 = vst [vmem:[#allocation177_spill] sm:$0xff] %v6049_v6  ;;  %2422 = vmatpush2.msra.mxu1 %v2421_v23  ;;  %8010 = vst [vmem:[#allocation179_spill] sm:$0xff] %v6062_v54  ;;  %2009 = vmatpush2.msra.mxu0 %v5944_v21  ;;  %v2451_v38 = vand.u32 4294901760, %v2450_v29  ;;  %v2474_v23 = vsub.f32 %v6001_v13, %v8011_v53  ;;  %v6071_v39 = vsub.f32 %v127_v22, %v6032_v35 }
 0x15a   :  { %8008 = vst [vmem:[#allocation178_spill] sm:$0xff] %v6057_v9  ;;  %v2468_v31 = vsub.f32 %v5971_v8, %v8009_v47  ;;  %2428 = vmatprep.subr.mxu1 %v2427_v44  ;;  %2011 = vmatprep.subr.mxu0 %v5978_v14  ;;  %v2457_v47 = vand.u32 4294901760, %v2456_v18  ;;  %v6075_v4 = vsub.f32 %v126_v11, %v6042_v46  ;;  %v8012_v44 = vand.u32 4294901760, %v5986_v63  ;;  %v340_v11 = vpop.f32.mrf.mxu0 }
 0x15b   :  { %2434 = vmatpush2.msra.mxu1 %v2433_v48  ;;  %2013 = vmatpush2.msra.mxu0 %v5966_v30  ;;  %v2463_v53 = vand.u32 4294901760, %v2462_v37  ;;  %v8013_v22 = vand.u32 4294901760, %v6018_v7  ;;  %v6087_v18 = vsub.f32 %v123_v42, %v6049_v6  ;;  %v6091_v24 = vsub.f32 %v122_v20, %v6062_v54 }
 0x15c   :  { %v2480_v29 = vsub.f32 %v5986_v63, %v8012_v44  ;;  %2440 = vmatprep.subr.mxu1 %v2439_v10  ;;  %2015 = vmatprep.subr.mxu0 %v5997_v55  ;;  %v2469_v44 = vand.u32 4294901760, %v2468_v31  ;;  %v8015_v10 = vand.u32 4294901760, %v6006_v0  ;;  %v8016_v42 = vand.u32 4294901760, %v6036_v26  ;;  %v342_v31 = vpop.f32.mrf.mxu0 }
 0x15d   :  { %v2486_v48 = vsub.f32 %v6018_v7, %v8013_v22  ;;  %2446 = vmatpush2.msra.mxu1 %v2445_v49  ;;  %8014 = vst [vmem:[#allocation180_spill] sm:$0xff] %v6091_v24  ;;  %2017 = vmatpush2.msra.mxu0 %v5993_v60  ;;  %v2475_v22 = vand.u32 4294901760, %v2474_v23  ;;  %v8017_v55 = vand.u32 4294901760, %v6023_v2  ;;  %v8018_v30 = vand.u32 4294901760, %v6053_v5 }
 0x15e   :  { %v2492_v37 = vsub.f32 %v6006_v0, %v8015_v10  ;;  %2452 = vmatprep.subr.mxu1 %v2451_v38  ;;  %v2498_v49 = vsub.f32 %v6036_v26, %v8016_v42  ;;  %2019 = vmatprep.subr.mxu0 %v6014_v51  ;;  %v2481_v20 = vand.u32 4294901760, %v2480_v29  ;;  %v8019_v29 = vand.u32 4294901760, %v6057_v9 }
 0x15f   :  { %2458 = vmatpush2.msra.mxu1 %v2457_v47  ;;  %v2504_v10 = vsub.f32 %v6023_v2, %v8017_v55  ;;  %2021 = vmatpush2.msra.mxu0 %v6025_v59  ;;  %v2487_v23 = vand.u32 4294901760, %v2486_v48  ;;  %v2510_v42 = vsub.f32 %v6053_v5, %v8018_v30  ;;  %v8020_v59 = vand.u32 4294901760, %v6071_v39 }
 0x160   :  { %2464 = vmatprep.subr.mxu1 %v2463_v53  ;;  %2023 = vmatprep.subr.mxu0 %v6032_v35  ;;  %v2493_v47 = vand.u32 4294901760, %v2492_v37  ;;  %v2516_v55 = vsub.f32 %v6057_v9, %v8019_v29  ;;  %v356_v53 = vpop.f32.mrf.mxu0  ;;  %v2499_v48 = vand.u32 4294901760, %v2498_v49  ;;  %v8021_v37 = vand.u32 4294901760, %v6075_v4  ;;  %v837_v29 = vpop.f32.mrf.mxu1 }
 0x161   :  { %2470 = vmatpush2.msra.mxu1 %v2469_v44  ;;  %2025 = vmatpush2.msra.mxu0 %v6042_v46  ;;  %v2522_v30 = vsub.f32 %v6071_v39, %v8020_v59  ;;  %v2505_v44 = vand.u32 4294901760, %v2504_v10  ;;  %v8022_v49 = vand.u32 4294901760, %v6087_v18  ;;  %v6129_v46 = vadd.f32 %v837_v29, %v340_v11  ;;  %v8023_v59 = vld [vmem:[#allocation116_spill] sm:$0xff] }
 0x162   :  { %2476 = vmatprep.subr.mxu1 %v2475_v22  ;;  %2027 = vmatprep.subr.mxu0 %v6049_v6  ;;  %v2528_v32 = vsub.f32 %v6075_v4, %v8021_v37  ;;  %v358_v35 = vpop.f32.mrf.mxu0  ;;  %v2511_v22 = vand.u32 4294901760, %v2510_v42  ;;  %v8024_v10 = vand.u32 4294901760, %v6091_v24  ;;  %v839_v6 = vpop.f32.mrf.mxu1 }
 0x163   :  { %2482 = vmatpush2.msra.mxu1 %v2481_v20  ;;  %2029 = vmatpush2.msra.mxu0 %v6062_v54  ;;  %v2534_v38 = vsub.f32 %v6087_v18, %v8022_v49  ;;  %v2517_v20 = vand.u32 4294901760, %v2516_v55  ;;  %v6136_v42 = vadd.f32 %v839_v6, %v342_v31  ;;  %v8025_v54 = vld [vmem:[#allocation117_spill] sm:$0xff] }
 0x164   :  { %2488 = vmatprep.subr.mxu1 %v2487_v23  ;;  %2035 = vmatprep.mubr.f32.mxu0 %v8023_v59  ;;  %v2540_v37 = vsub.f32 %v6091_v24, %v8024_v10  ;;  %v2523_v23 = vand.u32 4294901760, %v2522_v30  ;;  %v2529_v11 = vand.u32 4294901760, %v2528_v32  ;;  %v372_v29 = vpop.f32.mrf.mxu0  ;;  %v8026_v30 = vld [vmem:[#allocation87_spill] sm:$0xff]  ;;  %v8028_v59 = vld [vmem:[#allocation89_spill] sm:$0xff] }
 0x165   :  { %2494 = vmatpush2.msra.mxu1 %v2493_v47  ;;  %2610 = vmatprep.subr.mxu0 %v5286_v61  ;;  %v2535_v47 = vand.u32 4294901760, %v2534_v38 }
 0x166   :  { %2500 = vmatprep.subr.mxu1 %v2499_v48  ;;  %2041 = vmatmul.mubr.f32.vlgmr.msra.gmra.mxu0 %v8025_v54  ;;  %v2541_v55 = vand.u32 4294901760, %v2540_v37  ;;  %v845_v49 = vpop.f32.mrf.mxu1  ;;  %v374_v48 = vpop.f32.mrf.mxu0  ;;  %v8030_v37 = vld [vmem:[#allocation91_spill] sm:$0xff] }
 0x167   :  { %2506 = vmatpush2.msra.mxu1 %v2505_v44  ;;  %2613 = vmatpush1.msra.mxu0 %v5281_v15  ;;  %v6142_v6 = vadd.f32 %v845_v49, %v356_v53  ;;  %v8027_v44 = vld [vmem:[#allocation13_spill] sm:$0xff]  ;;  %v8035_v49 = vld [vmem:[#allocation38_spill] sm:$0xff] }
 0x168   :  { %2512 = vmatprep.subr.mxu1 %v2511_v22  ;;  %2616 = vmatprep.subr.mxu0 %v5307_v40  ;;  %v847_v54 = vpop.f32.mrf.mxu1 }
 0x169   :  { %2518 = vmatpush2.msra.mxu1 %v2517_v20  ;;  %2619 = vmatpush1.msra.mxu0 %v5302_v57  ;;  %v6146_v32 = vadd.f32 %v847_v54, %v358_v35  ;;  %v8029_v20 = vld [vmem:[#allocation34_spill] sm:$0xff] }
 0x16a   :  { %2524 = vmatprep.subr.mxu1 %v2523_v23  ;;  %2622 = vmatprep.subr.mxu0 %v5314_v62  ;;  %v388_v31 = vpop.f32.mrf.mxu0  ;;  %v8031_v23 = vld [vmem:[#allocation36_spill] sm:$0xff] }
 0x16b   :  { %2530 = vmatpush2.msra.mxu1 %v2529_v11  ;;  %2625 = vmatpush1.msra.mxu0 %v5319_v45 }
 0x16c   :  { %2536 = vmatprep.subr.mxu1 %v2535_v47  ;;  %2628 = vmatprep.subr.mxu0 %v5328_v16  ;;  %v853_v38 = vpop.f32.mrf.mxu1  ;;  %v390_v53 = vpop.f32.mrf.mxu0  ;;  %v8032_v47 = vld [vmem:[#allocation93_spill] sm:$0xff] }
 0x16d   :  { %2542 = vmatpush2.msra.mxu1 %v2541_v55  ;;  %2631 = vmatpush1.msra.mxu0 %v5333_v43  ;;  %v6155_v35 = vadd.f32 %v853_v38, %v372_v29  ;;  %v8033_v29 = vld [vmem:[#allocation14_spill] sm:$0xff]  ;;  %v8034_v55 = vld [vmem:[#allocation95_spill] sm:$0xff] }
 0x16e   :  { %2546 = vmatmul.mubr.f32.vlgmr.msra.gmra.mxu1 %v7835_v25  ;;  %2634 = vmatprep.subr.mxu0 %v5358_v33  ;;  %v855_v22 = vpop.f32.mrf.mxu1  ;;  %v8036_v25 = vld [vmem:[#allocation97_spill] sm:$0xff] }
 0x16f   :  { %2882 = vmatprep.subr.mxu1 %v5260_v28  ;;  %2637 = vmatpush1.msra.mxu0 %v5363_v58  ;;  %v6161_v10 = vadd.f32 %v855_v22, %v374_v48  ;;  %v8038_v22 = vld [vmem:[#allocation99_spill] sm:$0xff]  ;;  %v8067_v58 = vld [vmem:[#allocation70_spill] sm:$0xff]  ;;  %v8068_v28 = vld [vmem:[#allocation48_spill] sm:$0xff] }
 0x170   :  { %2884 = vmatpush1.msra.mxu1 %v8026_v30  ;;  %2640 = vmatprep.subr.mxu0 %v8027_v44  ;;  %v404_v11 = vpop.f32.mrf.mxu0  ;;  %v8055_v44 = vld [vmem:[#allocation62_spill] sm:$0xff]  ;;  %v8056_v30 = vld [vmem:[#allocation16_spill] sm:$0xff] }
 0x171   :  { %2886 = vmatprep.subr.mxu1 %v8028_v59  ;;  %2643 = vmatpush1.msra.mxu0 %v8029_v20  ;;  %v8043_v20 = vld [vmem:[#allocation22_spill] sm:$0xff]  ;;  %v8044_v59 = vld [vmem:[#allocation107_spill] sm:$0xff] }
 0x172   :  { %2888 = vmatpush1.msra.mxu1 %v8030_v37  ;;  %2646 = vmatprep.subr.mxu0 %v8031_v23  ;;  %v861_v54 = vpop.f32.mrf.mxu1  ;;  %v406_v38 = vpop.f32.mrf.mxu0  ;;  %v8039_v23 = vld [vmem:[#allocation46_spill] sm:$0xff] }
 0x173   :  { %2890 = vmatprep.subr.mxu1 %v8032_v47  ;;  %2649 = vmatpush1.msra.mxu0 %v8033_v29  ;;  %v6171_v48 = vadd.f32 %v861_v54, %v388_v31  ;;  %v8040_v47 = vld [vmem:[#allocation103_spill] sm:$0xff]  ;;  %v8041_v29 = vld [vmem:[#allocation44_spill] sm:$0xff]  ;;  %v8045_v31 = vld [vmem:[#allocation21_spill] sm:$0xff] }
 0x174   :  { %2892 = vmatpush1.msra.mxu1 %v8034_v55  ;;  %2652 = vmatprep.subr.mxu0 %v8035_v49  ;;  %v863_v37 = vpop.f32.mrf.mxu1  ;;  %v8042_v49 = vld [vmem:[#allocation105_spill] sm:$0xff]  ;;  %v8046_v54 = vld [vmem:[#allocation28_spill] sm:$0xff] }
 0x175   :  { %2894 = vmatprep.subr.mxu1 %v8036_v25  ;;  %2655 = vmatpush1.msra.mxu0 %v8037_v50  ;;  %v6177_v55 = vadd.f32 %v863_v37, %v390_v53  ;;  %v8050_v37 = vld [vmem:[#allocation30_spill] sm:$0xff] }
 0x176   :  { %2896 = vmatpush1.msra.mxu1 %v8038_v22  ;;  %2658 = vmatprep.subr.mxu0 %v8039_v23  ;;  %v420_v25 = vpop.f32.mrf.mxu0  ;;  %v8047_v22 = vld [vmem:[#allocation52_spill] sm:$0xff] }
 0x177   :  { %2898 = vmatprep.subr.mxu1 %v8040_v47  ;;  %2661 = vmatpush1.msra.mxu0 %v8041_v29  ;;  %v8048_v47 = vld [vmem:[#allocation11_spill] sm:$0xff] }
 0x178   :  { %2900 = vmatpush1.msra.mxu1 %v8042_v49  ;;  %2664 = vmatprep.subr.mxu0 %v8043_v20  ;;  %v869_v23 = vpop.f32.mrf.mxu1  ;;  %v422_v50 = vpop.f32.mrf.mxu0  ;;  %v8049_v29 = vld [vmem:[#allocation23_spill] sm:$0xff]  ;;  %v8051_v20 = vld [vmem:[#allocation56_spill] sm:$0xff] }
 0x179   :  { %2902 = vmatprep.subr.mxu1 %v8044_v59  ;;  %2667 = vmatpush1.msra.mxu0 %v8045_v31  ;;  %v6187_v53 = vadd.f32 %v869_v23, %v404_v11  ;;  %v8052_v59 = vld [vmem:[#allocation32_spill] sm:$0xff]  ;;  %v8053_v31 = vld [vmem:[#allocation25_spill] sm:$0xff] }
 0x17a   :  { %2904 = vmatpush1.msra.mxu1 %v8046_v54  ;;  %2670 = vmatprep.subr.mxu0 %v8047_v22  ;;  %v871_v49 = vpop.f32.mrf.mxu1  ;;  %v8054_v22 = vld [vmem:[#allocation15_spill] sm:$0xff]  ;;  %v8057_v23 = vld [vmem:[#allocation29_spill] sm:$0xff]  ;;  %v8058_v11 = vld [vmem:[#allocation40_spill] sm:$0xff] }
 0x17b   :  { %2906 = vmatprep.subr.mxu1 %v8048_v47  ;;  %2673 = vmatpush1.msra.mxu0 %v8049_v29  ;;  %v6193_v54 = vadd.f32 %v871_v49, %v406_v38  ;;  %v8062_v38 = vld [vmem:[#allocation18_spill] sm:$0xff] }
 0x17c   :  { %2908 = vmatpush1.msra.mxu1 %v8050_v37  ;;  %2676 = vmatprep.subr.mxu0 %v8051_v20  ;;  %v436_v47 = vpop.f32.mrf.mxu0  ;;  %v8059_v37 = vld [vmem:[#allocation31_spill] sm:$0xff] }
 0x17d   :  { %2910 = vmatprep.subr.mxu1 %v8052_v59  ;;  %2679 = vmatpush1.msra.mxu0 %v8053_v31  ;;  %v8060_v59 = vld [vmem:[#allocation42_spill] sm:$0xff] }
 0x17e   :  { %2912 = vmatpush1.msra.mxu1 %v8054_v22  ;;  %2682 = vmatprep.subr.mxu0 %v8055_v44  ;;  %v877_v20 = vpop.f32.mrf.mxu1  ;;  %v438_v29 = vpop.f32.mrf.mxu0  ;;  %v8061_v31 = vld [vmem:[#allocation66_spill] sm:$0xff]  ;;  %v8063_v44 = vld [vmem:[#allocation68_spill] sm:$0xff] }
 0x17f   :  { %2914 = vmatprep.subr.mxu1 %v8056_v30  ;;  %2685 = vmatpush1.msra.mxu0 %v8057_v23  ;;  %v6203_v49 = vadd.f32 %v877_v20, %v420_v25  ;;  %v8064_v30 = vld [vmem:[#allocation19_spill] sm:$0xff]  ;;  %v8065_v23 = vld [vmem:[#allocation33_spill] sm:$0xff] }
 0x180   :  { %2916 = vmatpush1.msra.mxu1 %v8058_v11  ;;  %2688 = vmatprep.subr.mxu0 %v8059_v37  ;;  %v879_v22 = vpop.f32.mrf.mxu1  ;;  %v8066_v37 = vld [vmem:[#allocation20_spill] sm:$0xff]  ;;  %v8069_v25 = vld [vmem:[#allocation39_spill] sm:$0xff] }
 0x181   :  { %2918 = vmatprep.subr.mxu1 %v8060_v59  ;;  %2691 = vmatpush1.msra.mxu0 %v8061_v31  ;;  %v6209_v11 = vadd.f32 %v879_v22, %v422_v50  ;;  %v8072_v50 = vld [vmem:[#allocation76_spill] sm:$0xff] }
 0x182   :  { %2920 = vmatpush1.msra.mxu1 %v8062_v38  ;;  %2694 = vmatprep.subr.mxu0 %v8063_v44  ;;  %v8070_v38 = vld [vmem:[#allocation50_spill] sm:$0xff] }
 0x183   :  { %2922 = vmatprep.subr.mxu1 %v8064_v30  ;;  %2697 = vmatpush1.msra.mxu0 %v8065_v23  ;;  %v1088_v59 = vpop.f32.mrf.mxu0  ;;  %v8071_v23 = vld [vmem:[#allocation54_spill] sm:$0xff] }
 0x184   :  { %2924 = vmatpush1.msra.mxu1 %v8066_v37  ;;  %2700 = vmatprep.subr.mxu0 %v8067_v58  ;;  %v1089_v20 = vadd.f32 %v1088_v59, %v5782_v41  ;;  %v885_v30 = vpop.f32.mrf.mxu1  ;;  %v8073_v37 = vld [vmem:[#allocation24_spill] sm:$0xff]  ;;  %v8074_v41 = vld [vmem:[#allocation58_spill] sm:$0xff]  ;;  %v8075_v59 = vld [vmem:[#allocation133_spill] sm:$0xff] }
 0x185   :  { %2926 = vmatprep.subr.mxu1 %v8068_v28  ;;  %2703 = vmatpush1.msra.mxu0 %v8069_v25  ;;  %v1090_v44 = vpop.f32.mrf.mxu0  ;;  %v6220_v22 = vadd.f32 %v885_v30, %v436_v47  ;;  %v8078_v30 = vld [vmem:[#allocation136_spill] sm:$0xff] }
 0x186   :  { %2928 = vmatpush1.msra.mxu1 %v8070_v38  ;;  %2706 = vmatprep.subr.mxu0 %v5705_v27  ;;  %v1091_v58 = vadd.f32 %v1090_v44, %v5809_v3  ;;  %v887_v25 = vpop.f32.mrf.mxu1  ;;  %v8076_v38 = vld [vmem:[#allocation47_spill] sm:$0xff]  ;;  %v8079_v44 = vld [vmem:[#allocation60_spill] sm:$0xff] }
 0x187   :  { %2930 = vmatprep.subr.mxu1 %v8071_v23  ;;  %2709 = vmatpush2.msra.mxu0 %v8072_v50  ;;  %v6227_v27 = vadd.f32 %v887_v25, %v438_v29  ;;  %v8077_v23 = vld [vmem:[#allocation26_spill] sm:$0xff]  ;;  %v8081_v29 = vld [vmem:[#allocation53_spill] sm:$0xff] }
 0x188   :  { %2932 = vmatpush1.msra.mxu1 %v8073_v37  ;;  %2712 = vmatprep.subr.mxu0 %v5741_v1 }
 0x189   :  { %2934 = vmatprep.subr.mxu1 %v8074_v41  ;;  %2051 = vmatprep.mubr.f32.mxu0 %v8075_v59  ;;  %v1098_v50 = vpop.f32.mrf.mxu0  ;;  %v8080_v41 = vld [vmem:[#allocation27_spill] sm:$0xff]  ;;  %v8082_v59 = vld [vmem:[#allocation64_spill] sm:$0xff] }
 0x18a   :  { %2715 = vmatpush2.msra.mxu0 %v8076_v38  ;;  %2936 = vmatpush1.msra.mxu1 %v8077_v23  ;;  %v1099_v3 = vadd.f32 %v1098_v50, %v6129_v46  ;;  %v8083_v23 = vld [vmem:[#allocation139_spill] sm:$0xff]  ;;  %v8085_v50 = vld [vmem:[#allocation142_spill] sm:$0xff] }
 0x18b   :  { %2057 = vmatmul.mubr.f32.gmra.mxu0 %v8078_v30  ;;  %2718 = vmatprep.subr.mxu0 %v5749_v19  ;;  %v1100_v47 = vpop.f32.mrf.mxu0  ;;  %v8084_v30 = vld [vmem:[#allocation35_spill] sm:$0xff] }
 0x18c   :  { %2938 = vmatprep.subr.mxu1 %v8079_v44  ;;  %2721 = vmatpush2.msra.mxu0 %v5756_v12  ;;  %v1101_v25 = vadd.f32 %v1100_v47, %v6136_v42  ;;  %v8086_v44 = vld [vmem:[#allocation118_spill] sm:$0xff] }
 0x18d   :  { %2940 = vmatpush1.msra.mxu1 %v8080_v41  ;;  %2724 = vmatprep.subr.mxu0 %v8081_v29  ;;  %v8087_v41 = vld [vmem:[#allocation57_spill] sm:$0xff] }
 0x18e   :  { %2942 = vmatprep.subr.mxu1 %v8082_v59  ;;  %2067 = vmatprep.mubr.f32.mxu0 %v8083_v23  ;;  %v1299_v46 = vpop.f32.mrf.mxu1  ;;  %v1108_v12 = vpop.f32.mrf.mxu0  ;;  %v8088_v29 = vld [vmem:[#allocation37_spill] sm:$0xff]  ;;  %v8089_v23 = vld [vmem:[#allocation119_spill] sm:$0xff] }
 0x18f   :  { %2727 = vmatpush2.msra.mxu0 %v5778_v34  ;;  %2944 = vmatpush1.msra.mxu1 %v8084_v30  ;;  %v6245_v19 = vadd.f32 %v1299_v46, %v1089_v20  ;;  %v1109_v42 = vadd.f32 %v1108_v12, %v6142_v6  ;;  %v8090_v34 = vld [vmem:[#allocation92_spill] sm:$0xff]  ;;  %v8092_v46 = vld [vmem:[#allocation74_spill] sm:$0xff]  ;;  %v8095_v12 = vld [vmem:[#allocation41_spill] sm:$0xff] }
 0x190   :  { %2073 = vmatmul.mubr.f32.gmra.mxu0 %v8085_v50  ;;  %2552 = vmatprep.mubr.f32.mxu1 %v8086_v44  ;;  %v1301_v47 = vpop.f32.mrf.mxu1  ;;  %v1110_v30 = vpop.f32.mrf.mxu0  ;;  %v8091_v50 = vld [vmem:[#allocation72_spill] sm:$0xff]  ;;  %v8093_v44 = vld [vmem:[#allocation147_spill] sm:$0xff] }
 0x191   :  { %2730 = vmatprep.subr.mxu0 %v8087_v41  ;;  %2946 = vmatprep.subr.mxu1 %v8088_v29  ;;  %v6252_v59 = vadd.f32 %v1301_v47, %v1091_v58  ;;  %v1111_v20 = vadd.f32 %v1110_v30, %v6146_v32  ;;  %v8094_v29 = vld [vmem:[#allocation63_spill] sm:$0xff] }
 0x192   :  { %2554 = vmatmul.mubr.f32.gmra.mxu1 %v8089_v23  ;;  %2733 = vmatpush2.msra.mxu0 %v8090_v34  ;;  %v8096_v23 = vld [vmem:[#allocation150_spill] sm:$0xff]  ;;  %v8097_v34 = vld [vmem:[#allocation121_spill] sm:$0xff] }
 0x193   :  { %2948 = vmatpush2.msra.mxu1 %v8091_v50  ;;  %2736 = vmatprep.subr.mxu0 %v5848_v17  ;;  %v8098_v50 = vld [vmem:[#allocation65_spill] sm:$0xff]  ;;  %v8099_v17 = vld [vmem:[#allocation43_spill] sm:$0xff] }
 0x194   :  { %2950 = vmatprep.subr.mxu1 %v8092_v46  ;;  %2083 = vmatprep.mubr.f32.mxu0 %v8093_v44  ;;  %v1118_v6 = vpop.f32.mrf.mxu0  ;;  %v1311_v47 = vpop.f32.mrf.mxu1  ;;  %v8100_v44 = vld [vmem:[#allocation123_spill] sm:$0xff] }
 0x195   :  { %2739 = vmatpush2.msra.mxu0 %v8094_v29  ;;  %2952 = vmatpush2.msra.mxu1 %v8095_v12  ;;  %v1119_v58 = vadd.f32 %v1118_v6, %v6155_v35  ;;  %v6266_v32 = vadd.f32 %v1311_v47, %v1099_v3  ;;  %v8101_v29 = vld [vmem:[#allocation100_spill] sm:$0xff]  ;;  %v8106_v3 = vld [vmem:[#allocation82_spill] sm:$0xff] }
 0x196   :  { %2089 = vmatmul.mubr.f32.gmra.mxu0 %v8096_v23  ;;  %2560 = vmatprep.mubr.f32.mxu1 %v8097_v34  ;;  %v1120_v30 = vpop.f32.mrf.mxu0  ;;  %v1313_v46 = vpop.f32.mrf.mxu1  ;;  %v8102_v23 = vld [vmem:[#allocation45_spill] sm:$0xff]  ;;  %v8103_v34 = vld [vmem:[#allocation102_spill] sm:$0xff]  ;;  %v8104_v6 = vld [vmem:[#allocation80_spill] sm:$0xff] }
 0x197   :  { %2742 = vmatprep.subr.mxu0 %v8098_v50  ;;  %2954 = vmatprep.subr.mxu1 %v8099_v17  ;;  %v1121_v12 = vadd.f32 %v1120_v30, %v6161_v10  ;;  %v6273_v35 = vadd.f32 %v1313_v46, %v1101_v25  ;;  %v8105_v50 = vld [vmem:[#allocation155_spill] sm:$0xff] }
 0x198   :  { %2562 = vmatmul.mubr.f32.gmra.mxu1 %v8100_v44  ;;  %2745 = vmatpush2.msra.mxu0 %v8101_v29  ;;  %v8107_v44 = vld [vmem:[#allocation158_spill] sm:$0xff]  ;;  %v8108_v29 = vld [vmem:[#allocation128_spill] sm:$0xff]  ;;  %v8110_v25 = vld [vmem:[#allocation51_spill] sm:$0xff] }
 0x199   :  { %2956 = vmatpush2.msra.mxu1 %v8102_v23  ;;  %2748 = vmatprep.subr.mxu0 %v8103_v34  ;;  %v8109_v23 = vld [vmem:[#allocation83_spill] sm:$0xff] }
 0x19a   :  { %2958 = vmatprep.subr.mxu1 %v8104_v6  ;;  %2099 = vmatprep.mubr.f32.mxu0 %v8105_v50  ;;  %v1128_v47 = vpop.f32.mrf.mxu0  ;;  %v1323_v30 = vpop.f32.mrf.mxu1  ;;  %v8111_v50 = vld [vmem:[#allocation130_spill] sm:$0xff] }
 0x19b   :  { %2751 = vmatpush2.msra.mxu0 %v5916_v52  ;;  %2960 = vmatpush2.msra.mxu1 %v8106_v3  ;;  %v1129_v10 = vadd.f32 %v1128_v47, %v6171_v48  ;;  %v6284_v46 = vadd.f32 %v1323_v30, %v1109_v42  ;;  %v8113_v47 = vld [vmem:[#allocation55_spill] sm:$0xff]  ;;  %v8115_v42 = vld [vmem:[#allocation90_spill] sm:$0xff] }
 0x19c   :  { %2105 = vmatmul.mubr.f32.gmra.mxu0 %v8107_v44  ;;  %2568 = vmatprep.mubr.f32.mxu1 %v8108_v29  ;;  %v1130_v6 = vpop.f32.mrf.mxu0  ;;  %v1325_v52 = vpop.f32.mrf.mxu1  ;;  %v8112_v44 = vld [vmem:[#allocation86_spill] sm:$0xff]  ;;  %v8114_v29 = vld [vmem:[#allocation163_spill] sm:$0xff] }
 0x19d   :  { %2754 = vmatprep.subr.mxu0 %v8109_v23  ;;  %2962 = vmatprep.subr.mxu1 %v8110_v25  ;;  %v1131_v3 = vadd.f32 %v1130_v6, %v6177_v55  ;;  %v6291_v48 = vadd.f32 %v1325_v52, %v1111_v20  ;;  %v8118_v52 = vld [vmem:[#allocation59_spill] sm:$0xff] }
 0x19e   :  { %2570 = vmatmul.mubr.f32.gmra.mxu1 %v8111_v50  ;;  %2757 = vmatpush2.msra.mxu0 %v5937_v56  ;;  %v8116_v50 = vld [vmem:[#allocation101_spill] sm:$0xff]  ;;  %v8117_v56 = vld [vmem:[#allocation135_spill] sm:$0xff] }
 0x19f   :  { %2964 = vmatpush2.msra.mxu1 %v8112_v44  ;;  %2760 = vmatprep.subr.mxu0 %v5981_v36 }
 0x1a0   :  { %2966 = vmatprep.subr.mxu1 %v8113_v47  ;;  %2115 = vmatprep.mubr.f32.mxu0 %v8114_v29  ;;  %v1138_v30 = vpop.f32.mrf.mxu0  ;;  %v1335_v6 = vpop.f32.mrf.mxu1  ;;  %v8119_v29 = vld [vmem:[#allocation138_spill] sm:$0xff] }
 0x1a1   :  { %2763 = vmatpush2.msra.mxu0 %v5971_v8  ;;  %2968 = vmatpush2.msra.mxu1 %v8115_v42  ;;  %v1139_v55 = vadd.f32 %v1138_v30, %v6187_v53  ;;  %v6302_v20 = vadd.f32 %v1335_v6, %v1119_v58  ;;  %v8121_v30 = vld [vmem:[#allocation61_spill] sm:$0xff]  ;;  %v8123_v58 = vld [vmem:[#allocation98_spill] sm:$0xff] }
 0x1a2   :  { %2121 = vmatmul.mubr.f32.gmra.mxu0 %v8116_v50  ;;  %2576 = vmatprep.mubr.f32.mxu1 %v8117_v56  ;;  %v1140_v47 = vpop.f32.mrf.mxu0  ;;  %v1337_v8 = vpop.f32.mrf.mxu1  ;;  %v8120_v50 = vld [vmem:[#allocation94_spill] sm:$0xff] }
 0x1a3   :  { %2766 = vmatprep.subr.mxu0 %v6001_v13  ;;  %2970 = vmatprep.subr.mxu1 %v8118_v52  ;;  %v1141_v42 = vadd.f32 %v1140_v47, %v6193_v54  ;;  %v6309_v53 = vadd.f32 %v1337_v8, %v1121_v12  ;;  %v8122_v56 = vld [vmem:[#allocation166_spill] sm:$0xff]  ;;  %v8126_v8 = vld [vmem:[#allocation104_spill] sm:$0xff] }
 0x1a4   :  { %2578 = vmatmul.mubr.f32.gmra.mxu1 %v8119_v29  ;;  %2769 = vmatpush2.msra.mxu0 %v5986_v63  ;;  %v8124_v29 = vld [vmem:[#allocation108_spill] sm:$0xff] }
 0x1a5   :  { %2972 = vmatpush2.msra.mxu1 %v8120_v50  ;;  %2772 = vmatprep.subr.mxu0 %v6018_v7  ;;  %v8125_v63 = vld [vmem:[#allocation144_spill] sm:$0xff] }
 0x1a6   :  { %2974 = vmatprep.subr.mxu1 %v8121_v30  ;;  %2131 = vmatprep.mubr.f32.mxu0 %v8122_v56  ;;  %v1148_v6 = vpop.f32.mrf.mxu0  ;;  %v1347_v47 = vpop.f32.mrf.mxu1  ;;  %v8127_v56 = vld [vmem:[#allocation146_spill] sm:$0xff] }
 0x1a7   :  { %2775 = vmatpush2.msra.mxu0 %v6006_v0  ;;  %2976 = vmatpush2.msra.mxu1 %v8123_v58  ;;  %v1149_v54 = vadd.f32 %v1148_v6, %v6203_v49  ;;  %v6320_v12 = vadd.f32 %v1347_v47, %v1129_v10  ;;  %v8129_v6 = vld [vmem:[#allocation106_spill] sm:$0xff]  ;;  %v8131_v10 = vld [vmem:[#allocation75_spill] sm:$0xff] }
 0x1a8   :  { %2137 = vmatmul.mubr.f32.gmra.mxu0 %v8124_v29  ;;  %2584 = vmatprep.mubr.f32.mxu1 %v8125_v63  ;;  %v1150_v30 = vpop.f32.mrf.mxu0  ;;  %v1349_v0 = vpop.f32.mrf.mxu1  ;;  %v8128_v29 = vld [vmem:[#allocation67_spill] sm:$0xff]  ;;  %v8130_v63 = vld [vmem:[#allocation77_spill] sm:$0xff] }
 0x1a9   :  { %2778 = vmatprep.subr.mxu0 %v6036_v26  ;;  %2978 = vmatprep.subr.mxu1 %v8126_v8  ;;  %v1151_v58 = vadd.f32 %v1150_v30, %v6209_v11  ;;  %v6327_v49 = vadd.f32 %v1349_v0, %v1131_v3  ;;  %v8134_v0 = vld [vmem:[#allocation81_spill] sm:$0xff] }
 0x1aa   :  { %2586 = vmatmul.mubr.f32.gmra.mxu1 %v8127_v56  ;;  %2781 = vmatpush2.msra.mxu0 %v6023_v2  ;;  %v8132_v56 = vld [vmem:[#allocation79_spill] sm:$0xff]  ;;  %v8133_v2 = vld [vmem:[#allocation152_spill] sm:$0xff] }
 0x1ab   :  { %2980 = vmatpush2.msra.mxu1 %v8128_v29  ;;  %2784 = vmatprep.subr.mxu0 %v6053_v5 }
 0x1ac   :  { %2982 = vmatprep.subr.mxu1 %v8129_v6  ;;  %2147 = vmatprep.mubr.f32.mxu0 %v8130_v63  ;;  %v1158_v47 = vpop.f32.mrf.mxu0  ;;  %v1359_v30 = vpop.f32.mrf.mxu1  ;;  %v8135_v63 = vld [vmem:[#allocation154_spill] sm:$0xff] }
 0x1ad   :  { %2787 = vmatpush2.msra.mxu0 %v6057_v9  ;;  %2984 = vmatpush2.msra.mxu1 %v8131_v10  ;;  %v1159_v11 = vadd.f32 %v1158_v47, %v6220_v22  ;;  %v6338_v3 = vadd.f32 %v1359_v30, %v1139_v55  ;;  %v8136_v55 = vld [vmem:[#allocation112_spill] sm:$0xff] }
 0x1ae   :  { %2153 = vmatmul.mubr.f32.gmra.mxu0 %v8132_v56  ;;  %2592 = vmatprep.mubr.f32.mxu1 %v8133_v2  ;;  %v1160_v6 = vpop.f32.mrf.mxu0  ;;  %v1361_v9 = vpop.f32.mrf.mxu1  ;;  %v8137_v56 = vld [vmem:[#allocation168_spill] sm:$0xff]  ;;  %v8142_v2 = vld [vmem:[#allocation162_spill] sm:$0xff] }
 0x1af   :  { %2790 = vmatprep.subr.mxu0 %v6071_v39  ;;  %2986 = vmatprep.subr.mxu1 %v8134_v0  ;;  %v1161_v10 = vadd.f32 %v1160_v6, %v6227_v27  ;;  %v6345_v22 = vadd.f32 %v1361_v9, %v1141_v42  ;;  %v8138_v30 = vld [vmem:[#allocation160_spill] sm:$0xff]  ;;  %v8140_v6 = vld [vmem:[#allocation171_spill] sm:$0xff]  ;;  %v8141_v9 = vand.u32 4294901760, %v5286_v61  ;;  %v8146_v61 = vld [vmem:[#allocation174_spill] sm:$0xff] }
 0x1b0   :  { %2594 = vmatmul.mubr.f32.gmra.mxu1 %v8135_v63  ;;  %2793 = vmatpush2.msra.mxu0 %v6075_v4  ;;  %v8139_v63 = vld [vmem:[#allocation113_spill] sm:$0xff] }
 0x1b1   :  { %2988 = vmatpush2.msra.mxu1 %v5944_v21  ;;  %2796 = vmatprep.subr.mxu0 %v6087_v18 }
 0x1b2   :  { %2990 = vmatprep.subr.mxu1 %v5978_v14  ;;  %2799 = vmatpush2.msra.mxu0 %v6091_v24  ;;  %v1371_v47 = vpop.f32.mrf.mxu1  ;;  %v8143_v24 = vand.u32 4294901760, %v5281_v15  ;;  %v8148_v15 = vld [vmem:[#allocation122_spill] sm:$0xff] }
 0x1b3   :  { %2802 = vmatprep.mubr.f32.mxu0 %v8136_v55  ;;  %2992 = vmatpush2.msra.mxu1 %v8137_v56  ;;  %v6353_v27 = vadd.f32 %v1371_v47, %v1149_v54  ;;  %v8145_v54 = vld [vmem:[#allocation120_spill] sm:$0xff]  ;;  %v8147_v47 = vand.u32 4294901760, %v5302_v57  ;;  %v8154_v57 = vand.u32 4294901760, %v5328_v16 }
 0x1b4   :  { %2600 = vmatprep.mubr.f32.mxu1 %v8138_v30  ;;  %2805 = vmatmul.mubr.f32.vlgmr.msra.gmra.mxu0 %v8139_v63  ;;  %v1373_v42 = vpop.f32.mrf.mxu1  ;;  %v8144_v30 = vand.u32 4294901760, %v5307_v40  ;;  %v8150_v40 = vand.u32 4294901760, %v5314_v62  ;;  %v8158_v62 = vand.u32 4294901760, %v5333_v43  ;;  %v8163_v16 = vld [vmem:[#allocation12_spill] sm:$0xff] }
 0x1b5   :  { %2994 = vmatprep.subr.mxu1 %v8140_v6  ;;  %3109 = vmatprep.subr.mxu0 %v8141_v9  ;;  %v6361_v55 = vadd.f32 %v1373_v42, %v1151_v58  ;;  %v8169_v43 = vld [vmem:[#allocation132_spill] sm:$0xff] }
 0x1b6   :  { %2602 = vmatmul.mubr.f32.gmra.mxu1 %v8142_v2  ;;  %3113 = vmatpush1.msra.mxu0 %v8143_v24  ;;  %v8149_v24 = vld [vmem:[#allocation175_spill] sm:$0xff]  ;;  %v8153_v2 = vld [vmem:[#allocation177_spill] sm:$0xff] }
 0x1b7   :  { %2996 = vmatpush2.msra.mxu1 %v5993_v60  ;;  %3117 = vmatprep.subr.mxu0 %v8144_v30  ;;  %v1383_v63 = vpop.f32.mrf.mxu1  ;;  %v8151_v30 = vld [vmem:[#allocation176_spill] sm:$0xff] }
 0x1b8   :  { %2998 = vmatprep.subr.mxu1 %v6014_v51  ;;  %2812 = vmatprep.mubr.f32.mxu0 %v8145_v54  ;;  %v6371_v9 = vadd.f32 %v1383_v63, %v1159_v11  ;;  %v8152_v54 = vand.u32 4294901760, %v5319_v45  ;;  %v8155_v11 = vld [vmem:[#allocation125_spill] sm:$0xff]  ;;  %v8156_v63 = vld [vmem:[#allocation179_spill] sm:$0xff]  ;;  %v8161_v45 = vand.u32 4294901760, %v5358_v33 }
 0x1b9   :  { %3000 = vmatpush2.msra.mxu1 %v8146_v61  ;;  %3121 = vmatpush1.msra.mxu0 %v8147_v47  ;;  %v1385_v58 = vpop.f32.mrf.mxu1  ;;  %v8157_v47 = vld [vmem:[#allocation114_spill] sm:$0xff]  ;;  %v8173_v33 = vld [vmem:[#allocation91_spill] sm:$0xff] }
 0x1ba   :  { %2815 = vmatmul.mubr.f32.gmra.mxu0 %v8148_v15  ;;  %3002 = vmatprep.subr.mxu1 %v8149_v24  ;;  %v6378_v42 = vadd.f32 %v1385_v58, %v1161_v10  ;;  %v8159_v15 = vld [vmem:[#allocation115_spill] sm:$0xff]  ;;  %v8162_v58 = vld [vmem:[#allocation85_spill] sm:$0xff] }
 0x1bb   :  { %3125 = vmatprep.subr.mxu0 %v8150_v40  ;;  %3004 = vmatpush2.msra.mxu1 %v8151_v30  ;;  %v8160_v10 = vld [vmem:[#allocation127_spill] sm:$0xff]  ;;  %v8164_v40 = vand.u32 4294901760, %v8163_v16  ;;  %v8176_v16 = vld [vmem:[#allocation36_spill] sm:$0xff] }
 0x1bc   :  { %3129 = vmatpush1.msra.mxu0 %v8152_v54  ;;  %3006 = vmatprep.subr.mxu1 %v8153_v2  ;;  %v8165_v54 = vld [vmem:[#allocation87_spill] sm:$0xff] }
 0x1bd   :  { %3133 = vmatprep.subr.mxu0 %v8154_v57  ;;  %2822 = vmatprep.mubr.f32.mxu0 %v8155_v11  ;;  %v8166_v57 = vld [vmem:[#allocation13_spill] sm:$0xff] }
 0x1be   :  { %3008 = vmatpush2.msra.mxu1 %v8156_v63  ;;  %3012 = vmatprep.mubr.f32.mxu1 %v8157_v47  ;;  %v8167_v11 = vand.u32 4294901760, %v8166_v57  ;;  %v8168_v47 = vld [vmem:[#allocation89_spill] sm:$0xff]  ;;  %v8179_v57 = vld [vmem:[#allocation14_spill] sm:$0xff] }
 0x1bf   :  { %3137 = vmatpush1.msra.mxu0 %v8158_v62  ;;  %3016 = vmatmul.mubr.f32.vlgmr.msra.gmra.mxu1 %v8159_v15  ;;  %v8170_v62 = vld [vmem:[#allocation124_spill] sm:$0xff]  ;;  %v8171_v15 = vld [vmem:[#allocation34_spill] sm:$0xff] }
 0x1c0   :  { %2825 = vmatmul.mubr.f32.gmra.mxu0 %v8160_v10  ;;  %3141 = vmatprep.subr.mxu0 %v8161_v45  ;;  %v8172_v10 = vand.u32 4294901760, %v8171_v15  ;;  %v8174_v45 = vld [vmem:[#allocation134_spill] sm:$0xff]  ;;  %v8184_v15 = vld [vmem:[#allocation97_spill] sm:$0xff] }
 0x1c1   :  { %3428 = vmatprep.subr.mxu1 %v8162_v58  ;;  %3145 = vmatpush1.msra.mxu0 %v8164_v40  ;;  %v8175_v58 = vld [vmem:[#allocation126_spill] sm:$0xff]  ;;  %v8177_v40 = vand.u32 4294901760, %v8176_v16  ;;  %v8189_v16 = vld [vmem:[#allocation99_spill] sm:$0xff] }
 0x1c2   :  { %3430 = vmatpush1.msra.mxu1 %v8165_v54  ;;  %3149 = vmatprep.subr.mxu0 %v8167_v11  ;;  %v8178_v54 = vld [vmem:[#allocation93_spill] sm:$0xff]  ;;  %v8180_v11 = vand.u32 4294901760, %v8179_v57  ;;  %v8192_v57 = vld [vmem:[#allocation46_spill] sm:$0xff] }
 0x1c3   :  { %3432 = vmatprep.subr.mxu1 %v8168_v47  ;;  %2832 = vmatprep.mubr.f32.mxu0 %v8169_v43  ;;  %v8181_v47 = vld [vmem:[#allocation95_spill] sm:$0xff]  ;;  %v8182_v43 = vld [vmem:[#allocation38_spill] sm:$0xff] }
 0x1c4   :  { %3024 = vmatprep.mubr.f32.mxu1 %v8170_v62  ;;  %3153 = vmatpush1.msra.mxu0 %v8172_v10  ;;  %v8183_v62 = vand.u32 4294901760, %v8182_v43  ;;  %v8185_v10 = vld [vmem:[#allocation141_spill] sm:$0xff]  ;;  %v8195_v43 = vld [vmem:[#allocation44_spill] sm:$0xff] }
 0x1c5   :  { %3434 = vmatpush1.msra.mxu1 %v8173_v33  ;;  %2835 = vmatmul.mubr.f32.gmra.mxu0 %v8174_v45  ;;  %v8186_v33 = vld [vmem:[#allocation129_spill] sm:$0xff] }
 0x1c6   :  { %3028 = vmatmul.mubr.f32.gmra.mxu1 %v8175_v58  ;;  %3157 = vmatprep.subr.mxu0 %v8177_v40  ;;  %v8187_v45 = vld [vmem:[#allocation17_spill] sm:$0xff]  ;;  %v8190_v40 = vld [vmem:[#allocation143_spill] sm:$0xff] }
 0x1c7   :  { %3436 = vmatprep.subr.mxu1 %v8178_v54  ;;  %3161 = vmatpush1.msra.mxu0 %v8180_v11  ;;  %v8188_v58 = vand.u32 4294901760, %v8187_v45  ;;  %v8191_v54 = vld [vmem:[#allocation131_spill] sm:$0xff]  ;;  %v8193_v11 = vand.u32 4294901760, %v8192_v57  ;;  %v8205_v57 = vld [vmem:[#allocation28_spill] sm:$0xff] }
 0x1c8   :  { %3438 = vmatpush1.msra.mxu1 %v8181_v47  ;;  %3165 = vmatprep.subr.mxu0 %v8183_v62  ;;  %v8194_v47 = vld [vmem:[#allocation103_spill] sm:$0xff]  ;;  %v8196_v62 = vand.u32 4294901760, %v8195_v43  ;;  %v8208_v43 = vld [vmem:[#allocation52_spill] sm:$0xff] }
 0x1c9   :  { %3440 = vmatprep.subr.mxu1 %v8184_v15  ;;  %2842 = vmatprep.mubr.f32.mxu0 %v8185_v10  ;;  %v8197_v15 = vld [vmem:[#allocation105_spill] sm:$0xff]  ;;  %v8198_v10 = vld [vmem:[#allocation22_spill] sm:$0xff]  ;;  %v8200_v45 = vld [vmem:[#allocation107_spill] sm:$0xff] }
 0x1ca   :  { %3036 = vmatprep.mubr.f32.mxu1 %v8186_v33  ;;  %3169 = vmatpush1.msra.mxu0 %v8188_v58  ;;  %v8199_v33 = vand.u32 4294901760, %v8198_v10  ;;  %v8201_v58 = vld [vmem:[#allocation149_spill] sm:$0xff]  ;;  %v8211_v10 = vld [vmem:[#allocation23_spill] sm:$0xff] }
 0x1cb   :  { %3442 = vmatpush1.msra.mxu1 %v8189_v16  ;;  %2845 = vmatmul.mubr.f32.gmra.mxu0 %v8190_v40  ;;  %v8202_v16 = vld [vmem:[#allocation137_spill] sm:$0xff] }
 0x1cc   :  { %3040 = vmatmul.mubr.f32.gmra.mxu1 %v8191_v54  ;;  %3173 = vmatprep.subr.mxu0 %v8193_v11  ;;  %v8203_v40 = vld [vmem:[#allocation21_spill] sm:$0xff]  ;;  %v8206_v11 = vld [vmem:[#allocation151_spill] sm:$0xff] }
 0x1cd   :  { %3444 = vmatprep.subr.mxu1 %v8194_v47  ;;  %3177 = vmatpush1.msra.mxu0 %v8196_v62  ;;  %v8204_v54 = vand.u32 4294901760, %v8203_v40  ;;  %v8207_v47 = vld [vmem:[#allocation140_spill] sm:$0xff]  ;;  %v8209_v62 = vand.u32 4294901760, %v8208_v43 }
 0x1ce   :  { %3446 = vmatpush1.msra.mxu1 %v8197_v15  ;;  %3181 = vmatprep.subr.mxu0 %v8199_v33  ;;  %v8210_v15 = vld [vmem:[#allocation11_spill] sm:$0xff]  ;;  %v8212_v33 = vand.u32 4294901760, %v8211_v10  ;;  %v8216_v40 = vld [vmem:[#allocation32_spill] sm:$0xff] }
 0x1cf   :  { %3448 = vmatprep.subr.mxu1 %v8200_v45  ;;  %2852 = vmatprep.mubr.f32.mxu0 %v8201_v58  ;;  %v8213_v45 = vld [vmem:[#allocation30_spill] sm:$0xff]  ;;  %v8214_v58 = vld [vmem:[#allocation56_spill] sm:$0xff]  ;;  %v8222_v10 = vld [vmem:[#allocation159_spill] sm:$0xff] }
 0x1d0   :  { %3048 = vmatprep.mubr.f32.mxu1 %v8202_v16  ;;  %3185 = vmatpush1.msra.mxu0 %v8204_v54  ;;  %v8215_v16 = vand.u32 4294901760, %v8214_v58  ;;  %v8217_v54 = vld [vmem:[#allocation157_spill] sm:$0xff]  ;;  %v8224_v58 = vld [vmem:[#allocation62_spill] sm:$0xff] }
 0x1d1   :  { %3450 = vmatpush1.msra.mxu1 %v8205_v57  ;;  %2855 = vmatmul.mubr.f32.gmra.mxu0 %v8206_v11  ;;  %v8218_v11 = vld [vmem:[#allocation145_spill] sm:$0xff] }
 0x1d2   :  { %3052 = vmatmul.mubr.f32.gmra.mxu1 %v8207_v47  ;;  %3189 = vmatprep.subr.mxu0 %v8209_v62  ;;  %v8219_v47 = vld [vmem:[#allocation25_spill] sm:$0xff] }
 0x1d3   :  { %3452 = vmatprep.subr.mxu1 %v8210_v15  ;;  %3193 = vmatpush1.msra.mxu0 %v8212_v33  ;;  %v1648_v57 = vpop.f32.mrf.mxu0  ;;  %v8220_v43 = vand.u32 4294901760, %v8219_v47  ;;  %v8221_v15 = vld [vmem:[#allocation15_spill] sm:$0xff]  ;;  %v8229_v47 = vld [vmem:[#allocation40_spill] sm:$0xff] }
 0x1d4   :  { %3454 = vmatpush1.msra.mxu1 %v8213_v45  ;;  %3197 = vmatprep.subr.mxu0 %v8215_v16  ;;  %v1649_v62 = vadd.f32 %v1648_v57, %v6245_v19  ;;  %v8223_v45 = vld [vmem:[#allocation148_spill] sm:$0xff]  ;;  %v8225_v16 = vand.u32 4294901760, %v8224_v58  ;;  %v8230_v19 = vld [vmem:[#allocation31_spill] sm:$0xff]  ;;  %v8234_v58 = vld [vmem:[#allocation153_spill] sm:$0xff] }
 0x1d5   :  { %3456 = vmatprep.subr.mxu1 %v8216_v40  ;;  %2862 = vmatprep.mubr.f32.mxu0 %v8217_v54  ;;  %v1650_v33 = vpop.f32.mrf.mxu0  ;;  %v8226_v54 = vld [vmem:[#allocation16_spill] sm:$0xff]  ;;  %v8231_v57 = vand.u32 4294901760, %v8230_v19 }
 0x1d6   :  { %3060 = vmatprep.mubr.f32.mxu1 %v8218_v11  ;;  %3201 = vmatpush1.msra.mxu0 %v8220_v43  ;;  %v1651_v40 = vadd.f32 %v1650_v33, %v6252_v59  ;;  %v8227_v11 = vld [vmem:[#allocation29_spill] sm:$0xff]  ;;  %v8235_v59 = vand.u32 4294901760, %v8061_v31  ;;  %v8244_v31 = vld [vmem:[#allocation20_spill] sm:$0xff] }
 0x1d7   :  { %3458 = vmatpush1.msra.mxu1 %v8221_v15  ;;  %2865 = vmatmul.mubr.f32.gmra.mxu0 %v8222_v10  ;;  %v8228_v63 = vand.u32 4294901760, %v8227_v11  ;;  %v8232_v15 = vld [vmem:[#allocation42_spill] sm:$0xff]  ;;  %v8233_v10 = vld [vmem:[#allocation165_spill] sm:$0xff]  ;;  %v8238_v11 = vld [vmem:[#allocation156_spill] sm:$0xff] }
 0x1d8   :  { %3064 = vmatmul.mubr.f32.gmra.mxu1 %v8223_v45  ;;  %3205 = vmatprep.subr.mxu0 %v8225_v16  ;;  %v8236_v16 = vld [vmem:[#allocation18_spill] sm:$0xff] }
 0x1d9   :  { %3460 = vmatprep.subr.mxu1 %v8226_v54  ;;  %3209 = vmatpush1.msra.mxu0 %v8228_v63  ;;  %v1656_v43 = vpop.f32.mrf.mxu0  ;;  %v8237_v63 = vld [vmem:[#allocation69_spill] sm:$0xff] }
 0x1da   :  { %3462 = vmatpush1.msra.mxu1 %v8229_v47  ;;  %3213 = vmatprep.subr.mxu0 %v8231_v57  ;;  %v1657_v45 = vadd.f32 %v1656_v43, %v6266_v32  ;;  %v8239_v47 = vld [vmem:[#allocation68_spill] sm:$0xff]  ;;  %v8241_v57 = vld [vmem:[#allocation19_spill] sm:$0xff]  ;;  %v8242_v32 = vld [vmem:[#allocation33_spill] sm:$0xff] }
 0x1db   :  { %3464 = vmatprep.subr.mxu1 %v8232_v15  ;;  %2872 = vmatprep.mubr.f32.mxu0 %v8233_v10  ;;  %v1658_v33 = vpop.f32.mrf.mxu0  ;;  %v8240_v19 = vand.u32 4294901760, %v8239_v47  ;;  %v8243_v43 = vand.u32 4294901760, %v8242_v32  ;;  %v8245_v10 = vld [vmem:[#allocation70_spill] sm:$0xff] }
 0x1dc   :  { %3072 = vmatprep.mubr.f32.mxu1 %v8234_v58  ;;  %3217 = vmatpush1.msra.mxu0 %v8235_v59  ;;  %v1659_v54 = vadd.f32 %v1658_v33, %v6273_v35  ;;  %v8246_v58 = vand.u32 4294901760, %v8245_v10  ;;  %v8247_v35 = vld [vmem:[#allocation161_spill] sm:$0xff]  ;;  %v8255_v10 = vld [vmem:[#allocation76_spill] sm:$0xff] }
 0x1dd   :  { %3466 = vmatpush1.msra.mxu1 %v8236_v16  ;;  %2875 = vmatmul.mubr.f32.gmra.mxu0 %v8237_v63 }
 0x1de   :  { %3076 = vmatmul.mubr.f32.gmra.mxu1 %v8238_v11  ;;  %3221 = vmatprep.subr.mxu0 %v8240_v19  ;;  %v1841_v15 = vpop.f32.mrf.mxu1  ;;  %v1664_v59 = vpop.f32.mrf.mxu0  ;;  %v8248_v11 = vld [vmem:[#allocation39_spill] sm:$0xff]  ;;  %v8250_v19 = vld [vmem:[#allocation50_spill] sm:$0xff] }
 0x1df   :  { %3468 = vmatprep.subr.mxu1 %v8241_v57  ;;  %3225 = vmatpush1.msra.mxu0 %v8243_v43  ;;  %v6484_v16 = vadd.f32 %v1841_v15, %v1649_v62  ;;  %v1665_v33 = vadd.f32 %v1664_v59, %v6284_v46  ;;  %v8249_v47 = vand.u32 4294901760, %v8248_v11  ;;  %v8251_v43 = vld [vmem:[#allocation164_spill] sm:$0xff]  ;;  %v8254_v15 = vld [vmem:[#allocation54_spill] sm:$0xff]  ;;  %v8256_v46 = vand.u32 4294901760, %v8255_v10 }
 0x1e0   :  { %3470 = vmatpush1.msra.mxu1 %v8244_v31  ;;  %3229 = vmatprep.subr.mxu0 %v8246_v58  ;;  %v1843_v63 = vpop.f32.mrf.mxu1  ;;  %v1666_v57 = vpop.f32.mrf.mxu0  ;;  %v8252_v31 = vld [vmem:[#allocation78_spill] sm:$0xff]  ;;  %v8257_v58 = vand.u32 4294901760, %v5741_v1  ;;  %v8263_v1 = vld [vmem:[#allocation49_spill] sm:$0xff] }
 0x1e1   :  { %3472 = vmatprep.subr.mxu1 %v8068_v28  ;;  %3084 = vmatprep.mubr.f32.mxu1 %v8247_v35  ;;  %v6492_v32 = vadd.f32 %v1843_v63, %v1651_v40  ;;  %v8253_v62 = vand.u32 4294901760, %v8252_v31  ;;  %v1667_v28 = vadd.f32 %v1666_v57, %v6291_v48  ;;  %v8258_v40 = vld [vmem:[#allocation58_spill] sm:$0xff]  ;;  %v8259_v35 = vld [vmem:[#allocation71_spill] sm:$0xff]  ;;  %v8260_v48 = vand.u32 4294901760, %v8076_v38 }
 0x1e2   :  { %3233 = vmatpush1.msra.mxu0 %v8249_v47  ;;  %3474 = vmatpush1.msra.mxu1 %v8250_v19  ;;  %v8261_v47 = vld [vmem:[#allocation26_spill] sm:$0xff]  ;;  %3709 = vtanh.f32 %v6484_v16 }
 0x1e3   :  { %3088 = vmatmul.mubr.f32.gmra.mxu1 %v8251_v43  ;;  %3237 = vmatprep.subr.mxu0 %v8253_v62  ;;  %v8264_v43 = vand.u32 4294901760, %v8263_v1  ;;  %3711 = vtanh.f32 %v6492_v32 }
 0x1e4   :  { %3476 = vmatprep.subr.mxu1 %v8254_v15  ;;  %3241 = vmatpush2.msra.mxu0 %v8256_v46  ;;  %v1672_v59 = vpop.f32.mrf.mxu0  ;;  %v1849_v11 = vpop.f32.mrf.mxu1  ;;  %v8265_v15 = vld [vmem:[#allocation60_spill] sm:$0xff]  ;;  %v8268_v46 = vld [vmem:[#allocation27_spill] sm:$0xff] }
 0x1e5   :  { %3478 = vmatpush1.msra.mxu1 %v8073_v37  ;;  %3245 = vmatprep.subr.mxu0 %v8257_v58  ;;  %v1673_v63 = vadd.f32 %v1672_v59, %v6302_v20  ;;  %v6510_v19 = vadd.f32 %v1849_v11, %v1657_v45  ;;  %v8262_v37 = vld [vmem:[#allocation167_spill] sm:$0xff]  ;;  %v8266_v20 = vld [vmem:[#allocation84_spill] sm:$0xff]  ;;  %v8269_v45 = vld [vmem:[#allocation53_spill] sm:$0xff] }
 0x1e6   :  { %3480 = vmatprep.subr.mxu1 %v8258_v40  ;;  %3096 = vmatprep.mubr.f32.mxu1 %v8259_v35  ;;  %v1674_v57 = vpop.f32.mrf.mxu0  ;;  %v1851_v62 = vpop.f32.mrf.mxu1  ;;  %v8267_v10 = vand.u32 4294901760, %v8266_v20  ;;  %v8270_v58 = vand.u32 4294901760, %v8269_v45  ;;  %v8271_v59 = vld [vmem:[#allocation64_spill] sm:$0xff]  ;;  %v8282_v45 = vld [vmem:[#allocation74_spill] sm:$0xff] }
 0x1e7   :  { %3249 = vmatpush2.msra.mxu0 %v8260_v48  ;;  %3482 = vmatpush1.msra.mxu1 %v8261_v47  ;;  %v1675_v31 = vadd.f32 %v1674_v57, %v6309_v53  ;;  %v6519_v38 = vadd.f32 %v1851_v62, %v1659_v54  ;;  %v8272_v40 = vld [vmem:[#allocation88_spill] sm:$0xff]  ;;  %v8274_v53 = vld [vmem:[#allocation35_spill] sm:$0xff]  ;;  %v8275_v48 = vand.u32 4294901760, %v8087_v41  ;;  %v8276_v57 = vld [vmem:[#allocation37_spill] sm:$0xff]  ;;  %3713 = vtanh.f32 %v6510_v19 }
 0x1e8   :  { %3100 = vmatmul.mubr.f32.gmra.mxu1 %v8262_v37  ;;  %3253 = vmatprep.subr.mxu0 %v8264_v43  ;;  %v8273_v35 = vand.u32 4294901760, %v8272_v40  ;;  %v8277_v37 = vld [vmem:[#allocation92_spill] sm:$0xff]  ;;  %v8285_v40 = vld [vmem:[#allocation41_spill] sm:$0xff] }
 0x1e9   :  { %3484 = vmatprep.subr.mxu1 %v8265_v15  ;;  %3257 = vmatpush2.msra.mxu0 %v8267_v10  ;;  %v8278_v1 = vand.u32 4294901760, %v8277_v37  ;;  %v8279_v15 = vld [vmem:[#allocation72_spill] sm:$0xff]  ;;  %3715 = vtanh.f32 %v6519_v38 }
 0x1ea   :  { %3486 = vmatpush1.msra.mxu1 %v8268_v46  ;;  %3261 = vmatprep.subr.mxu0 %v8270_v58  ;;  %v1680_v11 = vpop.f32.mrf.mxu0  ;;  %v1857_v54 = vpop.f32.mrf.mxu1  ;;  %v8280_v20 = vld [vmem:[#allocation96_spill] sm:$0xff] }
 0x1eb   :  { %3488 = vmatprep.subr.mxu1 %v8271_v59  ;;  %3265 = vmatpush2.msra.mxu0 %v8273_v35  ;;  %v1681_v47 = vadd.f32 %v1680_v11, %v6320_v12  ;;  %v6534_v43 = vadd.f32 %v1857_v54, %v1665_v33  ;;  %v8281_v10 = vand.u32 4294901760, %v8280_v20  ;;  %v8283_v12 = vld [vmem:[#allocation63_spill] sm:$0xff]  ;;  %v8286_v33 = vld [vmem:[#allocation65_spill] sm:$0xff]  ;;  %v8288_v11 = vld [vmem:[#allocation100_spill] sm:$0xff]  ;;  %v8291_v54 = vand.u32 4294901760, %v8103_v34 }
 0x1ec   :  { %3490 = vmatpush1.msra.mxu1 %v8274_v53  ;;  %3269 = vmatprep.subr.mxu0 %v8275_v48  ;;  %v1682_v62 = vpop.f32.mrf.mxu0  ;;  %v1859_v41 = vpop.f32.mrf.mxu1  ;;  %v8284_v58 = vand.u32 4294901760, %v8283_v12  ;;  %v8287_v35 = vand.u32 4294901760, %v8286_v33  ;;  %v8289_v53 = vand.u32 4294901760, %v8288_v11  ;;  %v8292_v37 = vld [vmem:[#allocation80_spill] sm:$0xff]  ;;  %v8295_v20 = vld [vmem:[#allocation82_spill] sm:$0xff] }
 0x1ed   :  { %3492 = vmatprep.subr.mxu1 %v8276_v57  ;;  %3273 = vmatpush2.msra.mxu0 %v8278_v1  ;;  %v1683_v46 = vadd.f32 %v1682_v62, %v6327_v49  ;;  %v6543_v59 = vadd.f32 %v1859_v41, %v1667_v28  ;;  %v8290_v49 = vld [vmem:[#allocation45_spill] sm:$0xff]  ;;  %3717 = vtanh.f32 %v6534_v43 }
 0x1ee   :  { %3494 = vmatpush2.msra.mxu1 %v8279_v15  ;;  %3277 = vmatprep.subr.mxu0 %v8281_v10  ;;  %v8293_v1 = vld [vmem:[#allocation73_spill] sm:$0xff]  ;;  %v8296_v10 = vand.u32 4294901760, %v8109_v23 }
 0x1ef   :  { %3496 = vmatprep.subr.mxu1 %v8282_v45  ;;  %3281 = vmatpush2.msra.mxu0 %v8284_v58  ;;  %v8294_v62 = vand.u32 4294901760, %v8293_v1  ;;  %v8300_v58 = vld [vmem:[#allocation55_spill] sm:$0xff]  ;;  %3719 = vtanh.f32 %v6543_v59 }
 0x1f0   :  { %3498 = vmatpush2.msra.mxu1 %v8285_v40  ;;  %3285 = vmatprep.subr.mxu0 %v8287_v35  ;;  %v1688_v48 = vpop.f32.mrf.mxu0  ;;  %v1865_v28 = vpop.f32.mrf.mxu1  ;;  %v8301_v40 = vld [vmem:[#allocation169_spill] sm:$0xff] }
 0x1f1   :  { %3500 = vmatprep.subr.mxu1 %v8099_v17  ;;  %3289 = vmatpush2.msra.mxu0 %v8289_v53  ;;  %v1689_v57 = vadd.f32 %v1688_v48, %v6338_v3  ;;  %v6558_v15 = vadd.f32 %v1865_v28, %v1673_v63  ;;  %v8297_v3 = vld [vmem:[#allocation109_spill] sm:$0xff]  ;;  %v8299_v63 = vand.u32 4294901760, %v5981_v36  ;;  %v8302_v23 = vand.u32 4294901760, %v8301_v40 }
 0x1f2   :  { %3502 = vmatpush2.msra.mxu1 %v8290_v49  ;;  %3293 = vmatprep.subr.mxu0 %v8291_v54  ;;  %v1690_v17 = vpop.f32.mrf.mxu0  ;;  %v1867_v34 = vpop.f32.mrf.mxu1  ;;  %v8298_v45 = vand.u32 4294901760, %v8297_v3  ;;  %v8307_v48 = vand.u32 4294901760, %v6018_v7  ;;  %v8308_v54 = vld [vmem:[#allocation61_spill] sm:$0xff]  ;;  %v8320_v3 = vand.u32 4294901760, %v6071_v39 }
 0x1f3   :  { %3504 = vmatprep.subr.mxu1 %v8292_v37  ;;  %3297 = vmatpush2.msra.mxu0 %v8294_v62  ;;  %v1691_v41 = vadd.f32 %v1690_v17, %v6345_v22  ;;  %v6567_v12 = vadd.f32 %v1867_v34, %v1675_v31  ;;  %v8303_v22 = vld [vmem:[#allocation90_spill] sm:$0xff]  ;;  %v8319_v34 = vld [vmem:[#allocation75_spill] sm:$0xff]  ;;  %3721 = vtanh.f32 %v6558_v15 }
 0x1f4   :  { %3506 = vmatpush2.msra.mxu1 %v8295_v20  ;;  %3301 = vmatprep.subr.mxu0 %v8296_v10  ;;  %v8311_v37 = vld [vmem:[#allocation98_spill] sm:$0xff] }
 0x1f5   :  { %3508 = vmatprep.subr.mxu1 %v8110_v25  ;;  %3305 = vmatpush2.msra.mxu0 %v8298_v45  ;;  %v1696_v33 = vpop.f32.mrf.mxu0  ;;  %v8304_v25 = vand.u32 4294901760, %v6001_v13  ;;  %v8316_v17 = vld [vmem:[#allocation106_spill] sm:$0xff]  ;;  %3723 = vtanh.f32 %v6567_v12 }
 0x1f6   :  { %3510 = vmatpush2.msra.mxu1 %v8112_v44  ;;  %3309 = vmatprep.subr.mxu0 %v8299_v63  ;;  %v1697_v35 = vadd.f32 %v1696_v33, %v6353_v27  ;;  %v8305_v44 = vld [vmem:[#allocation170_spill] sm:$0xff]  ;;  %v8309_v27 = vld [vmem:[#allocation172_spill] sm:$0xff]  ;;  %v8334_v33 = vld [vmem:[#allocation123_spill] sm:$0xff] }
 0x1f7   :  { %3512 = vmatprep.subr.mxu1 %v8300_v58  ;;  %3313 = vmatpush2.msra.mxu0 %v8302_v23  ;;  %v1873_v31 = vpop.f32.mrf.mxu1  ;;  %v8306_v11 = vand.u32 4294901760, %v8305_v44  ;;  %v1698_v53 = vpop.f32.mrf.mxu0  ;;  %v8310_v28 = vand.u32 4294901760, %v8309_v27  ;;  %v8317_v20 = vld [vmem:[#allocation178_spill] sm:$0xff]  ;;  %v8323_v63 = vld [vmem:[#allocation180_spill] sm:$0xff] }
 0x1f8   :  { %3514 = vmatpush2.msra.mxu1 %v8303_v22  ;;  %3317 = vmatprep.subr.mxu0 %v8304_v25  ;;  %v6582_v36 = vadd.f32 %v1873_v31, %v1681_v47  ;;  %v1699_v49 = vadd.f32 %v1698_v53, %v6361_v55  ;;  %v8312_v47 = vand.u32 4294901760, %v6036_v26  ;;  %v8315_v55 = vand.u32 4294901760, %v6053_v5  ;;  %v8339_v22 = vld [vmem:[#allocation144_spill] sm:$0xff]  ;;  %v8340_v25 = vld [vmem:[#allocation146_spill] sm:$0xff] }
 0x1f9   :  { %3516 = vmatprep.subr.mxu1 %v8118_v52  ;;  %3321 = vmatpush2.msra.mxu0 %v8306_v11  ;;  %v1875_v13 = vpop.f32.mrf.mxu1  ;;  %v8318_v10 = vand.u32 4294901760, %v8317_v20  ;;  %v8324_v39 = vand.u32 4294901760, %v8323_v63  ;;  %v8342_v31 = vld [vmem:[#allocation154_spill] sm:$0xff]  ;;  %v8343_v44 = vld [vmem:[#allocation160_spill] sm:$0xff] }
 0x1fa   :  { %3518 = vmatpush2.msra.mxu1 %v8120_v50  ;;  %3325 = vmatprep.subr.mxu0 %v8307_v48  ;;  %v6591_v52 = vadd.f32 %v1875_v13, %v1683_v46  ;;  %v8313_v50 = vld [vmem:[#allocation173_spill] sm:$0xff]  ;;  %v8344_v11 = vld [vmem:[#allocation162_spill] sm:$0xff]  ;;  %3725 = vtanh.f32 %v6582_v36 }
 0x1fb   :  { %3520 = vmatprep.subr.mxu1 %v8308_v54  ;;  %3329 = vmatpush2.msra.mxu0 %v8310_v28  ;;  %v8314_v7 = vand.u32 4294901760, %v8313_v50  ;;  %v1881_v46 = vpop.f32.mrf.mxu1 }
 0x1fc   :  { %3522 = vmatpush2.msra.mxu1 %v8311_v37  ;;  %3333 = vmatprep.subr.mxu0 %v8312_v47  ;;  %v1704_v1 = vpop.f32.mrf.mxu0  ;;  %v6606_v26 = vadd.f32 %v1881_v46, %v1689_v57  ;;  %v8322_v57 = vand.u32 4294901760, %v6087_v18  ;;  %v8327_v18 = vld [vmem:[#allocation118_spill] sm:$0xff]  ;;  %3727 = vtanh.f32 %v6591_v52 }
 0x1fd   :  { %3524 = vmatprep.subr.mxu1 %v8126_v8  ;;  %3337 = vmatpush2.msra.mxu0 %v8314_v7  ;;  %v1705_v62 = vadd.f32 %v1704_v1, %v6371_v9  ;;  %v1883_v5 = vpop.f32.mrf.mxu1  ;;  %v8321_v9 = vand.u32 4294901760, %v6075_v4  ;;  %v8326_v4 = vld [vmem:[#allocation111_spill] sm:$0xff] }
 0x1fe   :  { %3526 = vmatpush2.msra.mxu1 %v8128_v29  ;;  %3341 = vmatprep.subr.mxu0 %v8315_v55  ;;  %v1706_v8 = vpop.f32.mrf.mxu0  ;;  %v6615_v45 = vadd.f32 %v1883_v5, %v1691_v41  ;;  %v8329_v41 = vld [vmem:[#allocation119_spill] sm:$0xff]  ;;  %3729 = vtanh.f32 %v6606_v26 }
 0x1ff   :  { %3528 = vmatprep.subr.mxu1 %v8316_v17  ;;  %3345 = vmatpush2.msra.mxu0 %v8318_v10  ;;  %v1707_v29 = vadd.f32 %v1706_v8, %v6378_v42  ;;  %v8325_v42 = vld [vmem:[#allocation110_spill] sm:$0xff] }
 0x200   :  { %3530 = vmatpush2.msra.mxu1 %v8319_v34  ;;  %3349 = vmatprep.subr.mxu0 %v8320_v3  ;;  %3731 = vtanh.f32 %v6615_v45 }
 0x201   :  { %3532 = vmatprep.subr.mxu1 %v8134_v0  ;;  %3353 = vmatpush2.msra.mxu0 %v8321_v9 }
 0x202   :  { %3534 = vmatpush2.msra.mxu1 %v5944_v21  ;;  %3357 = vmatprep.subr.mxu0 %v8322_v57  ;;  %v1889_v58 = vpop.f32.mrf.mxu1 }
 0x203   :  { %3536 = vmatprep.subr.mxu1 %v5978_v14  ;;  %3361 = vmatpush2.msra.mxu0 %v8324_v39  ;;  %v6625_v0 = vadd.f32 %v1889_v58, %v1697_v35  ;;  %v8341_v35 = vld [vmem:[#allocation152_spill] sm:$0xff] }
 0x204   :  { %3363 = vmatprep.mubr.f32.mxu0 %v8325_v42  ;;  %3538 = vmatpush2.msra.mxu1 %v8137_v56  ;;  %v1891_v21 = vpop.f32.mrf.mxu1 }
 0x205   :  { %3365 = vmatmul.mubr.f32.vlgmr.msra.gmra.mxu0 %v8326_v4  ;;  %3540 = vmatprep.subr.mxu1 %v8140_v6  ;;  %v6631_v14 = vadd.f32 %v1891_v21, %v1699_v49  ;;  %3733 = vtanh.f32 %v6625_v0 }
 0x206   :  { %3542 = vmatpush2.msra.mxu1 %v5993_v60  ;;  %3371 = vmatprep.mubr.f32.mxu0 %v8327_v18  ;;  %v8331_v60 = vld [vmem:[#allocation121_spill] sm:$0xff] }
 0x207   :  { %8328 = vst [vmem:[#allocation116_spill] sm:$0xff] %v6631_v14  ;;  %3544 = vmatprep.subr.mxu1 %v6014_v51  ;;  %3556 = vmatprep.mubr.f32.mxu1 %v8325_v42  ;;  %v8333_v51 = vld [vmem:[#allocation179_spill] sm:$0xff] }
 0x208   :  { %3546 = vmatpush2.msra.mxu1 %v8146_v61  ;;  %v1897_v56 = vpop.f32.mrf.mxu1  ;;  %v8335_v61 = vld [vmem:[#allocation128_spill] sm:$0xff] }
 0x209   :  { %3373 = vmatmul.mubr.f32.gmra.mxu0 %v8329_v41  ;;  %3548 = vmatprep.subr.mxu1 %v8149_v24  ;;  %v6638_v40 = vadd.f32 %v1897_v56, %v1705_v62  ;;  %v8336_v24 = vld [vmem:[#allocation130_spill] sm:$0xff] }
 0x20a   :  { %3550 = vmatpush2.msra.mxu1 %v8151_v30  ;;  %3379 = vmatprep.mubr.f32.mxu0 %v8331_v60  ;;  %v1899_v6 = vpop.f32.mrf.mxu1  ;;  %v8337_v30 = vld [vmem:[#allocation135_spill] sm:$0xff] }
 0x20b   :  { %8330 = vst [vmem:[#allocation117_spill] sm:$0xff] %v6638_v40  ;;  %3552 = vmatprep.subr.mxu1 %v8153_v2  ;;  %v6643_v23 = vadd.f32 %v1899_v6, %v1707_v29  ;;  %v8338_v2 = vld [vmem:[#allocation138_spill] sm:$0xff] }
 0x20c   :  { %3554 = vmatpush2.msra.mxu1 %v8333_v51 }
 0x20d   :  { %8332 = vst [vmem:[#allocation66_spill] sm:$0xff] %v6643_v23  ;;  %3381 = vmatmul.mubr.f32.gmra.mxu0 %v8334_v33  ;;  %3558 = vmatmul.mubr.f32.vlgmr.msra.gmra.mxu1 %v8326_v4 }
 0x20e   :  { %3387 = vmatprep.mubr.f32.mxu0 %v8335_v61  ;;  %3564 = vmatprep.mubr.f32.mxu1 %v8327_v18 }
 0x211   :  { %3389 = vmatmul.mubr.f32.gmra.mxu0 %v8336_v24  ;;  %3566 = vmatmul.mubr.f32.gmra.mxu1 %v8329_v41 }
 0x212   :  { %3395 = vmatprep.mubr.f32.mxu0 %v8337_v30  ;;  %3572 = vmatprep.mubr.f32.mxu1 %v8331_v60 }
 0x215   :  { %3397 = vmatmul.mubr.f32.gmra.mxu0 %v8338_v2  ;;  %3574 = vmatmul.mubr.f32.gmra.mxu1 %v8334_v33 }
 0x216   :  { %3403 = vmatprep.mubr.f32.mxu0 %v8339_v22  ;;  %3580 = vmatprep.mubr.f32.mxu1 %v8335_v61 }
 0x219   :  { %3405 = vmatmul.mubr.f32.gmra.mxu0 %v8340_v25  ;;  %3582 = vmatmul.mubr.f32.gmra.mxu1 %v8336_v24 }
 0x21a   :  { %3411 = vmatprep.mubr.f32.mxu0 %v8341_v35  ;;  %3588 = vmatprep.mubr.f32.mxu1 %v8337_v30 }
 0x21d   :  { %3413 = vmatmul.mubr.f32.gmra.mxu0 %v8342_v31  ;;  %3590 = vmatmul.mubr.f32.gmra.mxu1 %v8338_v2 }
 0x21e   :  { %3419 = vmatprep.mubr.f32.mxu0 %v8343_v44  ;;  %3596 = vmatprep.mubr.f32.mxu1 %v8339_v22 }
 0x221   :  { %3421 = vmatmul.mubr.f32.gmra.mxu0 %v8344_v11  ;;  %3598 = vmatmul.mubr.f32.gmra.mxu1 %v8340_v25 }
 0x222   :  { %3604 = vmatprep.mubr.f32.mxu1 %v8341_v35 }
 0x225   :  { %3606 = vmatmul.mubr.f32.gmra.mxu1 %v8342_v31 }
 0x226   :  { %3612 = vmatprep.mubr.f32.mxu1 %v8343_v44  ;;  %v6672_v53 = vpop.f32.mrf.mxu0 }
 0x228   :  { %v6674_v48 = vpop.f32.mrf.mxu0 }
 0x229   :  { %3614 = vmatmul.mubr.f32.gmra.mxu1 %v8344_v11 }
 0x22e   :  { %v6678_v13 = vpop.f32.mrf.mxu1 }
 0x230   :  { %v6682_v27 = vpop.f32.mrf.mxu1 }
 0x231   :  { %v2550_v16 = vadd.f32 %v6682_v27, %v6674_v48 }
 0x24b   :  { %v6676_v49 = vpop.f32.mrf.mxu0 }
 0x24d   :  { %v6680_v54 = vpop.f32.mrf.mxu0 }
 0x250   :  { %v6684_v28 = vpop.f32.mrf.mxu0 }
 0x252   :  { %v6686_v37 = vpop.f32.mrf.mxu1  ;;  %v6688_v47 = vpop.f32.mrf.mxu0 }
 0x253   :  { %v2556_v32 = vadd.f32 %v6686_v37, %v6676_v49 }
 0x254   :  { %v6690_v50 = vpop.f32.mrf.mxu1 }
 0x255   :  { %v2558_v38 = vadd.f32 %v6690_v50, %v6680_v54 }
 0x256   :  { %v6692_v7 = vpop.f32.mrf.mxu0 }
 0x258   :  { %v6694_v1 = vpop.f32.mrf.mxu1  ;;  %v6696_v55 = vpop.f32.mrf.mxu0 }
 0x259   :  { %v2564_v43 = vadd.f32 %v6694_v1, %v6684_v28 }
 0x25a   :  { %v6698_v62 = vpop.f32.mrf.mxu1 }
 0x25b   :  { %v2566_v54 = vadd.f32 %v6698_v62, %v6688_v47  ;;  %v3741_v62 = vld [vmem:[#allocation2] sm:$0xff] }
 0x25c   :  { %v6700_v46 = vpop.f32.mrf.mxu0 }
 0x25e   :  { %v6702_v17 = vpop.f32.mrf.mxu1  ;;  %v6704_v20 = vpop.f32.mrf.mxu0 }
 0x260   :  { %v6706_v10 = vpop.f32.mrf.mxu1 }
 0x261   :  { %v2574_v36 = vadd.f32 %v6706_v10, %v6696_v55 }
 0x262   :  { %v6708_v8 = vpop.f32.mrf.mxu0 }
 0x264   :  { %v6710_v34 = vpop.f32.mrf.mxu1  ;;  %v6712_v3 = vpop.f32.mrf.mxu0 }
 0x265   :  { %8345 = vst [vmem:[#allocation48_spill] sm:$0xff] %v6712_v3  ;;  %v2580_v52 = vadd.f32 %v6710_v34, %v6700_v46 }
 0x266   :  { %v6714_v29 = vpop.f32.mrf.mxu1 }
 0x267   :  { %v2582_v26 = vadd.f32 %v6714_v29, %v6704_v20 }
 0x268   :  { %v6716_v5 = vpop.f32.mrf.mxu0 }
 0x269   :  { %8346 = vst [vmem:[#allocation24_spill] sm:$0xff] %v6716_v5 }
 0x26a   :  { %v6718_v9 = vpop.f32.mrf.mxu1  ;;  %v6720_v57 = vpop.f32.mrf.mxu0 }
 0x26b   :  { %8347 = vst [vmem:[#allocation133_spill] sm:$0xff] %v6720_v57  ;;  %v2588_v45 = vadd.f32 %v6718_v9, %v6708_v8 }
 0x26c   :  { %v6722_v63 = vpop.f32.mrf.mxu1 }
 0x26d   :  { %8348 = vst [vmem:[#allocation47_spill] sm:$0xff] %v6722_v63 }
 0x26e   :  { %v6724_v39 = vpop.f32.mrf.mxu0 }
 0x26f   :  { %8349 = vst [vmem:[#allocation136_spill] sm:$0xff] %v6724_v39 }
 0x270   :  { %v6726_v58 = vpop.f32.mrf.mxu1  ;;  %v6728_v42 = vpop.f32.mrf.mxu0 }
 0x271   :  { %8350 = vst [vmem:[#allocation139_spill] sm:$0xff] %v6726_v58  ;;  %8351 = vst [vmem:[#allocation142_spill] sm:$0xff] %v6728_v42 }
 0x272   :  { %v6730_v4 = vpop.f32.mrf.mxu1 }
 0x273   :  { %8352 = vst [vmem:[#allocation57_spill] sm:$0xff] %v6730_v4 }
 0x274   :  { %v2806_v21 = vpop.f32.mrf.mxu0  ;;  %v8367_v0 = vld [vmem:[#allocation47_spill] sm:$0xff] }
 0x276   :  { %v6732_v18 = vpop.f32.mrf.mxu1  ;;  %v2808_v56 = vpop.f32.mrf.mxu0 }
 0x277   :  { %8353 = vst [vmem:[#allocation147_spill] sm:$0xff] %v6732_v18 }
 0x278   :  { %v6734_v41 = vpop.f32.mrf.mxu1 }
 0x279   :  { %8354 = vst [vmem:[#allocation150_spill] sm:$0xff] %v6734_v41 }
 0x27a   :  { %v2816_v60 = vpop.f32.mrf.mxu0 }
 0x27c   :  { %v2818_v51 = vpop.f32.mrf.mxu0 }
 0x27d   :  { %v2819_v37 = vadd.f32 %v2818_v51, %v2558_v38 }
 0x27f   :  { %v3017_v6 = vpop.f32.mrf.mxu1 }
 0x280   :  { %v2826_v61 = vpop.f32.mrf.mxu0 }
 0x281   :  { %v3019_v33 = vpop.f32.mrf.mxu1  ;;  %v2827_v50 = vadd.f32 %v2826_v61, %v2564_v43 }
 0x282   :  { %v6736_v30 = vpop.f32.mrf.mxu0 }
 0x285   :  { %v6738_v22 = vpop.f32.mrf.mxu0 }
 0x286   :  { %v3029_v24 = vpop.f32.mrf.mxu1 }
 0x287   :  { %v6742_v35 = vpop.f32.mrf.mxu0 }
 0x288   :  { %v3031_v2 = vpop.f32.mrf.mxu1  ;;  %v2839_v55 = vadd.f32 %v6742_v35, %v2574_v36  ;;  %v8371_v36 = vld [vmem:[#allocation139_spill] sm:$0xff] }
 0x28b   :  { %v6746_v44 = vpop.f32.mrf.mxu0 }
 0x28c   :  { %v6740_v25 = vpop.f32.mrf.mxu1  ;;  %v2847_v46 = vadd.f32 %v6746_v44, %v2580_v52 }
 0x28d   :  { %v6750_v41 = vpop.f32.mrf.mxu0  ;;  %v3042_v12 = vadd.f32 %v6740_v25, %v2827_v50  ;;  %v3742_v25 = vld [vmem:[#allocation2 + $0x8] sm:$0xff] }
 0x28e   :  { %v6744_v31 = vpop.f32.mrf.mxu1  ;;  %v2849_v20 = vadd.f32 %v6750_v41, %v2582_v26 }
 0x291   :  { %v6754_v18 = vpop.f32.mrf.mxu0 }
 0x292   :  { %v6748_v11 = vpop.f32.mrf.mxu1  ;;  %8355 = vst [vmem:[#allocation43_spill] sm:$0xff] %v6754_v18 }
 0x293   :  { %v6758_v4 = vpop.f32.mrf.mxu0 }
 0x294   :  { %v6752_v42 = vpop.f32.mrf.mxu1  ;;  %8356 = vst [vmem:[#allocation102_spill] sm:$0xff] %v6758_v4 }
 0x295   :  { %v3056_v34 = vadd.f32 %v6752_v42, %v2839_v55  ;;  %v8373_v55 = vld [vmem:[#allocation66_spill] sm:$0xff] }
 0x297   :  { %v6762_v23 = vpop.f32.mrf.mxu0 }
 0x298   :  { %v6756_v39 = vpop.f32.mrf.mxu1  ;;  %8357 = vst [vmem:[#allocation155_spill] sm:$0xff] %v6762_v23 }
 0x299   :  { %v6766_v5 = vpop.f32.mrf.mxu0  ;;  %v3066_v29 = vadd.f32 %v6756_v39, %v2847_v46  ;;  %v3748_v46 = vld [vmem:[#allocation2 + $0x38] sm:$0xff] }
 0x29a   :  { %v6760_v57 = vpop.f32.mrf.mxu1  ;;  %8358 = vst [vmem:[#allocation158_spill] sm:$0xff] %v6766_v5  ;;  %v2548_v5 = vadd.f32 %v6678_v13, %v6672_v53 }
 0x29b   :  { %v3068_v9 = vadd.f32 %v6760_v57, %v2849_v20 }
 0x29d   :  { %v6770_v63 = vpop.f32.mrf.mxu0 }
 0x29e   :  { %v6764_v58 = vpop.f32.mrf.mxu1  ;;  %8360 = vst [vmem:[#allocation51_spill] sm:$0xff] %v6770_v63  ;;  %v2807_v63 = vadd.f32 %v2806_v21, %v2548_v5  ;;  %v3710_v21 = vpop.eup %3709 }
 0x29f   :  { %v6775_v18 = vpop.f32.mrf.mxu0  ;;  %v3712_v28 = vpop.eup %3711 }
 0x2a0   :  { %v6768_v40 = vpop.f32.mrf.mxu1  ;;  %8362 = vst [vmem:[#allocation163_spill] sm:$0xff] %v6775_v18  ;;  %v3018_v19 = vadd.f32 %v3017_v6, %v2807_v63 }
 0x2a1   :  { %8359 = vst [vmem:[#allocation83_spill] sm:$0xff] %v6768_v40 }
 0x2a3   :  { %v6772_v3 = vpop.f32.mrf.mxu1 }
 0x2a4   :  { %8361 = vst [vmem:[#allocation86_spill] sm:$0xff] %v6772_v3 }
 0x2a5   :  { %v6777_v14 = vpop.f32.mrf.mxu1 }
 0x2a6   :  { %8363 = vst [vmem:[#allocation101_spill] sm:$0xff] %v6777_v14  ;;  %v2809_v14 = vadd.f32 %v2808_v56, %v2550_v16  ;;  %v3032_v56 = vadd.f32 %v3031_v2, %v2819_v37 }
 0x2a8   :  { %v6783_v23 = vpop.f32.mrf.mxu1  ;;  %v3020_v3 = vadd.f32 %v3019_v33, %v2809_v14 }
 0x2a9   :  { %8364 = vst [vmem:[#allocation59_spill] sm:$0xff] %v6783_v23  ;;  %v2817_v23 = vadd.f32 %v2816_v60, %v2556_v32 }
 0x2aa   :  { %v6792_v53 = vpop.f32.mrf.mxu1 }
 0x2ab   :  { %v3030_v5 = vadd.f32 %v3029_v24, %v2817_v23  ;;  %v2829_v23 = vadd.f32 %v6736_v30, %v2566_v54 }
 0x2c5   :  { %v3366_v4 = vpop.f32.mrf.mxu0 }
 0x2c6   :  { %v3367_v48 = vadd.f32 %v3366_v4, %v3018_v19 }
 0x2c7   :  { %v3368_v40 = vpop.f32.mrf.mxu0 }
 0x2c8   :  { %v3369_v63 = vadd.f32 %v3368_v40, %v3020_v3  ;;  %v2572_v40 = vadd.f32 %v6702_v17, %v6692_v7  ;;  %v3044_v7 = vadd.f32 %v6744_v31, %v2829_v23 }
 0x2c9   :  { %v3374_v18 = vpop.f32.mrf.mxu0 }
 0x2ca   :  { %v3375_v15 = vadd.f32 %v3374_v18, %v3030_v5  ;;  %v3714_v18 = vpop.eup %3713  ;;  %v2837_v24 = vadd.f32 %v6738_v22, %v2572_v40  ;;  %v8366_v40 = vld [vmem:[#allocation48_spill] sm:$0xff] }
 0x2cb   :  { %v3376_v13 = vpop.f32.mrf.mxu0  ;;  %v2590_v23 = vadd.f32 %v8367_v0, %v8366_v40  ;;  %v8385_v0 = vld [vmem:[#allocation101_spill] sm:$0xff] }
 0x2cc   :  { %v3377_v47 = vadd.f32 %v3376_v13, %v3032_v56  ;;  %v3716_v13 = vpop.eup %3715  ;;  %v3054_v10 = vadd.f32 %v6748_v11, %v2837_v24  ;;  %v3745_v56 = vld [vmem:[#allocation2 + $0x20] sm:$0xff] }
 0x2cd   :  { %v3382_v27 = vpop.f32.mrf.mxu0  ;;  %v3559_v49 = vpop.f32.mrf.mxu1 }
 0x2ce   :  { %v3560_v59 = vadd.f32 %v3559_v49, %v3367_v48  ;;  %v3383_v2 = vadd.f32 %v3382_v27, %v3042_v12  ;;  %v3743_v48 = vld [vmem:[#allocation2 + $0x10] sm:$0xff]  ;;  %v3718_v37 = vpop.eup %3717  ;;  %v8368_v12 = vld [vmem:[#allocation43_spill] sm:$0xff] }
 0x2cf   :  { %v3384_v14 = vpop.f32.mrf.mxu0  ;;  %v3561_v4 = vpop.f32.mrf.mxu1  ;;  %v2857_v8 = vadd.f32 %v8368_v12, %v2588_v45 }
 0x2d0   :  { %v3636_v60 = vadd.f32 %v3710_v21, %v3560_v59  ;;  %v3562_v6 = vadd.f32 %v3561_v4, %v3369_v63  ;;  %v3385_v38 = vadd.f32 %v3384_v14, %v3044_v7  ;;  %v3720_v5 = vpop.eup %3719  ;;  %v3744_v59 = vld [vmem:[#allocation2 + $0x18] sm:$0xff] }
 0x2d1   :  { %v3390_v1 = vpop.f32.mrf.mxu0  ;;  %v3567_v3 = vpop.f32.mrf.mxu1  ;;  %v8372_v7 = vld [vmem:[#allocation102_spill] sm:$0xff] }
 0x2d2   :  { %v3652_v51 = vadd.f32 %v3741_v62, %v3636_v60  ;;  %v3637_v33 = vadd.f32 %v3712_v28, %v3562_v6  ;;  %v3568_v61 = vadd.f32 %v3567_v3, %v3375_v15  ;;  %v3391_v63 = vadd.f32 %v3390_v1, %v3054_v10  ;;  %v3722_v14 = vpop.eup %3721  ;;  %v8365_v28 = vld [vmem:[#allocation116_spill] sm:$0xff]  ;;  %v8374_v10 = vld [vmem:[#allocation133_spill] sm:$0xff] }
 0x2d3   :  { %v3392_v17 = vpop.f32.mrf.mxu0  ;;  %v3569_v30 = vpop.f32.mrf.mxu1  ;;  %3735 = vtanh.f32 %v8365_v28  ;;  %v8384_v28 = vld [vmem:[#allocation51_spill] sm:$0xff] }
 0x2d4   :  { %3668 = vst [vmem:[#allocation7] sm:$0xff] %v3652_v51  ;;  %v3653_v16 = vadd.f32 %v3742_v25, %v3637_v33  ;;  %v3638_v32 = vadd.f32 %v3714_v18, %v3568_v61  ;;  %v3570_v19 = vadd.f32 %v3569_v30, %v3377_v47  ;;  %v3393_v4 = vadd.f32 %v3392_v17, %v3056_v34  ;;  %v3724_v1 = vpop.eup %3723  ;;  %v3746_v47 = vld [vmem:[#allocation2 + $0x28] sm:$0xff]  ;;  %v8369_v61 = vld [vmem:[#allocation117_spill] sm:$0xff] }
 0x2d5   :  { %v3398_v22 = vpop.f32.mrf.mxu0  ;;  %v3575_v31 = vpop.f32.mrf.mxu1  ;;  %3737 = vtanh.f32 %v8369_v61  ;;  %v8370_v18 = vld [vmem:[#allocation24_spill] sm:$0xff]  ;;  %v2859_v17 = vadd.f32 %v8372_v7, %v2590_v23  ;;  %v3078_v30 = vadd.f32 %v6764_v58, %v2857_v8  ;;  %v3751_v7 = vld [vmem:[#allocation2 + $0x50] sm:$0xff] }
 0x2d6   :  { %3669 = vst [vmem:[#allocation7 + $0x8] sm:$0xff] %v3653_v16  ;;  %v3654_v43 = vadd.f32 %v3743_v48, %v3638_v32  ;;  %v3639_v27 = vadd.f32 %v3716_v13, %v3570_v19  ;;  %v3576_v49 = vadd.f32 %v3575_v31, %v3383_v2  ;;  %v3399_v3 = vadd.f32 %v3398_v22, %v3066_v29  ;;  %v3726_v25 = vpop.eup %3725  ;;  %v3747_v32 = vld [vmem:[#allocation2 + $0x30] sm:$0xff] }
 0x2d7   :  { %v3400_v35 = vpop.f32.mrf.mxu0  ;;  %v3577_v11 = vpop.f32.mrf.mxu1  ;;  %v2596_v24 = vadd.f32 %v8371_v36, %v8370_v18  ;;  %3739 = vtanh.f32 %v8373_v55  ;;  %v8375_v22 = vld [vmem:[#allocation57_spill] sm:$0xff] }
 0x2d8   :  { %3670 = vst [vmem:[#allocation7 + $0x10] sm:$0xff] %v3654_v43  ;;  %v3655_v21 = vadd.f32 %v3744_v59, %v3639_v27  ;;  %v3640_v54 = vadd.f32 %v3718_v37, %v3576_v49  ;;  %v3578_v50 = vadd.f32 %v3577_v11, %v3385_v38  ;;  %v3401_v16 = vadd.f32 %v3400_v35, %v3068_v9  ;;  %v8376_v38 = vld [vmem:[#allocation155_spill] sm:$0xff]  ;;  %v3728_v37 = vpop.eup %3727 }
 0x2d9   :  { %v3406_v44 = vpop.f32.mrf.mxu0  ;;  %v3583_v42 = vpop.f32.mrf.mxu1  ;;  %v2598_v31 = vadd.f32 %v8375_v22, %v8374_v10  ;;  %v2867_v48 = vadd.f32 %v8376_v38, %v2596_v24  ;;  %v8377_v43 = vld [vmem:[#allocation83_spill] sm:$0xff] }
 0x2da   :  { %3671 = vst [vmem:[#allocation7 + $0x18] sm:$0xff] %v3655_v21  ;;  %v3656_v15 = vadd.f32 %v3745_v56, %v3640_v54  ;;  %v3641_v60 = vadd.f32 %v3720_v5, %v3578_v50  ;;  %v3584_v6 = vadd.f32 %v3583_v42, %v3391_v63  ;;  %v3080_v27 = vadd.f32 %v8377_v43, %v2859_v17  ;;  %v8378_v5 = vld [vmem:[#allocation136_spill] sm:$0xff]  ;;  %v8379_v63 = vld [vmem:[#allocation147_spill] sm:$0xff]  ;;  %v8380_v21 = vld [vmem:[#allocation158_spill] sm:$0xff]  ;;  %v3730_v29 = vpop.eup %3729 }
 0x2db   :  { %v3408_v41 = vpop.f32.mrf.mxu0  ;;  %v3585_v39 = vpop.f32.mrf.mxu1  ;;  %v3407_v26 = vadd.f32 %v3406_v44, %v3078_v30  ;;  %v2604_v59 = vadd.f32 %v8379_v63, %v8378_v5  ;;  %v2869_v54 = vadd.f32 %v8380_v21, %v2598_v31  ;;  %v8381_v50 = vld [vmem:[#allocation86_spill] sm:$0xff] }
 0x2dc   :  { %3672 = vst [vmem:[#allocation7 + $0x20] sm:$0xff] %v3656_v15  ;;  %v3657_v62 = vadd.f32 %v3746_v47, %v3641_v60  ;;  %v3642_v51 = vadd.f32 %v3722_v14, %v3584_v6  ;;  %v3586_v33 = vadd.f32 %v3585_v39, %v3393_v4  ;;  %v3090_v45 = vadd.f32 %v8381_v50, %v2867_v48  ;;  %v3749_v14 = vld [vmem:[#allocation2 + $0x40] sm:$0xff]  ;;  %v8382_v15 = vld [vmem:[#allocation142_spill] sm:$0xff]  ;;  %v3732_v9 = vpop.eup %3731 }
 0x2dd   :  { %v3414_v2 = vpop.f32.mrf.mxu0  ;;  %v3591_v57 = vpop.f32.mrf.mxu1  ;;  %v3409_v42 = vadd.f32 %v3408_v41, %v3080_v27  ;;  %v8383_v60 = vld [vmem:[#allocation150_spill] sm:$0xff]  ;;  %v2877_v40 = vadd.f32 %v8384_v28, %v2604_v59  ;;  %v3092_v23 = vadd.f32 %v8385_v0, %v2869_v54  ;;  %v3753_v48 = vld [vmem:[#allocation2 + $0x60] sm:$0xff] }
 0x2de   :  { %3673 = vst [vmem:[#allocation7 + $0x28] sm:$0xff] %v3657_v62  ;;  %v3658_v19 = vadd.f32 %v3747_v32, %v3642_v51  ;;  %v3643_v13 = vadd.f32 %v3724_v1, %v3586_v33  ;;  %v3592_v52 = vadd.f32 %v3591_v57, %v3399_v3  ;;  %v2606_v6 = vadd.f32 %v8383_v60, %v8382_v15  ;;  %v3750_v1 = vld [vmem:[#allocation2 + $0x48] sm:$0xff]  ;;  %v8386_v62 = vld [vmem:[#allocation163_spill] sm:$0xff]  ;;  %v3734_v36 = vpop.eup %3733  ;;  %v3756_v63 = vld [vmem:[#allocation2 + $0x78] sm:$0xff] }
 0x2df   :  { %v3416_v49 = vpop.f32.mrf.mxu0  ;;  %v3593_v58 = vpop.f32.mrf.mxu1  ;;  %v3415_v39 = vadd.f32 %v3414_v2, %v3090_v45  ;;  %v8387_v33 = vld [vmem:[#allocation59_spill] sm:$0xff] }
 0x2e0   :  { %3674 = vst [vmem:[#allocation7 + $0x30] sm:$0xff] %v3658_v19  ;;  %v3659_v34 = vadd.f32 %v3748_v46, %v3643_v13  ;;  %v3644_v35 = vadd.f32 %v3726_v25, %v3592_v52  ;;  %v3594_v11 = vadd.f32 %v3593_v58, %v3401_v16  ;;  %v2879_v51 = vadd.f32 %v8386_v62, %v2606_v6  ;;  %v3736_v32 = vpop.eup %3735  ;;  %v3752_v13 = vld [vmem:[#allocation2 + $0x58] sm:$0xff] }
 0x2e1   :  { %v3599_v20 = vpop.f32.mrf.mxu1  ;;  %v3422_v12 = vpop.f32.mrf.mxu0  ;;  %v3102_v61 = vadd.f32 %v8387_v33, %v2877_v40  ;;  %v3417_v24 = vadd.f32 %v3416_v49, %v3092_v23 }
 0x2e2   :  { %3675 = vst [vmem:[#allocation7 + $0x38] sm:$0xff] %v3659_v34  ;;  %v3660_v4 = vadd.f32 %v3749_v14, %v3644_v35  ;;  %v3645_v56 = vadd.f32 %v3728_v37, %v3594_v11  ;;  %v3600_v44 = vadd.f32 %v3599_v20, %v3407_v26  ;;  %v3104_v25 = vadd.f32 %v6792_v53, %v2879_v51  ;;  %v3738_v31 = vpop.eup %3737  ;;  %v3754_v53 = vld [vmem:[#allocation2 + $0x68] sm:$0xff]  ;;  %v3755_v35 = vld [vmem:[#allocation2 + $0x70] sm:$0xff] }
 0x2e3   :  { %v3601_v8 = vpop.f32.mrf.mxu1  ;;  %v3424_v2 = vpop.f32.mrf.mxu0  ;;  %v3423_v19 = vadd.f32 %v3422_v12, %v3102_v61 }
 0x2e4   :  { %3676 = vst [vmem:[#allocation7 + $0x40] sm:$0xff] %v3660_v4  ;;  %v3661_v3 = vadd.f32 %v3750_v1, %v3645_v56  ;;  %v3646_v41 = vadd.f32 %v3730_v29, %v3600_v44  ;;  %v3602_v47 = vadd.f32 %v3601_v8, %v3409_v42  ;;  %v3425_v38 = vadd.f32 %v3424_v2, %v3104_v25  ;;  %v3740_v37 = vpop.eup %3739 }
 0x2e5   :  { %v3607_v18 = vpop.f32.mrf.mxu1 }
 0x2e6   :  { %3677 = vst [vmem:[#allocation7 + $0x48] sm:$0xff] %v3661_v3  ;;  %v3662_v17 = vadd.f32 %v3751_v7, %v3646_v41  ;;  %v3647_v30 = vadd.f32 %v3732_v9, %v3602_v47  ;;  %v3608_v57 = vadd.f32 %v3607_v18, %v3415_v39 }
 0x2e7   :  { %v3609_v16 = vpop.f32.mrf.mxu1 }
 0x2e8   :  { %3678 = vst [vmem:[#allocation7 + $0x50] sm:$0xff] %v3662_v17  ;;  %v3663_v52 = vadd.f32 %v3752_v13, %v3647_v30  ;;  %v3648_v55 = vadd.f32 %v3734_v36, %v3608_v57  ;;  %v3610_v10 = vadd.f32 %v3609_v16, %v3417_v24 }
 0x2e9   :  { %v3615_v22 = vpop.f32.mrf.mxu1 }
 0x2ea   :  { %3679 = vst [vmem:[#allocation7 + $0x58] sm:$0xff] %v3663_v52  ;;  %v3664_v43 = vadd.f32 %v3753_v48, %v3648_v55  ;;  %v3649_v27 = vadd.f32 %v3736_v32, %v3610_v10  ;;  %v3616_v49 = vadd.f32 %v3615_v22, %v3423_v19 }
 0x2eb   :  { %v3617_v58 = vpop.f32.mrf.mxu1 }
 0x2ec   :  { %3680 = vst [vmem:[#allocation7 + $0x60] sm:$0xff] %v3664_v43  ;;  %v3665_v26 = vadd.f32 %v3754_v53, %v3649_v27  ;;  %v3650_v46 = vadd.f32 %v3738_v31, %v3616_v49  ;;  %v3618_v34 = vadd.f32 %v3617_v58, %v3425_v38 }
 0x2ee   :  { %3681 = vst [vmem:[#allocation7 + $0x68] sm:$0xff] %v3665_v26  ;;  %v3666_v11 = vadd.f32 %v3755_v35, %v3650_v46  ;;  %v3651_v5 = vadd.f32 %v3740_v37, %v3618_v34 }
 0x2f0   :  { %3682 = vst [vmem:[#allocation7 + $0x70] sm:$0xff] %v3666_v11  ;;  %v3667_v59 = vadd.f32 %v3756_v63, %v3651_v5 }
 0x2f2   :  { %3683 = vst [vmem:[#allocation7 + $0x78] sm:$0xff] %v3667_v59 }
 0x2f3   :  { %3808 = shalt.err (!%p3805_p0)
}
 0x2f4   :  { %3695 = dma.vmem_to_hbm [thread:$0]  %s3690_s1, 2048, %s6861_s2, [#allocation4], %s3824_s12, %s3824_s12, %s3825_s13  }
 0x2f5   :  { %3821 = dma.done.wait [#allocation4], 2048  }
 0x2f6   :  { %3822 = vsyncadd [#allocation4], 4294965248 }
 0x2f7   :  { %3699 = vsyncpa [#allocation3], 1 }
 0x2f8   :  { %3700 = vsyncpa [#allocation6], 1 }
 0x2f9   :  { %3701 = vsyncpa [#allocation4], 1 }

</bundles_post_ra>
